<compile_context>
chip_gen: v6e
topology: v6e:2x2x1
jax: 0.10.0
libtpu: 0.0.40
codegen_flags: <defaults>
</compile_context>

<pallas_src>
import math
import numpy as np
import jax
import jax.numpy as jnp
from jax.experimental import pallas as pl
from jax.experimental.pallas import tpu as pltpu


def _round_up(v, m):
    return ((v + m - 1) // m) * m


# ----------------------------- parameter construction (host-side) -----------------------------

def _hz_to_mel_slaney(f):
    f = np.asarray(f, dtype=np.float64)
    min_log_hz = 1000.0
    min_log_mel = 15.0
    logstep = math.log(6.4) / 27.0
    linear = 3.0 * f / 200.0
    logpart = min_log_mel + np.log(np.maximum(f, 1e-10) / min_log_hz) / logstep
    return np.where(f >= min_log_hz, logpart, linear)


def _mel_to_hz_slaney(m):
    m = np.asarray(m, dtype=np.float64)
    min_log_hz = 1000.0
    min_log_mel = 15.0
    logstep = math.log(6.4) / 27.0
    linear = 200.0 * m / 3.0
    logpart = min_log_hz * np.exp(logstep * (m - min_log_mel))
    return np.where(m >= min_log_mel, logpart, linear)


def melscale_fbanks(n_freqs, f_min, f_max, n_mels, sample_rate):
    """torchaudio.functional.melscale_fbanks(norm='slaney', mel_scale='slaney')."""
    all_freqs = np.linspace(0.0, sample_rate // 2, n_freqs)
    m_pts = np.linspace(_hz_to_mel_slaney(f_min), _hz_to_mel_slaney(f_max), n_mels + 2)
    f_pts = _mel_to_hz_slaney(m_pts)
    f_diff = f_pts[1:] - f_pts[:-1]                     # (n_mels + 1,)
    slopes = f_pts[None, :] - all_freqs[:, None]        # (n_freqs, n_mels + 2)
    down = -slopes[:, :-2] / f_diff[:-1]
    up = slopes[:, 2:] / f_diff[1:]
    fb = np.maximum(0.0, np.minimum(down, up))          # (n_freqs, n_mels)
    enorm = 2.0 / (f_pts[2:n_mels + 2] - f_pts[:n_mels])
    fb = fb * enorm[None, :]
    return fb.astype(np.float32)


def build_logmel_params(sample_rate, n_fft, win_length, n_mels, f_min, f_max, use_bf16=True):
    """Returns (cs, fb):
       cs: (win, 2*F_pad) fused [cos | sin] windowed real-DFT matrix (hann folded in)
       fb: (F_pad, n_mels) mel filterbank.  F_pad = round_up(n_fft//2+1, 128);
       padded frequency rows/cols are zero so results are numerically identical."""
    if win_length != n_fft:
        # TODO(synk): pad the hann window to n_fft when win_length < n_fft.
        raise NotImplementedError("win_length must equal n_fft")
    n = np.arange(n_fft, dtype=np.float64)
    k = np.arange(n_fft // 2 + 1, dtype=np.float64)
    window = 0.5 - 0.5 * np.cos(2.0 * np.pi * n / n_fft)    # torch.hann_window (periodic)
    ang = 2.0 * np.pi * np.outer(n, k) / n_fft               # (win, F)
    cos_m = window[:, None] * np.cos(ang)                    # Re part weights
    sin_m = -window[:, None] * np.sin(ang)                   # Im part weights
    fbank = melscale_fbanks(n_fft // 2 + 1, f_min, f_max, n_mels, sample_rate)  # (F, n_mels)

    n_freqs = k.shape[0]
    f_pad = _round_up(n_freqs, 128)
    cs = np.zeros((win_length, 2 * f_pad), np.float32)
    cs[:, :n_freqs] = cos_m
    cs[:, f_pad:f_pad + n_freqs] = sin_m
    fb_p = np.zeros((f_pad, n_mels), np.float32)
    fb_p[:n_freqs, :] = fbank
    dt = jnp.bfloat16 if use_bf16 else jnp.float32
    return jnp.asarray(cs, dtype=dt), jnp.asarray(fb_p, dtype=dt)


# ----------------------------- Pallas kernel (hot path) -----------------------------

def logmel_kernel(cur_ref, nxt_ref, cs_ref, fb_ref, out_ref):
    # cur_ref: (1, TF, hop)   hop-rows of reflect-padded audio for this frame tile
    # nxt_ref: (1, RPAD, hop) first hop-rows of the next tile (frame-overlap lookahead)
    # cs_ref : (win, 2*F_pad) fused windowed [cos | sin] real-DFT matrix (resident)
    # fb_ref : (F_pad, n_mels) mel filterbank (resident)
    # out_ref: (1, n_mels, TF) -- frame axis last -> lane-dense unmasked stores
    tf = cur_ref.shape[1]
    hop = cur_ref.shape[2]
    win, two_fp = cs_ref.shape
    f_pad = two_fp // 2
    r = win // hop                                            # frames-per-window overlap factor

    rows = jnp.concatenate([cur_ref[0], nxt_ref[0]], axis=0)  # (TF + RPAD, hop)
    # Build the (TF, win) frame matrix in VMEM from win/hop shifted hop-row views:
    # frame f = [rows[f], rows[f+1], ..., rows[f+r-1]] along the sample axis.
    frames = jnp.concatenate([rows[j:j + tf, :] for j in range(r)], axis=1)   # (TF, win)

    # One fused MXU matmul: [Re | Im] = frames @ [cos | sin], f32 accumulation.
    spec = jnp.dot(frames, cs_ref[...], preferred_element_type=jnp.float32)   # (TF, 2*F_pad)
    re = spec[:, :f_pad]
    im = spec[:, f_pad:]
    mag = jnp.sqrt(re * re + im * im + 1e-6)                  # LinearSpectrogram 'pow2_sqrt'

    # NN mel matmul in bf16 (f32 acc); only the small (TF, n_mels) result is transposed.
    mel = jnp.dot(mag.astype(fb_ref.dtype), fb_ref[...],
                  preferred_element_type=jnp.float32)          # (TF, n_mels)
    out_ref[0] = jnp.log(jnp.maximum(mel, 1e-5)).T             # compress -> (n_mels, TF)


def log_mel_spectrogram(x, cs, fb, win_length, hop_length,
                        frame_tile=512, vmem_limit_bytes=48 * 1024 * 1024):
    """x: (B, T) or (B, 1, T) audio. Returns (B, n_mels, n_frames) log-mel, float32."""
    if x.ndim == 3:                          # (B, 1, T) -> (B, T), as in the PyTorch module
        x = x[:, 0, :]
    x = x.astype(jnp.float32)
    win, two_fp = cs.shape
    f_pad = two_fp // 2
    n_mels = fb.shape[1]
    assert win == win_length
    assert frame_tile % 128 == 0 and frame_tile >= 128
    if win_length % hop_length != 0:
        # TODO(synk): support win_length % hop_length != 0 (needs sample-granular framing DMA).
        raise NotImplementedError("win_length must be a multiple of hop_length")
    r = win_length // hop_length

    # Reflect pad exactly like the PyTorch module (center=False stft).
    pad_l = (win_length - hop_length) // 2
    pad_r = (win_length - hop_length + 1) // 2
    y = jnp.pad(x, ((0, 0), (pad_l, pad_r)), mode="reflect")
    batch, padded_len = y.shape
    n_frames = (padded_len - win_length) // hop_length + 1
    assert n_frames >= 1

    # Tile selection: pad frames to a multiple of 128 only; pick the largest
    # 128-multiple divisor <= frame_tile that still leaves >= 4 grid steps
    # (>= 2 per v7x TensorCore).
    nf_pad = _round_up(n_frames, 128)
    cands = [c for c in range(128, frame_tile + 1, 128) if nf_pad % c == 0]
    tf = cands[0]
    for c in cands:
        if batch * (nf_pad // c) >= 4:
            tf = c
    num_tiles = nf_pad // tf
    assert r <= tf, "win/hop overlap exceeds the frame tile"

    # Lookahead rows fetched from the start of the next tile's block (r-1 rows needed).
    r_pad = max(8, _round_up(max(r - 1, 1), 8))
    if tf % r_pad != 0:
        r_pad = tf

    # Hop-row layout of the padded audio: yh[b, p, m] = y[b, p*hop + m].
    # One extra tile of zero rows so the lookahead block always exists.
    n_hop = (num_tiles + 1) * tf
    need = n_hop * hop_length
    if padded_len < need:
        y = jnp.pad(y, ((0, 0), (0, need - padded_len)))
    else:
        y = y[:, :need]
    yh = y.reshape(batch, n_hop, hop_length).astype(cs.dtype)   # bf16 halves audio DMA

    out = pl.pallas_call(
        logmel_kernel,
        out_shape=jax.ShapeDtypeStruct((batch, n_mels, nf_pad), jnp.float32),
        grid=(batch, num_tiles),
        in_specs=[
            pl.BlockSpec((1, tf, hop_length), lambda b, t: (b, t, 0)),
            pl.BlockSpec((1, r_pad, hop_length),
                         lambda b, t: (b, (t + 1) * (tf // r_pad), 0)),
            pl.BlockSpec((win, two_fp), lambda b, t: (0, 0)),     # resident across tiles
            pl.BlockSpec((f_pad, n_mels), lambda b, t: (0, 0)),   # resident across tiles
        ],
        out_specs=pl.BlockSpec((1, n_mels, tf), lambda b, t: (b, 0, t)),
        compiler_params=pltpu.CompilerParams(
            dimension_semantics=("parallel", "parallel"),
            vmem_limit_bytes=vmem_limit_bytes),
    )(yh, yh, cs, fb)

    # Drop padded frames; layout is already the PyTorch convention (B, n_mels, n_frames).
    return out[:, :, :n_frames]


# ----------------------------- demo / self-check -----------------------------

if __name__ == "__main__":
    # Module defaults scaled down (n_fft 2048 -> 512, hop 512 -> 128; n_mels kept at 128).
    sample_rate = 16000
    n_fft = 512
    win_length = 512
    hop_length = 128
    n_mels = 128
    f_min = 0.0
    f_max = float(sample_rate // 2)

    B, T = 2, 4096                                    # -> n_frames = 32

    cs, fb = build_logmel_params(sample_rate, n_fft, win_length, n_mels,
                                 f_min, f_max, use_bf16=True)

    key = jax.random.PRNGKey(0)
    x = jax.random.normal(key, (B, 1, T), dtype=jnp.float32)   # (B, 1, T) like the module

    out = log_mel_spectrogram(x, cs, fb, win_length, hop_length)
    out = jax.block_until_ready(out)
    n_frames = (T - hop_length) // hop_length + 1
    assert out.shape == (B, n_mels, n_frames), out.shape

    # Pure-JAX reference mirroring the kernel's bf16 operand quantization
    # (accumulation stays f32), so the comparison isolates kernel logic.
    f_pad = cs.shape[1] // 2
    xs = x[:, 0, :]
    pad_l = (win_length - hop_length) // 2
    pad_r = (win_length - hop_length + 1) // 2
    y = jnp.pad(xs, ((0, 0), (pad_l, pad_r)), mode="reflect")
    idx = np.arange(n_frames)[:, None] * hop_length + np.arange(win_length)[None, :]
    fr = y[:, idx].astype(jnp.bfloat16).astype(jnp.float32)
    spec = jnp.einsum("bfw,wk->bfk", fr, cs.astype(jnp.float32))
    re = spec[..., :f_pad]
    im = spec[..., f_pad:]
    mag = jnp.sqrt(re * re + im * im + 1e-6)
    mel = jnp.einsum("bfk,km->bfm",
                     mag.astype(jnp.bfloat16).astype(jnp.float32),
                     fb.astype(jnp.float32))
    ref = jnp.transpose(jnp.log(jnp.maximum(mel, 1e-5)), (0, 2, 1))
    np.testing.assert_allclose(np.asarray(out), np.asarray(ref), rtol=2e-2, atol=2e-2)

    print("KERNEL_OK")
</pallas_src>

<mosaic_0001>
module attributes {stable_mosaic.version = 11 : i64} {
  func.func @logmel_kernel(%arg0: i32, %arg1: i32, %arg2: memref<1x128x128xbf16, #tpu.memory_space<vmem>>, %arg3: memref<1x8x128xbf16, #tpu.memory_space<vmem>>, %arg4: memref<512x768xbf16, #tpu.memory_space<vmem>>, %arg5: memref<384x128xbf16, #tpu.memory_space<vmem>>, %arg6: memref<1x128x128xf32, #tpu.memory_space<vmem>>) attributes {dimension_semantics = [#tpu.dimension_semantics<parallel>, #tpu.dimension_semantics<parallel>], iteration_bounds = array<i64: 2, 1>, scalar_prefetch = 0 : i64, scratch_operands = 0 : i64, tpu.core_type = #tpu.core_type<tc>, window_params = [{transform_indices = @transform_0, window_bounds = array<i64: 1, 128, 128>}, {transform_indices = @transform_1, window_bounds = array<i64: 1, 8, 128>}, {pipeline_mode = #tpu.pipeline_mode<synchronous>, transform_indices = @transform_2, window_bounds = array<i64: 512, 768>}, {pipeline_mode = #tpu.pipeline_mode<synchronous>, transform_indices = @transform_3, window_bounds = array<i64: 384, 128>}, {transform_indices = @transform_4, window_bounds = array<i64: 1, 128, 128>}]} {
    %c0 = arith.constant 0 : index
    %c0_0 = arith.constant 0 : index
    %c0_1 = arith.constant 0 : index
    %0 = vector.load %arg2[%c0, %c0_0, %c0_1] : memref<1x128x128xbf16, #tpu.memory_space<vmem>>, vector<1x128x128xbf16>
    %1 = vector.shape_cast %0 : vector<1x128x128xbf16> to vector<128x128xbf16>
    %c0_2 = arith.constant 0 : index
    %c0_3 = arith.constant 0 : index
    %c0_4 = arith.constant 0 : index
    %2 = vector.load %arg3[%c0_2, %c0_3, %c0_4] : memref<1x8x128xbf16, #tpu.memory_space<vmem>>, vector<1x8x128xbf16>
    %3 = vector.shape_cast %2 : vector<1x8x128xbf16> to vector<8x128xbf16>
    %4 = tpu.concatenate %1, %3 in 0 : vector<128x128xbf16>, vector<8x128xbf16> -> vector<136x128xbf16>
    %5 = vector.extract_strided_slice %4 {offsets = [0, 0], sizes = [128, 128], strides = [1, 1]} : vector<136x128xbf16> to vector<128x128xbf16>
    %6 = vector.extract_strided_slice %4 {offsets = [1, 0], sizes = [128, 128], strides = [1, 1]} : vector<136x128xbf16> to vector<128x128xbf16>
    %7 = vector.extract_strided_slice %4 {offsets = [2, 0], sizes = [128, 128], strides = [1, 1]} : vector<136x128xbf16> to vector<128x128xbf16>
    %8 = vector.extract_strided_slice %4 {offsets = [3, 0], sizes = [128, 128], strides = [1, 1]} : vector<136x128xbf16> to vector<128x128xbf16>
    %9 = tpu.concatenate %5, %6, %7, %8 in 1 : vector<128x128xbf16>, vector<128x128xbf16>, vector<128x128xbf16>, vector<128x128xbf16> -> vector<128x512xbf16>
    %c0_5 = arith.constant 0 : index
    %c0_6 = arith.constant 0 : index
    %10 = vector.load %arg4[%c0_5, %c0_6] : memref<512x768xbf16, #tpu.memory_space<vmem>>, vector<512x768xbf16>
    %cst = arith.constant dense<0.000000e+00> : vector<128x768xf32>
    %11 = tpu.matmul %9, %10, %cst {dimension_numbers = #tpu.dot_dimension_numbers<[1], [0], [0], [1], [0, 0, 1, 1], [], []>} : vector<128x512xbf16>, vector<512x768xbf16>, vector<128x768xf32> -> vector<128x768xf32>
    %12 = vector.extract_strided_slice %11 {offsets = [0, 0], sizes = [128, 384], strides = [1, 1]} : vector<128x768xf32> to vector<128x384xf32>
    %13 = vector.extract_strided_slice %11 {offsets = [0, 384], sizes = [128, 384], strides = [1, 1]} : vector<128x768xf32> to vector<128x384xf32>
    %14 = arith.mulf %12, %12 : vector<128x384xf32>
    %15 = arith.mulf %13, %13 : vector<128x384xf32>
    %16 = arith.addf %14, %15 : vector<128x384xf32>
    %cst_7 = arith.constant 9.99999997E-7 : f32
    %17 = vector.broadcast %cst_7 : f32 to vector<128x384xf32>
    %18 = arith.addf %16, %17 : vector<128x384xf32>
    %19 = math.sqrt %18 : vector<128x384xf32>
    %20 = arith.truncf %19 : vector<128x384xf32> to vector<128x384xbf16>
    %c0_8 = arith.constant 0 : index
    %c0_9 = arith.constant 0 : index
    %21 = vector.load %arg5[%c0_8, %c0_9] : memref<384x128xbf16, #tpu.memory_space<vmem>>, vector<384x128xbf16>
    %cst_10 = arith.constant dense<0.000000e+00> : vector<128x128xf32>
    %22 = tpu.matmul %20, %21, %cst_10 {dimension_numbers = #tpu.dot_dimension_numbers<[1], [0], [0], [1], [0, 0, 1, 1], [], []>} : vector<128x384xbf16>, vector<384x128xbf16>, vector<128x128xf32> -> vector<128x128xf32>
    %cst_11 = arith.constant 9.99999974E-6 : f32
    %23 = vector.broadcast %cst_11 : f32 to vector<128x128xf32>
    %24 = arith.maximumf %22, %23 : vector<128x128xf32>
    %25 = math.log %24 : vector<128x128xf32>
    %26 = tpu.transpose %25, [1, 0] : vector<128x128xf32> -> vector<128x128xf32>
    %c0_12 = arith.constant 0 : index
    %c0_13 = arith.constant 0 : index
    %c0_14 = arith.constant 0 : index
    %27 = vector.load %arg6[%c0_12, %c0_13, %c0_14] : memref<1x128x128xf32, #tpu.memory_space<vmem>>, vector<1x128x128xf32>
    %28 = vector.shape_cast %27 : vector<1x128x128xf32> to vector<128x128xf32>
    %29 = vector.shape_cast %26 : vector<128x128xf32> to vector<1x128x128xf32>
    tpu.vector_store %arg6[%c0_12, %c0_13, %c0_14], %29 {strides = array<i32>} : memref<1x128x128xf32, #tpu.memory_space<vmem>>, vector<1x128x128xf32>,
    return
  }
  func.func @transform_0(%arg0: i32, %arg1: i32) -> (i32, i32, i32) {
    %c0_i32 = arith.constant 0 : i32
    %c0_i32_0 = arith.constant 0 : i32
    return %arg0, %arg1, %c0_i32 : i32, i32, i32
  }
  func.func @transform_1(%arg0: i32, %arg1: i32) -> (i32, i32, i32) {
    %c1_i32 = arith.constant 1 : i32
    %0 = arith.addi %arg1, %c1_i32 : i32
    %c16_i32 = arith.constant 16 : i32
    %1 = arith.muli %0, %c16_i32 : i32
    %c0_i32 = arith.constant 0 : i32
    %c0_i32_0 = arith.constant 0 : i32
    return %arg0, %1, %c0_i32 : i32, i32, i32
  }
  func.func @transform_2(%arg0: i32, %arg1: i32) -> (i32, i32) {
    %c0_i32 = arith.constant 0 : i32
    %c0_i32_0 = arith.constant 0 : i32
    %c0_i32_1 = arith.constant 0 : i32
    return %c0_i32, %c0_i32_0 : i32, i32
  }
  func.func @transform_3(%arg0: i32, %arg1: i32) -> (i32, i32) {
    %c0_i32 = arith.constant 0 : i32
    %c0_i32_0 = arith.constant 0 : i32
    %c0_i32_1 = arith.constant 0 : i32
    return %c0_i32, %c0_i32_0 : i32, i32
  }
  func.func @transform_4(%arg0: i32, %arg1: i32) -> (i32, i32, i32) {
    %c0_i32 = arith.constant 0 : i32
    %c0_i32_0 = arith.constant 0 : i32
    return %arg0, %c0_i32, %arg1 : i32, i32, i32
  }
}

</mosaic_0001>

<bundles_post_ra>
// kernel: tpu_custom_call.1
= control target key start
LH: loop header
LB: loop body
LE: loop exit
PB: predicated region body
PF: predicated region fallthrough
CT: control target
= control target key end

     0   :  { %s6031_s0 = inlined_call_operand.hbm [shape: bf16[2,256,128], index: 0, kind: input, shape index: {}]   ;;  %s6032_s1 = inlined_call_operand.hbm [shape: bf16[2,256,128], index: 1, kind: input, shape index: {}]   ;;  %s6033_s2 = inlined_call_operand.hbm [shape: bf16[512,768], index: 2, kind: input, shape index: {}]   ;;  %s6034_s3 = inlined_call_operand.hbm [shape: bf16[384,128], index: 3, kind: input, shape index: {}]   ;;  %s6035_s4 = inlined_call_operand.hbm [shape: f32[2,128,128], index: 4, kind: output, shape index: {}]  }
   0x1   :  { %6048 = sst [smem:[#allocation28_spill]] %s6031_s0 }
   0x2   :  { %6049 = sst [smem:[#allocation29_spill]] %s6033_s2 }
   0x3   :  { %6050 = sst [smem:[#allocation30_spill]] %s6034_s3 }
   0x4   :  { %9 = vsyncpa [#allocation3], 0 }
   0x5   :  { %11 = vsyncpa [#allocation3 + $0x1], 0 }
   0x6   :  { %12 = vsyncpa [#allocation6], 0 }
   0x7   :  { %14 = vsyncpa [#allocation6 + $0x1], 0 }
   0x8   :  { %15 = vsyncpa [#allocation9], 0 }
   0x9   :  { %16 = vsyncpa [#allocation4], 0 }
   0xa   :  { %18 = vsyncpa [#allocation4 + $0x1], 0  ;;  %s4688_s15 = smov 0   ;;  %s4690_s16 = smov 0  }
   0xb   :  { %s4692_s17 = smov 0   ;;  %s4694_s18 = smov 0  }
   0xc   :  { %s4696_s19 = smov 0   ;;  %s4698_s20 = smov 0  }
   0xd LB: > { %6051 = sst [smem:[#allocation16_spill]] %s4638_s17  ;;  %s4719_s21 = sadd.s32 4294967295, %s4650_s20   ;;  %s4650_s20 = sphi %s4698_s20, %s24_s20   ;;  %s4646_s19 = sphi %s4696_s19, %s6108_s19   ;;  %s4642_s18 = sphi %s4694_s18, %s6107_s18   ;;  %s4638_s17 = sphi %s4692_s17, %s6106_s17   ;;  %s4634_s16 = sphi %s4690_s16, %s6110_s16   ;;  %s4630_s15 = sphi %s4688_s15, %s6109_s15  }
   0xe   : > { %6052 = sst [smem:[#allocation17_spill]] %s4646_s19  ;;  %s3541_s22 = sadd.s32 4294967294, %s4650_s20  }
   0xf   : > { %p58_p0 = scmp.ne.s32.totalorder %s4634_s16, %s4630_s15  ;;  %p6036_p1 = scmp.eq.s32.totalorder %s4719_s21, 0 }
  0x10   : > { %p164_p3 = scmp.eq.s32.totalorder %s3541_s22, 1  ;;  %p3542_p5 = scmp.ge.s32.totalorder %s4650_s20, 1 }
  0x11   : > { %p4728_p4 = por %p6036_p1, %p58_p0  ;;  %p171_p7 = scmp.lt.s32.totalorder %s4650_s20, 3 }
  0x12   : > { %p4733_p6 = por %p164_p3, %p58_p0  ;;  %s4652_s26 = smov [#allocation7]  }
  0x13   : > { %p4738_p8 = pnand %p3542_p5, %p171_p7  ;;  %s183_s27 = sshll.u32 %s4652_s26, 4  ;;  %s184_s27 = int_to_ptr.vmem [resolvable:$true] %s183_s27 }
  0x14   : > { %s6054_s24 = scalar_select %p4733_p6, 1, 0 }
  0x15   : > { %p3916_p9 = pneg %p4738_p8  ;;  %s4653_s29 = smov [#allocation8]  }
  0x16   : > { %s196_s30 = sshll.u32 %s4653_s29, 4  ;;  %s4460_s5 = scalar_lea.vmem %s184_s27, 24576  ;;  %s197_s30 = int_to_ptr.vmem [resolvable:$true] %s196_s30 }
  0x17   : > { %p4747_p11 = pnand %p3916_p9, %p6036_p1  ;;  %p4461_p13 = scmp.ne.s32.totalorder %s184_s27, %s4460_s5 }
  0x18   : > { %p4468_p5 = scmp.lt.s32.totalorder %s184_s27, %s184_s27  ;;  %p4469_p7 = scmp.lt.s32.totalorder %s4460_s5, %s4460_s5 }
  0x19   : > { %p4451_p12 = pneg %p4747_p11 }
  0x1a   : > { %p4470_p10 = por %p4469_p7, %p4468_p5 }
  0x1b   : > { %p4463_p0 = pnand %p4461_p13, %p4451_p12 }
  0x1d   : > { %p4464_p3 = pneg %p4463_p0 }
  0x1f   : > { %p4471_p9 = pnand %p4470_p10, %p4464_p3 }
  0x21   : > { %4474 = shalt.err (!%p4471_p9)
}
  0x22   : > { %s4654_s6 = smov 384   ;;  %s4655_s7 = smov 24  }
  0x23   : > { %s6057_s2 = sld [smem:[#allocation29_spill]]  ;;  %s4486_s10 = scalar_lea.vmem %s197_s30, 3072 }
  0x24   : > { %p4487_p1 = scmp.ne.s32.totalorder %s197_s30, %s4486_s10  ;;  %p4494_p2 = scmp.lt.s32.totalorder %s197_s30, %s197_s30 }
  0x25   : > { %p4495_p6 = scmp.lt.s32.totalorder %s4486_s10, %s4486_s10 }
  0x26   : > { %p4489_p13 = pnand %p4487_p1, %p4451_p12 }
  0x27   : > { %p4496_p5 = por %p4495_p6, %p4494_p2 }
  0x28   : > { %p4490_p0 = pneg %p4489_p13 }
  0x29   : > { %3919 = dma.hbm_to_vmem [thread:$0]  (!%p4747_p11), %s6057_s2, 24576, %s184_s27, [#allocation6], %s4654_s6, %s4654_s6, %s4655_s7  }
  0x2a   : > { %p4497_p10 = pnand %p4496_p5, %p4490_p0 }
  0x2c   : > { %4500 = shalt.err (!%p4497_p10)
}
  0x2d   : > { %s6037_s11 = smov 64   ;;  %s4657_s12 = smov 4  }
  0x2e   : > { %s6058_s3 = sld [smem:[#allocation30_spill]]  ;;  %s36_s22 = sadd.s32 1, %s4646_s19 }
  0x2f   : > { %s45_s26 = sadd.s32 1, %s4638_s17  ;;  %p38_p1 = scmp.ge.s32.totalorder %s36_s22, 2 }
  0x30   : > { %p52_p2 = scmp.ne.s32.totalorder %s4638_s17, %s4634_s16  ;;  %p53_p6 = scmp.eq.s32.totalorder %s4650_s20, 0 }
  0x31   : > { %p3936_p12 = scmp.lt.s32.totalorder %s4650_s20, 2  ;;  %s6112_s22 = smov (%p38_p1, %s36_s22), 0 }
  0x32   : > { %6059 = sst [smem:[#allocation18_spill]] %s6112_s22  ;;  %p54_p3 = por %p53_p6, %p52_p2 }
  0x33   : > { %p6060_p7 = scmp.eq.s32.totalorder %s4719_s21, 1  ;;  %s40_s28 = ssub.s32 %s4646_s19, %s6112_s22 }
  0x34   : > { %3922 = dma.hbm_to_vmem [thread:$0]  (!%p4747_p11), %s6058_s3, 3072, %s197_s30, [#allocation9], %s6037_s11, %s6037_s11, %s4657_s12  }
  0x35   : > { %p4782_p9 = por %p6060_p7, %p52_p2  ;;  %s4789_s29 = sand.u32 1, %s4638_s17  }
  0x36   : > { %p43_p11 = scmp.eq.s32.totalorder %s40_s28, 0  ;;  %s3546_s30 = sshll.u32 %s4789_s29, 6 }
  0x37   : > { %s3787_s5 = sshll.u32 %s4646_s19, 11  ;;  %s6063_s0 = sld [smem:[#allocation28_spill]] }
  0x38   : > { %s4794_s6 = scalar_select %p43_p11, %s4638_s17, %s45_s26  }
  0x39   : > { %s214_s10 = scalar_lea.vmem [#allocation2], %s3546_s30  ;;  %p4801_p13 = pnand %p3936_p12, %p54_p3 }
  0x3a   : > { %6062 = sst [smem:[#allocation19_spill]] %s4794_s6  ;;  %s223_s13 = sshll.u32 %s214_s10, 4  ;;  %s224_s13 = int_to_ptr.vmem [resolvable:$true] %s223_s13 }
  0x3b   : > { %s233_s11 = sand.u32 1, %s4650_s20   ;;  %s211_s28 = scalar_lea.sflag [#allocation3], %s4789_s29 }
  0x3c   : > { %p4503_p0 = pneg %p4801_p13  ;;  %s4514_s26 = scalar_lea.vmem %s224_s13, 1024 }
  0x3d   : > { %s222_s9 = scalar_lea.hbm %s6063_s0, %s3787_s5  ;;  %p4515_p5 = scmp.ne.s32.totalorder %s224_s13, %s4514_s26 }
  0x3e   : > { %s4658_s30 = smov [#allocation2]  }
  0x3f   : > { %p4517_p10 = pnand %p4515_p5, %p4503_p0  ;;  %s4519_s7 = sshll.u32 %s4658_s30, 4  ;;  %s4520_s7 = int_to_ptr.vmem [resolvable:$false] %s4519_s7 }
  0x40   : > { %s4521_s8 = scalar_lea.vmem %s4520_s7, 2048  ;;  %p4522_p2 = scmp.lt.s32.totalorder %s224_s13, %s4520_s7 }
  0x41   : > { %p4518_p1 = pneg %p4517_p10  ;;  %p4523_p6 = scmp.lt.s32.totalorder %s4521_s8, %s4514_s26 }
  0x43   : > { %p4524_p12 = por %p4523_p6, %p4522_p2 }
  0x45   : > { %p4525_p3 = pnand %p4524_p12, %p4518_p1 }
  0x47   : > { %4528 = shalt.err (!%p4525_p3)
}
  0x48   : > { %s6065_s10 = smov 64   ;;  %s3549_s0 = sshll.u32 %s4789_s29, 2 }
  0x49   : > { %3926 = dma.hbm_to_vmem [thread:$0]  (!%p4801_p13), %s222_s9, 1024, %s224_s13, %s211_s28, %s6065_s10, %s6065_s10, %s4657_s12  }
  0x4a   : > { %s3454_s30 = scalar_lea.hbm %s6032_s1, %s3787_s5  ;;  %s237_s19 = scalar_lea.vmem [#allocation5], %s3549_s0 }
  0x4b   : > { %s3455_s22 = scalar_lea.hbm %s3454_s30, 1024  ;;  %s248_s7 = sshll.u32 %s237_s19, 4  ;;  %s249_s7 = int_to_ptr.vmem [resolvable:$true] %s248_s7 }
  0x4c   : > { %s234_s26 = scalar_lea.sflag [#allocation6], %s233_s11  ;;  %s4542_s8 = scalar_lea.vmem %s249_s7, 64 }
  0x4d   : > { %p4543_p7 = scmp.ne.s32.totalorder %s249_s7, %s4542_s8  ;;  %s4659_s6 = smov [#allocation5]  }
  0x4e   : > { %s4547_s17 = sshll.u32 %s4659_s6, 4  ;;  %s4548_s17 = int_to_ptr.vmem [resolvable:$false] %s4547_s17 }
  0x4f   : > { %p4545_p11 = pnand %p4543_p7, %p4503_p0  ;;  %s4549_s12 = scalar_lea.vmem %s4548_s17, 128 }
  0x50   : > { %p4550_p10 = scmp.lt.s32.totalorder %s249_s7, %s4548_s17  ;;  %p4551_p1 = scmp.lt.s32.totalorder %s4549_s12, %s4542_s8 }
  0x51   : > { %p4546_p5 = pneg %p4545_p11 }
  0x52   : > { %p4552_p2 = por %p4551_p1, %p4550_p10 }
  0x54   : > { %p4553_p6 = pnand %p4552_p2, %p4546_p5 }
  0x56   : > { %4556 = shalt.err (!%p4553_p6)
}
  0x57   : > { %3929 = dma.hbm_to_vmem [thread:$0]  (!%p4801_p13), %s3455_s22, 64, %s249_s7, %s234_s26  }
  0x58   : > { %257 = sbr.rel (%p4738_p8) target bundleno = 971 (0x3cb), region = 36 }
  0x5d   : > { %s4829_s0 = sand.u32 1, %s4634_s16  }
  0x5e   : > { %s3553_s2 = sshll.u32 %s4829_s0, 6  ;;  %s260_s3 = scalar_lea.sflag [#allocation3], %s4829_s0 }
  0x5f   : > { %s4833_s19 = scalar_lea.vmem [#allocation2], %s3553_s2 }
  0x60   : > { %4609 = dma.done.wait (%p4728_p4), %s260_s3, 1024  }
  0x61   : > { %4611 = vsyncadd (%p4728_p4), %s260_s3, 4294966272  ;;  %s268_s17 = sand.u32 1, %s4719_s21   ;;  %s3554_s25 = sshll.u32 %s4829_s0, 2 }
  0x62   : > { %s269_s11 = scalar_lea.sflag [#allocation6], %s268_s17  ;;  %s4841_s22 = scalar_lea.vmem [#allocation5], %s3554_s25 }
  0x63   : > { %4613 = dma.done.wait (%p4728_p4), %s269_s11, 64  }
  0x64   : > { %4615 = vsyncadd (%p4728_p4), %s269_s11, 4294967232  ;;  %p6066_p8 = scmp.eq.s32.totalorder %s4719_s21, 0 }
  0x66   : > { %4617 = dma.done.wait (%p6066_p8), [#allocation6], 24576   ;;  %p6067_p13 = pmov %p6066_p8 }
  0x67   : > { %p6068_p0 = pmov %p6066_p8 }
  0x68   : > { %4619 = vsyncadd (%p6067_p13), [#allocation6], 4294942720 }
  0x69   : > { %4621 = dma.done.wait (%p6068_p0), [#allocation9], 3072   ;;  %p6069_p12 = pmov %p6068_p0 }
  0x6a   : > { %v3996_v0 = vld [vmem:[#allocation7 + $0x154] ss:$24 sps:$4 sm:$0xff]   ;;  %v4000_v2 = vld [vmem:[#allocation7 + $0x150] ss:$24 sps:$4 sm:$0xff]   ;;  %v4002_v4 = vld [vmem:[#allocation7 + $0x124] ss:$24 sps:$4 sm:$0xff]  }
  0x6b   : > { %4623 = vsyncadd (%p6069_p12), [#allocation9], 4294964224  ;;  %v3998_v1 = vld [vmem:[#allocation7 + $0x454] ss:$24 sps:$4 sm:$0xff]   ;;  %1681 = vmatprep.subr.bf16.mxu0 %v3996_v0  ;;  %v4001_v3 = vld [vmem:[#allocation7 + $0x450] ss:$24 sps:$4 sm:$0xff]  }
  0x6c   : > { %1794 = vmatprep.subr.bf16.mxu1 %v3998_v1  ;;  %1682 = vmatpush1.bf16.msra.mxu0 %v4000_v2  ;;  %v4004_v5 = vld [vmem:[#allocation7 + $0x424] ss:$24 sps:$4 sm:$0xff]   ;;  %v4006_v6 = vld [vmem:[#allocation7 + $0x120] ss:$24 sps:$4 sm:$0xff]   ;;  %v4008_v8 = vld [vmem:[#allocation7 + $0xf4] ss:$24 sps:$4 sm:$0xff]  }
  0x6d   : > { %1795 = vmatpush1.bf16.msra.mxu1 %v4001_v3  ;;  %1683 = vmatprep.subr.bf16.mxu0 %v4002_v4  ;;  %v4007_v7 = vld [vmem:[#allocation7 + $0x420] ss:$24 sps:$4 sm:$0xff]   ;;  %v4010_v9 = vld [vmem:[#allocation7 + $0x3f4] ss:$24 sps:$4 sm:$0xff]   ;;  %v4012_v10 = vld [vmem:[#allocation7 + $0xf0] ss:$24 sps:$4 sm:$0xff]  }
  0x6e   : > { %1796 = vmatprep.subr.bf16.mxu1 %v4004_v5  ;;  %v4013_v11 = vld [vmem:[#allocation7 + $0x3f0] ss:$24 sps:$4 sm:$0xff]   ;;  %v4014_v12 = vld [vmem:[#allocation7 + $0xc4] ss:$24 sps:$4 sm:$0xff]   ;;  %v4018_v14 = vld [vmem:[#allocation7 + $0xc0] ss:$24 sps:$4 sm:$0xff]  }
  0x6f   : > { %v4016_v13 = vld [vmem:[#allocation7 + $0x3c4] ss:$24 sps:$4 sm:$0xff]   ;;  %v4019_v15 = vld [vmem:[#allocation7 + $0x3c0] ss:$24 sps:$4 sm:$0xff]   ;;  %v4020_v16 = vld [vmem:[#allocation7 + $0x94] ss:$24 sps:$4 sm:$0xff]  }
  0x70   : > { %1684 = vmatpush1.bf16.msra.mxu0 %v4006_v6  ;;  %v4022_v17 = vld [vmem:[#allocation7 + $0x394] ss:$24 sps:$4 sm:$0xff]   ;;  %v4024_v18 = vld [vmem:[#allocation7 + $0x90] ss:$24 sps:$4 sm:$0xff]   ;;  %v4026_v20 = vld [vmem:[#allocation7 + $0x64] ss:$24 sps:$4 sm:$0xff]  }
  0x71   : > { %1797 = vmatpush1.bf16.msra.mxu1 %v4007_v7  ;;  %1685 = vmatprep.subr.bf16.mxu0 %v4008_v8  ;;  %v4025_v19 = vld [vmem:[#allocation7 + $0x390] ss:$24 sps:$4 sm:$0xff]   ;;  %v4028_v21 = vld [vmem:[#allocation7 + $0x364] ss:$24 sps:$4 sm:$0xff]   ;;  %v4030_v22 = vld [vmem:[#allocation7 + $0x60] ss:$24 sps:$4 sm:$0xff]  }
  0x72   : > { %1798 = vmatprep.subr.bf16.mxu1 %v4010_v9  ;;  %v4031_v23 = vld [vmem:[#allocation7 + $0x360] ss:$24 sps:$4 sm:$0xff]   ;;  %v4032_v24 = vld [vmem:[#allocation7 + $0x34] ss:$24 sps:$4 sm:$0xff]   ;;  %v4036_v26 = vld [vmem:[#allocation7 + $0x30] ss:$24 sps:$4 sm:$0xff]  }
  0x73   : > { %v4034_v25 = vld [vmem:[#allocation7 + $0x334] ss:$24 sps:$4 sm:$0xff]   ;;  %v4037_v27 = vld [vmem:[#allocation7 + $0x330] ss:$24 sps:$4 sm:$0xff]   ;;  %v4038_v28 = vld [vmem:[#allocation7 + $0x4] ss:$24 sps:$4 sm:$0xff]  }
  0x74   : > { %1686 = vmatpush1.bf16.msra.mxu0 %v4012_v10  ;;  %v4040_v29 = vld [vmem:[#allocation7 + $0x304] ss:$24 sps:$4 sm:$0xff]   ;;  %v4042_v30 = vld [vmem:[#allocation7] ss:$24 sps:$4 sm:$0xff]   ;;  %v4044_v32 = vld [vmem:[#allocation7 + $0x2d4] ss:$24 sps:$4 sm:$0xff]  }
  0x75   : > { %1799 = vmatpush1.bf16.msra.mxu1 %v4013_v11  ;;  %1687 = vmatprep.subr.bf16.mxu0 %v4014_v12  ;;  %v4043_v31 = vld [vmem:[#allocation7 + $0x300] ss:$24 sps:$4 sm:$0xff]   ;;  %v4046_v33 = vld [vmem:[#allocation7 + $0x5d4] ss:$24 sps:$4 sm:$0xff]   ;;  %v4048_v34 = vld [vmem:[#allocation7 + $0x2d0] ss:$24 sps:$4 sm:$0xff]  }
  0x76   : > { %1800 = vmatprep.subr.bf16.mxu1 %v4016_v13  ;;  %v4049_v35 = vld [vmem:[#allocation7 + $0x5d0] ss:$24 sps:$4 sm:$0xff]   ;;  %v4050_v36 = vld [vmem:[#allocation7 + $0x2a4] ss:$24 sps:$4 sm:$0xff]   ;;  %v4054_v38 = vld [vmem:[#allocation7 + $0x2a0] ss:$24 sps:$4 sm:$0xff]  }
  0x77   : > { %v4052_v37 = vld [vmem:[#allocation7 + $0x5a4] ss:$24 sps:$4 sm:$0xff]   ;;  %v4055_v39 = vld [vmem:[#allocation7 + $0x5a0] ss:$24 sps:$4 sm:$0xff]   ;;  %v4056_v40 = vld [vmem:[#allocation7 + $0x274] ss:$24 sps:$4 sm:$0xff]  }
  0x78   : > { %1688 = vmatpush1.bf16.msra.mxu0 %v4018_v14  ;;  %v4058_v41 = vld [vmem:[#allocation7 + $0x574] ss:$24 sps:$4 sm:$0xff]   ;;  %v4060_v42 = vld [vmem:[#allocation7 + $0x270] ss:$24 sps:$4 sm:$0xff]   ;;  %v4062_v44 = vld [vmem:[#allocation7 + $0x244] ss:$24 sps:$4 sm:$0xff]  }
  0x79   : > { %1801 = vmatpush1.bf16.msra.mxu1 %v4019_v15  ;;  %1689 = vmatprep.subr.bf16.mxu0 %v4020_v16  ;;  %v4061_v43 = vld [vmem:[#allocation7 + $0x570] ss:$24 sps:$4 sm:$0xff]   ;;  %v4064_v45 = vld [vmem:[#allocation7 + $0x544] ss:$24 sps:$4 sm:$0xff]   ;;  %v4066_v46 = vld [vmem:[#allocation7 + $0x240] ss:$24 sps:$4 sm:$0xff]  }
  0x7a   : > { %1802 = vmatprep.subr.bf16.mxu1 %v4022_v17  ;;  %v4067_v47 = vld [vmem:[#allocation7 + $0x540] ss:$24 sps:$4 sm:$0xff]   ;;  %v4068_v50 = vld [vmem:[#allocation7 + $0x214] ss:$24 sps:$4 sm:$0xff]   ;;  %v4072_v56 = vld [vmem:[#allocation7 + $0x210] ss:$24 sps:$4 sm:$0xff]  }
  0x7b   : > { %v4856_v48 = vld [vmem:[%s4833_s19] sm:$0xff]   ;;  %v4859_v49 = vld [vmem:[%s4833_s19 + $0x8] sm:$0xff]   ;;  %v4070_v51 = vld [vmem:[#allocation7 + $0x514] ss:$24 sps:$4 sm:$0xff]   ;;  %vm379_vm0 = vsmask.f32 7424 }
  0x7c   : > { %1690 = vmatpush1.bf16.msra.mxu0 %v4024_v18  ;;  %v381_v52 = vshrl.u32 %v4856_v48, 16  ;;  %v383_v53 = vshll.u32 %v4856_v48, 16  ;;  %v388_v54 = vshll.u32 %v4859_v49, 16  ;;  %v392_v55 = vshrl.u32 %v4859_v49, 16  ;;  %v4073_v57 = vld [vmem:[#allocation7 + $0x510] ss:$24 sps:$4 sm:$0xff]  }
  0x7d   : > { %1803 = vmatpush1.bf16.msra.mxu1 %v4025_v19  ;;  %1691 = vmatprep.subr.bf16.mxu0 %v4026_v20  ;;  %v4074_v62 = vld [vmem:[#allocation7 + $0x1e4] ss:$24 sps:$4 sm:$0xff]   ;;  %v4078_v2 = vld [vmem:[#allocation7 + $0x1e0] ss:$24 sps:$4 sm:$0xff]   ;;  %vm483_vm1 = vsmask.f32 6400 }
  0x7e   : > { %1804 = vmatprep.subr.bf16.mxu1 %v4028_v21  ;;  %v385_v58 = vrot.slane %v383_v53, 1  ;;  %v390_v59 = vrot.slane %v388_v54, 1  ;;  %v484_v60 = vrot.slane %v381_v52, 1  ;;  %v485_v61 = vrot.slane %v383_v53, 2  ;;  %v4076_v63 = vld [vmem:[#allocation7 + $0x4e4] ss:$24 sps:$4 sm:$0xff]  }
  0x7f   : > { %v487_v0 = vrot.slane %v392_v55, 1  ;;  %v488_v1 = vrot.slane %v388_v54, 2  ;;  %v4079_v5 = vld [vmem:[#allocation7 + $0x4e0] ss:$24 sps:$4 sm:$0xff]   ;;  %v4869_v8 = vld [vmem:[%s4833_s19 + $0x10] sm:$0xff]   ;;  %v4879_v21 = vld [vmem:[%s4833_s19 + $0x18] sm:$0xff]  }
  0x80   : > { %1692 = vmatpush1.bf16.msra.mxu0 %v4030_v22  ;;  %v386_v3 = vor.u32 %v385_v58, %v381_v52  ;;  %v486_v4 = vor.u32 %v485_v61, %v484_v60  ;;  %v4080_v9 = vld [vmem:[#allocation7 + $0x1b4] ss:$24 sps:$4 sm:$0xff]   ;;  %v396_v12 = vshll.u32 %v4869_v8, 16  ;;  %v400_v13 = vshrl.u32 %v4869_v8, 16  ;;  %v4084_v14 = vld [vmem:[#allocation7 + $0x1b0] ss:$24 sps:$4 sm:$0xff]  }
  0x81   : > { %1805 = vmatpush1.bf16.msra.mxu1 %v4031_v23  ;;  %1693 = vmatprep.subr.bf16.mxu0 %v4032_v24  ;;  %v489_v6 = vor.u32 %v488_v1, %v487_v0  ;;  %v4082_v10 = vld [vmem:[#allocation7 + $0x4b4] ss:$24 sps:$4 sm:$0xff]   ;;  %v4085_v15 = vld [vmem:[#allocation7 + $0x4b0] ss:$24 sps:$4 sm:$0xff]   ;;  %v4086_v16 = vld [vmem:[#allocation7 + $0x184] ss:$24 sps:$4 sm:$0xff]  }
  0x82   : > { %1806 = vmatprep.subr.bf16.mxu1 %v4034_v25  ;;  %v4866_v7 = vsel %vm379_vm0, %v386_v3, %v390_v59  ;;  %v4088_v17 = vld [vmem:[#allocation7 + $0x484] ss:$24 sps:$4 sm:$0xff]   ;;  %v4090_v18 = vld [vmem:[#allocation7 + $0x180] ss:$24 sps:$4 sm:$0xff]   ;;  %v491_v19 = vrot.slane %v400_v13, 1  ;;  %v492_v20 = vrot.slane %v396_v12, 2 }
  0x83   : > { %v4872_v11 = vsel %vm483_vm1, %v486_v4, %v489_v6  ;;  %1713 = vmatprep.mubr.bf16.mxu0 %v4866_v7  ;;  %v4091_v22 = vld [vmem:[#allocation7 + $0x480] ss:$24 sps:$4 sm:$0xff]   ;;  %v458_v23 = vrot.slane %v4856_v48, 1  ;;  %v459_v24 = vrot.slane %v4859_v49, 1  ;;  %vm457_vm2 = vcmask 1046528   ;;  %s3557_s21 = sshll.u32 %s4829_s0, 7 }
  0x84   : > { %1694 = vmatpush1.bf16.msra.mxu0 %v4036_v26  ;;  %1826 = vmatprep.mubr.bf16.mxu1 %v4872_v11  ;;  %v4096_v25 = vld [vmem:[#allocation7 + $0x15c] ss:$24 sps:$4 sm:$0xff]   ;;  %v4118_v58 = vld [vmem:[#allocation7 + $0x3cc] ss:$24 sps:$4 sm:$0xff]   ;;  %v4116_v1 = vld [vmem:[#allocation7 + $0x3c8] ss:$24 sps:$4 sm:$0xff]  }
  0x85   : > { %1807 = vmatpush1.bf16.msra.mxu1 %v4037_v27  ;;  %1695 = vmatprep.subr.bf16.mxu0 %v4038_v28  ;;  %v4099_v26 = vld [vmem:[#allocation7 + $0x45c] ss:$24 sps:$4 sm:$0xff]   ;;  %v394_v27 = vor.u32 %v392_v55, %v390_v59  ;;  %v4094_v28 = vld [vmem:[#allocation7 + $0x158] ss:$24 sps:$4 sm:$0xff]   ;;  %v4113_v59 = vld [vmem:[#allocation7 + $0xc8] ss:$24 sps:$4 sm:$0xff]  }
  0x86   : > { %1808 = vmatprep.subr.bf16.mxu1 %v4040_v29  ;;  %v398_v29 = vrot.slane %v396_v12, 1  ;;  %v4916_v0 = vld [vmem:[%s4833_s19 + $0x28] sm:$0xff]   ;;  %v4122_v3 = vld [vmem:[#allocation7 + $0x9c] ss:$24 sps:$4 sm:$0xff]   ;;  %s5958_s23 = scalar_lea.vmem [#allocation10], %s3557_s21  ;;  %s3789_s29 = sshll.u32 %s4642_s18, 11 }
  0x87   : > { %v4125_v4 = vld [vmem:[#allocation7 + $0x39c] ss:$24 sps:$4 sm:$0xff]   ;;  %v420_v12 = vshll.u32 %v4916_v0, 16  ;;  %s3408_s5 = sshll.u32 %s5958_s23, 4  ;;  %s5980_s13 = scalar_lea.hbm %s6035_s4, %s3789_s29  ;;  %s5982_s5 = int_to_ptr.vmem [resolvable:$true] %s3408_s5 }
  0x88   : > { %1696 = vmatpush1.bf16.msra.mxu0 %v4042_v30  ;;  %v493_v30 = vor.u32 %v492_v20, %v491_v19  ;;  %s3394_s14 = scalar_lea.sflag [#allocation4], %s4829_s0  ;;  %s4558_s28 = scalar_lea.vmem %s5982_s5, 2048 }
  0x89   : > { %1809 = vmatpush1.bf16.msra.mxu1 %v4043_v31  ;;  %1697 = vmatprep.subr.bf16.mxu0 %v4044_v32  ;;  %v404_v31 = vshll.u32 %v4879_v21, 16  ;;  %v408_v32 = vshrl.u32 %v4879_v21, 16  ;;  %p4559_p4 = scmp.ne.s32.totalorder %s5982_s5, %s4558_s28  ;;  %s4660_s18 = smov [#allocation10]  }
  0x8a   : > { %1810 = vmatprep.subr.bf16.mxu1 %v4046_v33  ;;  %v4886_v33 = vsel %vm457_vm2, %v458_v23, %v459_v24  ;;  %v4935_v23 = vld [vmem:[%s4833_s19 + $0x30] sm:$0xff]   ;;  %s4562_s10 = sshll.u32 %s4660_s18, 4  ;;  %s4563_s10 = int_to_ptr.vmem [resolvable:$false] %s4562_s10 }
  0x8b   : > { %v406_v52 = vrot.slane %v404_v31, 1  ;;  %p4560_p3 = pnand %p4559_p4, %p4782_p9  ;;  %s4564_s30 = scalar_lea.vmem %s4563_s10, 4096 }
  0x8c   : > { %1698 = vmatpush2.bf16.msra.mxu0 %v4048_v34  ;;  %v4097_v34 = vld [vmem:[#allocation7 + $0x458] ss:$24 sps:$4 sm:$0xff]   ;;  %p4565_p11 = scmp.lt.s32.totalorder %s5982_s5, %s4563_s10  ;;  %p4566_p5 = scmp.lt.s32.totalorder %s4564_s30, %s4558_s28 }
  0x8d   : > { %1811 = vmatpush2.bf16.msra.mxu1 %v4049_v35  ;;  %1699 = vmatprep.subr.bf16.mxu0 %v4050_v36  ;;  %v4102_v35 = vld [vmem:[#allocation7 + $0x12c] ss:$24 sps:$4 sm:$0xff]   ;;  %p4561_p7 = pneg %p4560_p3 }
  0x8e   : > { %1812 = vmatprep.subr.bf16.mxu1 %v4052_v37  ;;  %v4105_v36 = vld [vmem:[#allocation7 + $0x42c] ss:$24 sps:$4 sm:$0xff]   ;;  %v4100_v37 = vld [vmem:[#allocation7 + $0x128] ss:$24 sps:$4 sm:$0xff]   ;;  %p4567_p10 = por %p4566_p5, %p4565_p11 }
  0x90   : > { %1700 = vmatpush2.bf16.msra.mxu0 %v4054_v38  ;;  %v4891_v38 = vsel %vm379_vm0, %v394_v27, %v398_v29  ;;  %v4135_v27 = vld [vmem:[#allocation7 + $0x3c] ss:$24 sps:$4 sm:$0xff]   ;;  %p4568_p1 = pnand %p4567_p10, %p4561_p7 }
  0x91   : > { %1813 = vmatpush2.bf16.msra.mxu1 %v4055_v39  ;;  %1701 = vmatprep.subr.bf16.mxu0 %v4056_v40  ;;  %v4894_v39 = vsel %vm483_vm1, %v489_v6, %v493_v30  ;;  %v495_v40 = vrot.slane %v408_v32, 1 }
  0x92   : > { %1814 = vmatprep.subr.bf16.mxu1 %v4058_v41  ;;  %v496_v41 = vrot.slane %v404_v31, 2 }
  0x94   : > { %1702 = vmatpush2.bf16.msra.mxu0 %v4060_v42  ;;  %v4897_v42 = vld [vmem:[%s4833_s19 + $0x20] sm:$0xff]   ;;  %v497_v53 = vor.u32 %v496_v41, %v495_v40  ;;  %v4141_v40 = vld [vmem:[#allocation7 + $0xc] ss:$24 sps:$4 sm:$0xff]  }
  0x95   : > { %1815 = vmatpush2.bf16.msra.mxu1 %v4061_v43  ;;  %1703 = vmatprep.subr.bf16.mxu0 %v4062_v44  ;;  %v4103_v43 = vld [vmem:[#allocation7 + $0x428] ss:$24 sps:$4 sm:$0xff]   ;;  %v461_v44 = vrot.slane %v4869_v8, 1  ;;  %v412_v54 = vshll.u32 %v4897_v42, 16  ;;  %v416_v55 = vshrl.u32 %v4897_v42, 16 }
  0x96   : > { %1816 = vmatprep.subr.bf16.mxu1 %v4064_v45  ;;  %v4109_v45 = vld [vmem:[#allocation7 + $0xfc] ss:$24 sps:$4 sm:$0xff]   ;;  %v4913_v61 = vsel %vm483_vm1, %v493_v30, %v497_v53  ;;  %v422_v30 = vrot.slane %v420_v12, 1  ;;  %v4144_v41 = vld [vmem:[#allocation7 + $0x30c] ss:$24 sps:$4 sm:$0xff]  }
  0x97   : > { %v414_v6 = vrot.slane %v412_v54, 1 }
  0x98   : > { %1704 = vmatpush2.bf16.msra.mxu0 %v4066_v46  ;;  %v4112_v46 = vld [vmem:[#allocation7 + $0x3fc] ss:$24 sps:$4 sm:$0xff]  }
  0x99   : > { %1817 = vmatpush2.bf16.msra.mxu1 %v4067_v47  ;;  %1705 = vmatprep.subr.bf16.mxu0 %v4068_v50  ;;  %v4107_v47 = vld [vmem:[#allocation7 + $0xf8] ss:$24 sps:$4 sm:$0xff]   ;;  %v402_v50 = vor.u32 %v400_v13, %v398_v29  ;;  %v424_v13 = vshrl.u32 %v4916_v0, 16  ;;  %v418_v29 = vor.u32 %v416_v55, %v414_v6 }
  0x9a   : > { %1818 = vmatprep.subr.bf16.mxu1 %v4070_v51  ;;  %v4110_v51 = vld [vmem:[#allocation7 + $0x3f8] ss:$24 sps:$4 sm:$0xff]  }
  0x9b   : > { %v4910_v60 = vsel %vm379_vm0, %v402_v50, %v406_v52  ;;  %v503_v20 = vrot.slane %v424_v13, 1  ;;  %v4139_v50 = vld [vmem:[#allocation7 + $0x8] ss:$24 sps:$4 sm:$0xff]  }
  0x9c   : > { %1706 = vmatpush2.bf16.msra.mxu0 %v4072_v56  ;;  %v4905_v56 = vsel %vm457_vm2, %v459_v24, %v461_v44  ;;  %v4126_v24 = vld [vmem:[#allocation7 + $0x68] ss:$24 sps:$4 sm:$0xff]  }
  0x9d   : > { %1819 = vmatpush2.bf16.msra.mxu1 %v4073_v57  ;;  %1707 = vmatprep.subr.bf16.mxu0 %v4074_v62  ;;  %v4115_v57 = vld [vmem:[#allocation7 + $0xcc] ss:$24 sps:$4 sm:$0xff]   ;;  %v499_v62 = vrot.slane %v416_v55, 1  ;;  %v426_v55 = vor.u32 %v424_v13, %v422_v30 }
  0x9e   : > { %1820 = vmatprep.subr.bf16.mxu1 %v4076_v63  ;;  %v500_v63 = vrot.slane %v412_v54, 2  ;;  %v4151_v54 = vld [vmem:[#allocation7 + $0x5dc] ss:$24 sps:$4 sm:$0xff]  }
  0xa0   : > { %1708 = vmatpush2.bf16.msra.mxu0 %v4078_v2  ;;  %v463_v2 = vrot.slane %v4879_v21, 1 }
  0xa1   : > { %1821 = vmatpush2.bf16.msra.mxu1 %v4079_v5  ;;  %1709 = vmatprep.subr.bf16.mxu0 %v4080_v9  ;;  %v4120_v5 = vld [vmem:[#allocation7 + $0x98] ss:$24 sps:$4 sm:$0xff]   ;;  %v410_v9 = vor.u32 %v408_v32, %v406_v52  ;;  %v428_v32 = vshll.u32 %v4935_v23, 16  ;;  %v467_v52 = vrot.slane %v4916_v0, 1 }
  0xa2   : > { %1822 = vmatprep.subr.bf16.mxu1 %v4082_v10  ;;  %v501_v10 = vor.u32 %v500_v63, %v499_v62 }
  0xa4   : > { %1710 = vmatpush2.bf16.msra.mxu0 %v4084_v14  ;;  %v4924_v14 = vsel %vm457_vm2, %v461_v44, %v463_v2  ;;  %v4932_v19 = vsel %vm483_vm1, %v497_v53, %v501_v10  ;;  %v4148_v53 = vld [vmem:[#allocation7 + $0x2dc] ss:$24 sps:$4 sm:$0xff]  }
  0xa5   : > { %1823 = vmatpush2.bf16.msra.mxu1 %v4085_v15  ;;  %1711 = vmatprep.subr.bf16.mxu0 %v4086_v16  ;;  %v4123_v15 = vld [vmem:[#allocation7 + $0x398] ss:$24 sps:$4 sm:$0xff]   ;;  %v4128_v16 = vld [vmem:[#allocation7 + $0x6c] ss:$24 sps:$4 sm:$0xff]  }
  0xa6   : > { %1824 = vmatprep.subr.bf16.mxu1 %v4088_v17  ;;  %v4131_v17 = vld [vmem:[#allocation7 + $0x36c] ss:$24 sps:$4 sm:$0xff]  }
  0xa8   : > { %1712 = vmatpush2.bf16.msra.mxu0 %v4090_v18  ;;  %v4929_v18 = vsel %vm379_vm0, %v410_v9, %v414_v6  ;;  %v4155_v6 = vld [vmem:[#allocation7 + $0x5a8] ss:$24 sps:$4 sm:$0xff]  }
  0xa9   : > { %1825 = vmatpush2.bf16.msra.mxu1 %v4091_v22  ;;  %1907 = vmatprep.subr.bf16.mxu0 %v4096_v25  ;;  %v504_v22 = vrot.slane %v420_v12, 2  ;;  %v4129_v25 = vld [vmem:[#allocation7 + $0x368] ss:$24 sps:$4 sm:$0xff]  }
  0xaa   : > { %2020 = vmatprep.subr.bf16.mxu1 %v4099_v26  ;;  %v465_v26 = vrot.slane %v4897_v42, 1 }
  0xab   : > { %1714 = vmatmul.mubr.bf16.vlgmr.msra.gmra.mxu0 %v4856_v48  ;;  %v505_v31 = vor.u32 %v504_v22, %v503_v20  ;;  %v4164_v20 = vld [vmem:[#allocation7 + $0x57c] ss:$24 sps:$4 sm:$0xff]  }
  0xac   : > { %1827 = vmatmul.mubr.bf16.vlgmr.msra.gmra.mxu1 %v4886_v33  ;;  %1908 = vmatpush1.bf16.msra.mxu0 %v4094_v28  ;;  %v4138_v28 = vld [vmem:[#allocation7 + $0x33c] ss:$24 sps:$4 sm:$0xff]   ;;  %v4962_v63 = vsel %vm457_vm2, %v465_v26, %v467_v52 }
  0xad   : > { %2021 = vmatpush1.bf16.msra.mxu1 %v4097_v34  ;;  %1909 = vmatprep.subr.bf16.mxu0 %v4102_v35  ;;  %v432_v34 = vshrl.u32 %v4935_v23, 16  ;;  %v4943_v35 = vsel %vm457_vm2, %v463_v2, %v465_v26  ;;  %v4951_v44 = vsel %vm483_vm1, %v501_v10, %v505_v31  ;;  %v4149_v2 = vld [vmem:[#allocation7 + $0x5d8] ss:$24 sps:$4 sm:$0xff]  }
  0xae   : > { %2022 = vmatprep.subr.bf16.mxu1 %v4105_v36  ;;  %1723 = vmatprep.mubr.bf16.mxu0 %v4891_v38  ;;  %v4133_v36 = vld [vmem:[#allocation7 + $0x38] ss:$24 sps:$4 sm:$0xff]  }
  0xaf   : > { %1836 = vmatprep.mubr.bf16.mxu1 %v4894_v39 }
  0xb0   : > { %1910 = vmatpush1.bf16.msra.mxu0 %v4100_v37  ;;  %v4136_v37 = vld [vmem:[#allocation7 + $0x338] ss:$24 sps:$4 sm:$0xff]  }
  0xb1   : > { %2023 = vmatpush1.bf16.msra.mxu1 %v4103_v43  ;;  %1911 = vmatprep.subr.bf16.mxu0 %v4109_v45  ;;  %v4948_v43 = vsel %vm379_vm0, %v418_v29, %v422_v30  ;;  %v507_v45 = vrot.slane %v432_v34, 1  ;;  %v4162_v30 = vld [vmem:[#allocation7 + $0x578] ss:$24 sps:$4 sm:$0xff]  }
  0xb2   : > { %2024 = vmatprep.subr.bf16.mxu1 %v4112_v46  ;;  %v508_v46 = vrot.slane %v428_v32, 2 }
  0xb3   : > { %1724 = vmatmul.mubr.bf16.gmra.mxu0 %v4859_v49 }
  0xb4   : > { %1837 = vmatmul.mubr.bf16.gmra.mxu1 %v4905_v56  ;;  %1912 = vmatpush1.bf16.msra.mxu0 %v4107_v47  ;;  %v4954_v47 = vld [vmem:[%s4833_s19 + $0x38] sm:$0xff]  }
  0xb5   : > { %2025 = vmatpush1.bf16.msra.mxu1 %v4110_v51  ;;  %1913 = vmatprep.subr.bf16.mxu0 %v4115_v57  ;;  %v4142_v51 = vld [vmem:[#allocation7 + $0x308] ss:$24 sps:$4 sm:$0xff]   ;;  %v430_v57 = vrot.slane %v428_v32, 1  ;;  %v440_v62 = vshrl.u32 %v4954_v47, 16  ;;  %v4170_v32 = vld [vmem:[#allocation7 + $0x54c] ss:$24 sps:$4 sm:$0xff]  }
  0xb6   : > { %2026 = vmatprep.subr.bf16.mxu1 %v4118_v58  ;;  %1733 = vmatprep.mubr.bf16.mxu0 %v4910_v60  ;;  %v509_v58 = vor.u32 %v508_v46, %v507_v45  ;;  %v4168_v45 = vld [vmem:[#allocation7 + $0x548] ss:$24 sps:$4 sm:$0xff]   ;;  %v471_v46 = vrot.slane %v4954_v47, 1 }
  0xb7   : > { %1846 = vmatprep.mubr.bf16.mxu1 %v4913_v61  ;;  %v4967_v9 = vsel %vm379_vm0, %v426_v55, %v430_v57  ;;  %v511_v12 = vrot.slane %v440_v62, 1  ;;  %v434_v22 = vor.u32 %v432_v34, %v430_v57  ;;  %v4165_v34 = vld [vmem:[#allocation7 + $0x248] ss:$24 sps:$4 sm:$0xff]  }
  0xb8   : > { %1914 = vmatpush1.bf16.msra.mxu0 %v4113_v59  ;;  %v436_v59 = vshll.u32 %v4954_v47, 16  ;;  %v4970_v10 = vsel %vm483_vm1, %v505_v31, %v509_v58  ;;  %v4167_v31 = vld [vmem:[#allocation7 + $0x24c] ss:$24 sps:$4 sm:$0xff]  }
  0xb9   : > { %2027 = vmatpush1.bf16.msra.mxu1 %v4116_v1  ;;  %1915 = vmatprep.subr.bf16.mxu0 %v4122_v3  ;;  %v4146_v1 = vld [vmem:[#allocation7 + $0x2d8] ss:$24 sps:$4 sm:$0xff]   ;;  %v4154_v3 = vld [vmem:[#allocation7 + $0x2ac] ss:$24 sps:$4 sm:$0xff]  }
  0xba   : > { %2028 = vmatprep.subr.bf16.mxu1 %v4125_v4  ;;  %v4157_v4 = vld [vmem:[#allocation7 + $0x5ac] ss:$24 sps:$4 sm:$0xff]   ;;  %v512_v13 = vrot.slane %v436_v59, 2 }
  0xbb   : > { %1734 = vmatmul.mubr.bf16.gmra.mxu0 %v4869_v8 }
  0xbc   : > { %1847 = vmatmul.mubr.bf16.gmra.mxu1 %v4924_v14  ;;  %1916 = vmatpush1.bf16.msra.mxu0 %v4120_v5  ;;  %v4152_v5 = vld [vmem:[#allocation7 + $0x2a8] ss:$24 sps:$4 sm:$0xff]   ;;  %v513_v26 = vor.u32 %v512_v13, %v511_v12  ;;  %v4189_v12 = vld [vmem:[#allocation7 + $0x4bc] ss:$24 sps:$4 sm:$0xff]   ;;  %v4184_v13 = vld [vmem:[#allocation7 + $0x1b8] ss:$24 sps:$4 sm:$0xff]  }
  0xbd   : > { %2029 = vmatpush1.bf16.msra.mxu1 %v4123_v15  ;;  %1917 = vmatprep.subr.bf16.mxu0 %v4128_v16  ;;  %v469_v15 = vrot.slane %v4935_v23, 1  ;;  %v4161_v16 = vld [vmem:[#allocation7 + $0x27c] ss:$24 sps:$4 sm:$0xff]  }
  0xbe   : > { %2030 = vmatprep.subr.bf16.mxu1 %v4131_v17  ;;  %1743 = vmatprep.mubr.bf16.mxu0 %v4929_v18  ;;  %v4974_v17 = vld [vmem:[%s4841_s22] sm:$0xf] }
  0xbf   : > { %1856 = vmatprep.mubr.bf16.mxu1 %v4932_v19  ;;  %v4981_v29 = vsel %vm457_vm2, %v467_v52, %v469_v15  ;;  %v4172_v52 = vld [vmem:[#allocation7 + $0x218] ss:$24 sps:$4 sm:$0xff]   ;;  %v4995_v57 = vsel %vm457_vm2, %v469_v15, %v471_v46 }
  0xc0   : > { %1918 = vmatpush1.bf16.msra.mxu0 %v4126_v24  ;;  %v4159_v24 = vld [vmem:[#allocation7 + $0x278] ss:$24 sps:$4 sm:$0xff]  }
  0xc1   : > { %2031 = vmatpush1.bf16.msra.mxu1 %v4129_v25  ;;  %1919 = vmatprep.subr.bf16.mxu0 %v4135_v27  ;;  %v438_v25 = vrot.slane %v436_v59, 1  ;;  %v444_v27 = vshll.u32 %v4974_v17, 16  ;;  %v4180_v59 = vld [vmem:[#allocation7 + $0x1ec] ss:$24 sps:$4 sm:$0xff]  }
  0xc2   : > { %2032 = vmatprep.subr.bf16.mxu1 %v4138_v28  ;;  %v515_v28 = vshrl.u32 %v4974_v17, 16 }
  0xc3   : > { %1744 = vmatmul.mubr.bf16.gmra.mxu0 %v4879_v21 }
  0xc4   : > { %1857 = vmatmul.mubr.bf16.gmra.mxu1 %v4943_v35  ;;  %1920 = vmatpush1.bf16.msra.mxu0 %v4133_v36  ;;  %v4986_v36 = vsel %vm379_vm0, %v434_v22, %v438_v25  ;;  %v4195_v22 = vld [vmem:[#allocation7 + $0x48c] ss:$24 sps:$4 sm:$0xff]  }
  0xc5   : > { %2033 = vmatpush1.bf16.msra.mxu1 %v4136_v37  ;;  %1921 = vmatprep.subr.bf16.mxu0 %v4141_v40  ;;  %v4989_v37 = vsel %vm483_vm1, %v509_v58, %v513_v26  ;;  %v517_v40 = vrot.slane %v515_v28, 1  ;;  %v4175_v58 = vld [vmem:[#allocation7 + $0x518] ss:$24 sps:$4 sm:$0xff]  }
  0xc6   : > { %2034 = vmatprep.subr.bf16.mxu1 %v4144_v41  ;;  %1753 = vmatprep.mubr.bf16.mxu0 %v4948_v43  ;;  %v518_v41 = vrot.slane %v444_v27, 2  ;;  %v4199_v28 = vld [vmem:[#allocation7 + $0x460] ss:$24 sps:$4 sm:$0xff]  }
  0xc7   : > { %1866 = vmatprep.mubr.bf16.mxu1 %v4951_v44 }
  0xc8   : > { %1922 = vmatpush1.bf16.msra.mxu0 %v4139_v50  ;;  %v4174_v50 = vld [vmem:[#allocation7 + $0x21c] ss:$24 sps:$4 sm:$0xff]   ;;  %v519_v55 = vor.u32 %v518_v41, %v517_v40 }
  0xc9   : > { %2035 = vmatpush1.bf16.msra.mxu1 %v4142_v51  ;;  %1923 = vmatprep.subr.bf16.mxu0 %v4148_v53  ;;  %v4177_v51 = vld [vmem:[#allocation7 + $0x51c] ss:$24 sps:$4 sm:$0xff]   ;;  %v442_v53 = vor.u32 %v440_v62, %v438_v25 }
  0xca   : > { %2036 = vmatprep.subr.bf16.mxu1 %v4151_v54  ;;  %v446_v54 = vrot.slane %v444_v27, 1  ;;  %v5003_v62 = vsel %vm483_vm1, %v513_v26, %v519_v55  ;;  %v4198_v25 = vld [vmem:[#allocation7 + $0x164] ss:$24 sps:$4 sm:$0xff]   ;;  %v4196_v27 = vld [vmem:[#allocation7 + $0x160] ss:$24 sps:$4 sm:$0xff]  }
  0xcb   : > { %1754 = vmatmul.mubr.bf16.gmra.mxu0 %v4897_v42  ;;  %v4201_v26 = vld [vmem:[#allocation7 + $0x464] ss:$24 sps:$4 sm:$0xff]   ;;  %v4220_v55 = vld [vmem:[#allocation7 + $0xa0] ss:$24 sps:$4 sm:$0xff]  }
  0xcc   : > { %1867 = vmatmul.mubr.bf16.gmra.mxu1 %v4962_v63  ;;  %1924 = vmatpush2.bf16.msra.mxu0 %v4146_v1  ;;  %v4183_v1 = vld [vmem:[#allocation7 + $0x4ec] ss:$24 sps:$4 sm:$0xff]  }
  0xcd   : > { %2037 = vmatpush2.bf16.msra.mxu1 %v4149_v2  ;;  %1925 = vmatprep.subr.bf16.mxu0 %v4154_v3  ;;  %v4178_v2 = vld [vmem:[#allocation7 + $0x1e8] ss:$24 sps:$4 sm:$0xff]   ;;  %v5000_v3 = vsel %vm379_vm0, %v442_v53, %v446_v54  ;;  %v4210_v40 = vld [vmem:[#allocation7 + $0x104] ss:$24 sps:$4 sm:$0xff]  }
  0xce   : > { %2038 = vmatprep.subr.bf16.mxu1 %v4157_v4  ;;  %1763 = vmatprep.mubr.bf16.mxu0 %v4967_v9  ;;  %v4181_v4 = vld [vmem:[#allocation7 + $0x4e8] ss:$24 sps:$4 sm:$0xff]   ;;  %v4213_v41 = vld [vmem:[#allocation7 + $0x404] ss:$24 sps:$4 sm:$0xff]  }
  0xcf   : > { %1876 = vmatprep.mubr.bf16.mxu1 %v4970_v10  ;;  %v4222_v53 = vld [vmem:[#allocation7 + $0xa4] ss:$24 sps:$4 sm:$0xff]  }
  0xd0   : > { %1926 = vmatpush2.bf16.msra.mxu0 %v4152_v5  ;;  %v473_v5 = vrot.slane %v4974_v17, 1  ;;  %v4190_v17 = vld [vmem:[#allocation7 + $0x188] ss:$24 sps:$4 sm:$0xff]   ;;  %v4225_v54 = vld [vmem:[#allocation7 + $0x3a4] ss:$24 sps:$4 sm:$0xff]  }
  0xd1   : > { %2039 = vmatpush2.bf16.msra.mxu1 %v4155_v6  ;;  %1927 = vmatprep.subr.bf16.mxu0 %v4161_v16  ;;  %v4186_v6 = vld [vmem:[#allocation7 + $0x1bc] ss:$24 sps:$4 sm:$0xff]   ;;  %v4187_v16 = vld [vmem:[#allocation7 + $0x4b8] ss:$24 sps:$4 sm:$0xff]  }
  0xd2   : > { %2040 = vmatprep.subr.bf16.mxu1 %v4164_v20  ;;  %v5009_v15 = vsel %vm457_vm2, %v471_v46, %v473_v5  ;;  %v4192_v20 = vld [vmem:[#allocation7 + $0x18c] ss:$24 sps:$4 sm:$0xff]   ;;  %v4211_v46 = vld [vmem:[#allocation7 + $0x400] ss:$24 sps:$4 sm:$0xff]  }
  0xd3   : > { %1764 = vmatmul.mubr.bf16.gmra.mxu0 %v4916_v0  ;;  %v4237_v5 = vld [vmem:[#allocation7 + $0x344] ss:$24 sps:$4 sm:$0xff]  }
  0xd4   : > { %1877 = vmatmul.mubr.bf16.gmra.mxu1 %v4981_v29  ;;  %1928 = vmatpush2.bf16.msra.mxu0 %v4159_v24  ;;  %v4193_v24 = vld [vmem:[#allocation7 + $0x488] ss:$24 sps:$4 sm:$0xff]  }
  0xd5   : > { %2041 = vmatpush2.bf16.msra.mxu1 %v4162_v30  ;;  %1929 = vmatprep.subr.bf16.mxu0 %v4167_v31  ;;  %v4204_v30 = vld [vmem:[#allocation7 + $0x134] ss:$24 sps:$4 sm:$0xff]  }
  0xd6   : > { %2042 = vmatprep.subr.bf16.mxu1 %v4170_v32  ;;  %1773 = vmatprep.mubr.bf16.mxu0 %v4986_v36  ;;  %v4207_v31 = vld [vmem:[#allocation7 + $0x434] ss:$24 sps:$4 sm:$0xff]   ;;  %v4202_v32 = vld [vmem:[#allocation7 + $0x130] ss:$24 sps:$4 sm:$0xff]  }
  0xd7   : > { %1886 = vmatprep.mubr.bf16.mxu1 %v4989_v37 }
  0xd8   : > { %1930 = vmatpush2.bf16.msra.mxu0 %v4165_v34  ;;  %v4205_v34 = vld [vmem:[#allocation7 + $0x430] ss:$24 sps:$4 sm:$0xff]  }
  0xd9   : > { %2043 = vmatpush2.bf16.msra.mxu1 %v4168_v45  ;;  %1931 = vmatprep.subr.bf16.mxu0 %v4174_v50  ;;  %v4208_v45 = vld [vmem:[#allocation7 + $0x100] ss:$24 sps:$4 sm:$0xff]   ;;  %v4216_v50 = vld [vmem:[#allocation7 + $0xd4] ss:$24 sps:$4 sm:$0xff]  }
  0xda   : > { %2044 = vmatprep.subr.bf16.mxu1 %v4177_v51  ;;  %v4214_v51 = vld [vmem:[#allocation7 + $0xd0] ss:$24 sps:$4 sm:$0xff]  }
  0xdb   : > { %1774 = vmatmul.mubr.bf16.gmra.mxu0 %v4935_v23 }
  0xdc   : > { %1887 = vmatmul.mubr.bf16.gmra.mxu1 %v4995_v57  ;;  %1932 = vmatpush2.bf16.msra.mxu0 %v4172_v52  ;;  %v4217_v52 = vld [vmem:[#allocation7 + $0x3d0] ss:$24 sps:$4 sm:$0xff]  }
  0xdd   : > { %2045 = vmatpush2.bf16.msra.mxu1 %v4175_v58  ;;  %1933 = vmatprep.subr.bf16.mxu0 %v4180_v59  ;;  %v4223_v58 = vld [vmem:[#allocation7 + $0x3a0] ss:$24 sps:$4 sm:$0xff]   ;;  %v4228_v59 = vld [vmem:[#allocation7 + $0x74] ss:$24 sps:$4 sm:$0xff]  }
  0xde   : > { %2046 = vmatprep.subr.bf16.mxu1 %v4183_v1  ;;  %1783 = vmatprep.mubr.bf16.mxu0 %v5000_v3  ;;  %v4231_v1 = vld [vmem:[#allocation7 + $0x374] ss:$24 sps:$4 sm:$0xff]  }
  0xdf   : > { %1896 = vmatprep.mubr.bf16.mxu1 %v5003_v62 }
  0xe0   : > { %1934 = vmatpush2.bf16.msra.mxu0 %v4178_v2  ;;  %v4229_v2 = vld [vmem:[#allocation7 + $0x370] ss:$24 sps:$4 sm:$0xff]  }
  0xe1   : > { %2047 = vmatpush2.bf16.msra.mxu1 %v4181_v4  ;;  %1935 = vmatprep.subr.bf16.mxu0 %v4186_v6  ;;  %v4234_v4 = vld [vmem:[#allocation7 + $0x44] ss:$24 sps:$4 sm:$0xff]   ;;  %v4232_v6 = vld [vmem:[#allocation7 + $0x40] ss:$24 sps:$4 sm:$0xff]  }
  0xe2   : > { %2048 = vmatprep.subr.bf16.mxu1 %v4189_v12  ;;  %v4235_v12 = vld [vmem:[#allocation7 + $0x340] ss:$24 sps:$4 sm:$0xff]  }
  0xe3   : > { %1784 = vmatmul.mubr.bf16.gmra.mxu0 %v4954_v47 }
  0xe4   : > { %1897 = vmatmul.mubr.bf16.gmra.mxu1 %v5009_v15  ;;  %1936 = vmatpush2.bf16.msra.mxu0 %v4184_v13  ;;  %v4240_v13 = vld [vmem:[#allocation7 + $0x14] ss:$24 sps:$4 sm:$0xff]  }
  0xe5   : > { %2049 = vmatpush2.bf16.msra.mxu1 %v4187_v16  ;;  %1937 = vmatprep.subr.bf16.mxu0 %v4192_v20  ;;  %v4243_v16 = vld [vmem:[#allocation7 + $0x314] ss:$24 sps:$4 sm:$0xff]   ;;  %v4241_v20 = vld [vmem:[#allocation7 + $0x310] ss:$24 sps:$4 sm:$0xff]  }
  0xe6   : > { %2050 = vmatprep.subr.bf16.mxu1 %v4195_v22  ;;  %1939 = vmatprep.mubr.bf16.mxu0 %v4866_v7  ;;  %v4246_v22 = vld [vmem:[#allocation7 + $0x2e4] ss:$24 sps:$4 sm:$0xff]  }
  0xe7   : > { %2052 = vmatprep.mubr.bf16.mxu1 %v4872_v11 }
  0xe8   : > { %1938 = vmatpush2.bf16.msra.mxu0 %v4190_v17  ;;  %v4249_v17 = vld [vmem:[#allocation7 + $0x5e4] ss:$24 sps:$4 sm:$0xff]  }
  0xe9   : > { %2051 = vmatpush2.bf16.msra.mxu1 %v4193_v24  ;;  %2133 = vmatprep.subr.bf16.mxu0 %v4198_v25  ;;  %v4244_v24 = vld [vmem:[#allocation7 + $0x2e0] ss:$24 sps:$4 sm:$0xff]  }
  0xea   : > { %2246 = vmatprep.subr.bf16.mxu1 %v4201_v26  ;;  %v4247_v25 = vld [vmem:[#allocation7 + $0x5e0] ss:$24 sps:$4 sm:$0xff]   ;;  %v4252_v26 = vld [vmem:[#allocation7 + $0x2b4] ss:$24 sps:$4 sm:$0xff]  }
  0xeb   : > { %1940 = vmatmul.mubr.bf16.vlgmr.msra.gmra.mxu0 %v4856_v48  ;;  %v4219_v48 = vld [vmem:[#allocation7 + $0x3d4] ss:$24 sps:$4 sm:$0xff]  }
  0xec   : > { %2053 = vmatmul.mubr.bf16.vlgmr.msra.gmra.mxu1 %v4886_v33  ;;  %2134 = vmatpush1.bf16.msra.mxu0 %v4196_v27  ;;  %v4250_v27 = vld [vmem:[#allocation7 + $0x2b0] ss:$24 sps:$4 sm:$0xff]  }
  0xed   : > { %2247 = vmatpush1.bf16.msra.mxu1 %v4199_v28  ;;  %2135 = vmatprep.subr.bf16.mxu0 %v4204_v30  ;;  %v4253_v28 = vld [vmem:[#allocation7 + $0x5b0] ss:$24 sps:$4 sm:$0xff]   ;;  %v4258_v30 = vld [vmem:[#allocation7 + $0x284] ss:$24 sps:$4 sm:$0xff]  }
  0xee   : > { %2248 = vmatprep.subr.bf16.mxu1 %v4207_v31  ;;  %1949 = vmatprep.mubr.bf16.mxu0 %v4891_v38  ;;  %v4261_v31 = vld [vmem:[#allocation7 + $0x584] ss:$24 sps:$4 sm:$0xff]  }
  0xef   : > { %2062 = vmatprep.mubr.bf16.mxu1 %v4894_v39 }
  0xf0   : > { %2136 = vmatpush1.bf16.msra.mxu0 %v4202_v32  ;;  %v4256_v32 = vld [vmem:[#allocation7 + $0x280] ss:$24 sps:$4 sm:$0xff]  }
  0xf1   : > { %2249 = vmatpush1.bf16.msra.mxu1 %v4205_v34  ;;  %2137 = vmatprep.subr.bf16.mxu0 %v4210_v40  ;;  %v4259_v34 = vld [vmem:[#allocation7 + $0x580] ss:$24 sps:$4 sm:$0xff]   ;;  %v4267_v40 = vld [vmem:[#allocation7 + $0x554] ss:$24 sps:$4 sm:$0xff]  }
  0xf2   : > { %2250 = vmatprep.subr.bf16.mxu1 %v4213_v41  ;;  %v4262_v41 = vld [vmem:[#allocation7 + $0x250] ss:$24 sps:$4 sm:$0xff]  }
  0xf3   : > { %1950 = vmatmul.mubr.bf16.gmra.mxu0 %v4859_v49  ;;  %v4226_v49 = vld [vmem:[#allocation7 + $0x70] ss:$24 sps:$4 sm:$0xff]  }
  0xf4   : > { %2063 = vmatmul.mubr.bf16.gmra.mxu1 %v4905_v56  ;;  %2138 = vmatpush1.bf16.msra.mxu0 %v4208_v45  ;;  %v4265_v45 = vld [vmem:[#allocation7 + $0x550] ss:$24 sps:$4 sm:$0xff]  }
  0xf5   : > { %2251 = vmatpush1.bf16.msra.mxu1 %v4211_v46  ;;  %2139 = vmatprep.subr.bf16.mxu0 %v4216_v50  ;;  %v4270_v46 = vld [vmem:[#allocation7 + $0x224] ss:$24 sps:$4 sm:$0xff]  }
  0xf6   : > { %2252 = vmatprep.subr.bf16.mxu1 %v4219_v48  ;;  %1959 = vmatprep.mubr.bf16.mxu0 %v4910_v60  ;;  %v4273_v50 = vld [vmem:[#allocation7 + $0x524] ss:$24 sps:$4 sm:$0xff]   ;;  %v4268_v48 = vld [vmem:[#allocation7 + $0x220] ss:$24 sps:$4 sm:$0xff]  }
  0xf7   : > { %2072 = vmatprep.mubr.bf16.mxu1 %v4913_v61 }
  0xf8   : > { %2140 = vmatpush1.bf16.msra.mxu0 %v4214_v51  ;;  %v4271_v51 = vld [vmem:[#allocation7 + $0x520] ss:$24 sps:$4 sm:$0xff]  }
  0xf9   : > { %2253 = vmatpush1.bf16.msra.mxu1 %v4217_v52  ;;  %2141 = vmatprep.subr.bf16.mxu0 %v4222_v53  ;;  %v4276_v52 = vld [vmem:[#allocation7 + $0x1f4] ss:$24 sps:$4 sm:$0xff]  }
  0xfa   : > { %2254 = vmatprep.subr.bf16.mxu1 %v4225_v54  ;;  %v4279_v53 = vld [vmem:[#allocation7 + $0x4f4] ss:$24 sps:$4 sm:$0xff]   ;;  %v4274_v54 = vld [vmem:[#allocation7 + $0x1f0] ss:$24 sps:$4 sm:$0xff]  }
  0xfb   : > { %1960 = vmatmul.mubr.bf16.gmra.mxu0 %v4869_v8  ;;  %v4238_v8 = vld [vmem:[#allocation7 + $0x10] ss:$24 sps:$4 sm:$0xff]  }
  0xfc   : > { %2073 = vmatmul.mubr.bf16.gmra.mxu1 %v4924_v14  ;;  %2142 = vmatpush1.bf16.msra.mxu0 %v4220_v55  ;;  %v4277_v55 = vld [vmem:[#allocation7 + $0x4f0] ss:$24 sps:$4 sm:$0xff]  }
  0xfd   : > { %2255 = vmatpush1.bf16.msra.mxu1 %v4223_v58  ;;  %2143 = vmatprep.subr.bf16.mxu0 %v4228_v59  ;;  %v4282_v58 = vld [vmem:[#allocation7 + $0x1c4] ss:$24 sps:$4 sm:$0xff]  }
  0xfe   : > { %2256 = vmatprep.subr.bf16.mxu1 %v4231_v1  ;;  %1969 = vmatprep.mubr.bf16.mxu0 %v4929_v18  ;;  %v4285_v59 = vld [vmem:[#allocation7 + $0x4c4] ss:$24 sps:$4 sm:$0xff]   ;;  %v4280_v1 = vld [vmem:[#allocation7 + $0x1c0] ss:$24 sps:$4 sm:$0xff]  }
  0xff   : > { %2082 = vmatprep.mubr.bf16.mxu1 %v4932_v19 }
 0x100   : > { %2144 = vmatpush1.bf16.msra.mxu0 %v4226_v49  ;;  %v4283_v49 = vld [vmem:[#allocation7 + $0x4c0] ss:$24 sps:$4 sm:$0xff]  }
 0x101   : > { %2257 = vmatpush1.bf16.msra.mxu1 %v4229_v2  ;;  %2145 = vmatprep.subr.bf16.mxu0 %v4234_v4  ;;  %v4288_v2 = vld [vmem:[#allocation7 + $0x194] ss:$24 sps:$4 sm:$0xff]  }
 0x102   : > { %2258 = vmatprep.subr.bf16.mxu1 %v4237_v5  ;;  %v4291_v4 = vld [vmem:[#allocation7 + $0x494] ss:$24 sps:$4 sm:$0xff]   ;;  %v4286_v5 = vld [vmem:[#allocation7 + $0x190] ss:$24 sps:$4 sm:$0xff]  }
 0x103   : > { %1970 = vmatmul.mubr.bf16.gmra.mxu0 %v4879_v21  ;;  %v4255_v21 = vld [vmem:[#allocation7 + $0x5b4] ss:$24 sps:$4 sm:$0xff]  }
 0x104   : > { %2083 = vmatmul.mubr.bf16.gmra.mxu1 %v4943_v35  ;;  %2146 = vmatpush1.bf16.msra.mxu0 %v4232_v6  ;;  %v4289_v6 = vld [vmem:[#allocation7 + $0x490] ss:$24 sps:$4 sm:$0xff]  }
 0x105   : > { %2259 = vmatpush1.bf16.msra.mxu1 %v4235_v12  ;;  %2147 = vmatprep.subr.bf16.mxu0 %v4240_v13  ;;  %v4444_v12 = vld [vmem:[%s4833_s19] sm:$0xff]   ;;  %v4445_v13 = vld [vmem:[%s4833_s19 + $0x8] sm:$0xff]  }
 0x106   : > { %2260 = vmatprep.subr.bf16.mxu1 %v4243_v16  ;;  %1979 = vmatprep.mubr.bf16.mxu0 %v4948_v43 }
 0x107   : > { %2092 = vmatprep.mubr.bf16.mxu1 %v4951_v44 }
 0x108   : > { %2148 = vmatpush1.bf16.msra.mxu0 %v4238_v8 }
 0x109   : > { %2261 = vmatpush1.bf16.msra.mxu1 %v4241_v20  ;;  %2149 = vmatprep.subr.bf16.mxu0 %v4246_v22  ;;  %v4302_v22 = vld [vmem:[#allocation8 + $0x20] sm:$0xff]  }
 0x10a   : > { %2262 = vmatprep.subr.bf16.mxu1 %v4249_v17  ;;  %v4303_v17 = vld [vmem:[#allocation8 + $0xa0] sm:$0xff]  }
 0x10b   : > { %1980 = vmatmul.mubr.bf16.gmra.mxu0 %v4897_v42  ;;  %v4264_v42 = vld [vmem:[#allocation7 + $0x254] ss:$24 sps:$4 sm:$0xff]  }
 0x10c   : > { %2093 = vmatmul.mubr.bf16.gmra.mxu1 %v4962_v63  ;;  %2150 = vmatpush2.bf16.msra.mxu0 %v4244_v24 }
 0x10d   : > { %2263 = vmatpush2.bf16.msra.mxu1 %v4247_v25  ;;  %2151 = vmatprep.subr.bf16.mxu0 %v4252_v26 }
 0x10e   : > { %2264 = vmatprep.subr.bf16.mxu1 %v4255_v21  ;;  %1989 = vmatprep.mubr.bf16.mxu0 %v4967_v9 }
 0x10f   : > { %2102 = vmatprep.mubr.bf16.mxu1 %v4970_v10 }
 0x110   : > { %2152 = vmatpush2.bf16.msra.mxu0 %v4250_v27 }
 0x111   : > { %2265 = vmatpush2.bf16.msra.mxu1 %v4253_v28  ;;  %2153 = vmatprep.subr.bf16.mxu0 %v4258_v30 }
 0x112   : > { %2266 = vmatprep.subr.bf16.mxu1 %v4261_v31 }
 0x113   : > { %1990 = vmatmul.mubr.bf16.gmra.mxu0 %v4916_v0 }
 0x114   : > { %2103 = vmatmul.mubr.bf16.gmra.mxu1 %v4981_v29  ;;  %2154 = vmatpush2.bf16.msra.mxu0 %v4256_v32  ;;  %v4304_v32 = vld [vmem:[#allocation8 + $0x58] sm:$0xff]  }
 0x115   : > { %2267 = vmatpush2.bf16.msra.mxu1 %v4259_v34  ;;  %2155 = vmatprep.subr.bf16.mxu0 %v4264_v42 }
 0x116   : > { %2268 = vmatprep.subr.bf16.mxu1 %v4267_v40  ;;  %1999 = vmatprep.mubr.bf16.mxu0 %v4986_v36  ;;  %v4305_v40 = vld [vmem:[#allocation8 + $0x18] sm:$0xff]  }
 0x117   : > { %2112 = vmatprep.mubr.bf16.mxu1 %v4989_v37 }
 0x118   : > { %2156 = vmatpush2.bf16.msra.mxu0 %v4262_v41 }
 0x119   : > { %2269 = vmatpush2.bf16.msra.mxu1 %v4265_v45  ;;  %2157 = vmatprep.subr.bf16.mxu0 %v4270_v46  ;;  %v4306_v45 = vld [vmem:[#allocation8 + $0x98] sm:$0xff]  }
 0x11a   : > { %2270 = vmatprep.subr.bf16.mxu1 %v4273_v50 }
 0x11b   : > { %2000 = vmatmul.mubr.bf16.gmra.mxu0 %v4935_v23 }
 0x11c   : > { %2113 = vmatmul.mubr.bf16.gmra.mxu1 %v4995_v57  ;;  %2158 = vmatpush2.bf16.msra.mxu0 %v4268_v48 }
 0x11d   : > { %2271 = vmatpush2.bf16.msra.mxu1 %v4271_v51  ;;  %2159 = vmatprep.subr.bf16.mxu0 %v4276_v52  ;;  %v4307_v51 = vld [vmem:[#allocation8 + $0x50] sm:$0xff]  }
 0x11e   : > { %2272 = vmatprep.subr.bf16.mxu1 %v4279_v53  ;;  %2009 = vmatprep.mubr.bf16.mxu0 %v5000_v3 }
 0x11f   : > { %2122 = vmatprep.mubr.bf16.mxu1 %v5003_v62 }
 0x120   : > { %2160 = vmatpush2.bf16.msra.mxu0 %v4274_v54  ;;  %v4308_v54 = vld [vmem:[#allocation8 + $0x10] sm:$0xff]  }
 0x121   : > { %2273 = vmatpush2.bf16.msra.mxu1 %v4277_v55  ;;  %2161 = vmatprep.subr.bf16.mxu0 %v4282_v58 }
 0x122   : > { %2274 = vmatprep.subr.bf16.mxu1 %v4285_v59 }
 0x123   : > { %2010 = vmatmul.mubr.bf16.gmra.mxu0 %v4954_v47 }
 0x124   : > { %2123 = vmatmul.mubr.bf16.gmra.mxu1 %v5009_v15  ;;  %2162 = vmatpush2.bf16.msra.mxu0 %v4280_v1  ;;  %v4310_v1 = vld [vmem:[#allocation8 + $0x48] sm:$0xff]  }
 0x125   : > { %2275 = vmatpush2.bf16.msra.mxu1 %v4283_v49  ;;  %2163 = vmatprep.subr.bf16.mxu0 %v4288_v2 }
 0x126   : > { %2276 = vmatprep.subr.bf16.mxu1 %v4291_v4  ;;  %2165 = vmatprep.mubr.bf16.mxu0 %v4866_v7  ;;  %v4446_v7 = vld [vmem:[%s4833_s19 + $0x10] sm:$0xff]  }
 0x127   : > { %2278 = vmatprep.mubr.bf16.mxu1 %v4872_v11  ;;  %v4447_v11 = vld [vmem:[%s4833_s19 + $0x18] sm:$0xff]   ;;  %v4311_v4 = vld [vmem:[#allocation8 + $0x8] sm:$0xff]  }
 0x128   : > { %2164 = vmatpush2.bf16.msra.mxu0 %v4286_v5 }
 0x129   : > { %2277 = vmatpush2.bf16.msra.mxu1 %v4289_v6  ;;  %v4309_v6 = vld [vmem:[#allocation8 + $0x90] sm:$0xff]  }
 0x12b   : > { %2166 = vmatmul.mubr.bf16.vlgmr.msra.gmra.mxu0 %v4444_v12 }
 0x12c   : > { %2279 = vmatmul.mubr.bf16.vlgmr.msra.gmra.mxu1 %v4886_v33  ;;  %2175 = vmatprep.mubr.bf16.mxu0 %v4891_v38  ;;  %v4448_v33 = vld [vmem:[%s4833_s19 + $0x20] sm:$0xff]  }
 0x12d   : > { %2288 = vmatprep.mubr.bf16.mxu1 %v4894_v39  ;;  %v4292_v38 = vld [vmem:[#allocation8 + $0x78] sm:$0xff]  }
 0x12e   : > { %3790 = vmatprep.subr.bf16.mxu0 %v4292_v38  ;;  %v4293_v39 = vld [vmem:[#allocation8 + $0x38] sm:$0xff]  }
 0x12f   : > { %3791 = vmatpush3.bf16.msra.mxu0 %v4293_v39  ;;  %v4314_v39 = vld [vmem:[#allocation8] sm:$0xff]  }
 0x133   : > { %2176 = vmatmul.mubr.bf16.gmra.mxu0 %v4445_v13 }
 0x134   : > { %2289 = vmatmul.mubr.bf16.gmra.mxu1 %v4905_v56  ;;  %2185 = vmatprep.mubr.bf16.mxu0 %v4910_v60  ;;  %v4294_v56 = vld [vmem:[#allocation8 + $0xb8] sm:$0xff]   ;;  %v4295_v60 = vld [vmem:[#allocation8 + $0x70] sm:$0xff]  }
 0x135   : > { %2298 = vmatprep.mubr.bf16.mxu1 %v4913_v61  ;;  %3870 = vmatprep.subr.bf16.mxu1 %v4294_v56  ;;  %v4296_v61 = vld [vmem:[#allocation8 + $0x30] sm:$0xff]  }
 0x136   : > { %3871 = vmatpush3.bf16.msra.mxu1 %v4294_v56  ;;  %3792 = vmatprep.subr.bf16.mxu0 %v4295_v60 }
 0x137   : > { %3793 = vmatpush3.bf16.msra.mxu0 %v4296_v61 }
 0x13b   : > { %2186 = vmatmul.mubr.bf16.gmra.mxu0 %v4446_v7 }
 0x13c   : > { %2299 = vmatmul.mubr.bf16.gmra.mxu1 %v4924_v14  ;;  %2195 = vmatprep.mubr.bf16.mxu0 %v4929_v18  ;;  %v4298_v14 = vld [vmem:[#allocation8 + $0x68] sm:$0xff]  }
 0x13d   : > { %2308 = vmatprep.mubr.bf16.mxu1 %v4932_v19  ;;  %3794 = vmatprep.subr.bf16.mxu0 %v4298_v14 }
 0x143   : > { %2196 = vmatmul.mubr.bf16.gmra.mxu0 %v4447_v11  ;;  %v4313_v11 = vld [vmem:[#allocation8 + $0x40] sm:$0xff]  }
 0x144   : > { %2309 = vmatmul.mubr.bf16.gmra.mxu1 %v4943_v35  ;;  %2205 = vmatprep.mubr.bf16.mxu0 %v4948_v43 }
 0x145   : > { %2318 = vmatprep.mubr.bf16.mxu1 %v4951_v44 }
 0x14b   : > { %2206 = vmatmul.mubr.bf16.gmra.mxu0 %v4448_v33 }
 0x14c   : > { %2319 = vmatmul.mubr.bf16.gmra.mxu1 %v4962_v63  ;;  %2215 = vmatprep.mubr.bf16.mxu0 %v4967_v9  ;;  %v4299_v63 = vld [vmem:[#allocation8 + $0x28] sm:$0xff]  }
 0x14d   : > { %2328 = vmatprep.mubr.bf16.mxu1 %v4970_v10  ;;  %3795 = vmatpush3.bf16.msra.mxu0 %v4299_v63 }
 0x153   : > { %2216 = vmatmul.mubr.bf16.gmra.mxu0 %v4916_v0  ;;  %v4297_v0 = vld [vmem:[#allocation8 + $0xb0] sm:$0xff]  }
 0x154   : > { %2329 = vmatmul.mubr.bf16.gmra.mxu1 %v4981_v29  ;;  %2225 = vmatprep.mubr.bf16.mxu0 %v4986_v36 }
 0x155   : > { %2338 = vmatprep.mubr.bf16.mxu1 %v4989_v37  ;;  %3872 = vmatprep.subr.bf16.mxu1 %v4297_v0 }
 0x156   : > { %3873 = vmatpush3.bf16.msra.mxu1 %v4297_v0 }
 0x15b   : > { %2226 = vmatmul.mubr.bf16.gmra.mxu0 %v4935_v23 }
 0x15c   : > { %2339 = vmatmul.mubr.bf16.gmra.mxu1 %v4995_v57  ;;  %2235 = vmatprep.mubr.bf16.mxu0 %v5000_v3 }
 0x15d   : > { %2348 = vmatprep.mubr.bf16.mxu1 %v5003_v62 }
 0x163   : > { %2236 = vmatmul.mubr.bf16.gmra.mxu0 %v4954_v47  ;;  %v4300_v47 = vld [vmem:[#allocation8 + $0xa8] sm:$0xff]  }
 0x164   : > { %2349 = vmatmul.mubr.bf16.gmra.mxu1 %v5009_v15  ;;  %3874 = vmatprep.subr.bf16.mxu1 %v4300_v47  ;;  %v4301_v15 = vld [vmem:[#allocation8 + $0x60] sm:$0xff]  }
 0x165   : > { %3875 = vmatpush3.bf16.msra.mxu1 %v4300_v47  ;;  %3796 = vmatprep.subr.bf16.mxu0 %v4301_v15  ;;  %v4315_v15 = vld [vmem:[#allocation8 + $0x80] sm:$0xff]  }
 0x166   : > { %3797 = vmatpush3.bf16.msra.mxu0 %v4302_v22  ;;  %3876 = vmatprep.subr.bf16.mxu1 %v4303_v17 }
 0x167   : > { %3798 = vmatprep.subr.bf16.mxu0 %v4304_v32 }
 0x169   : > { %3877 = vmatpush3.bf16.msra.mxu1 %v4303_v17 }
 0x16a   : > { %3799 = vmatpush3.bf16.msra.mxu0 %v4305_v40  ;;  %3878 = vmatprep.subr.bf16.mxu1 %v4306_v45 }
 0x16b   : > { %v1715_v18 = vpop.f32.mrf.mxu0  ;;  %3800 = vmatprep.subr.bf16.mxu0 %v4307_v51 }
 0x16c   : > { %v1828_v19 = vpop.f32.mrf.mxu1 }
 0x16d   : > { %v5077_v23 = vadd.f32 %v1828_v19, %v1715_v18  ;;  %v1717_v35 = vpop.f32.mrf.mxu0  ;;  %3879 = vmatpush3.bf16.msra.mxu1 %v4306_v45  ;;  %v4312_v18 = vld [vmem:[#allocation8 + $0x88] sm:$0xff]  }
 0x16e   : > { %v1830_v43 = vpop.f32.mrf.mxu1  ;;  %3801 = vmatpush3.bf16.msra.mxu0 %v4308_v54  ;;  %3880 = vmatprep.subr.bf16.mxu1 %v4309_v6 }
 0x16f   : > { %v5079_v44 = vadd.f32 %v1830_v43, %v1717_v35  ;;  %v1719_v9 = vpop.f32.mrf.mxu0  ;;  %3802 = vmatprep.subr.bf16.mxu0 %v4310_v1 }
 0x170   : > { %v1832_v10 = vpop.f32.mrf.mxu1 }
 0x171   : > { %v5081_v29 = vadd.f32 %v1832_v10, %v1719_v9  ;;  %v5083_v36 = vpop.f32.mrf.mxu0  ;;  %3881 = vmatpush3.bf16.msra.mxu1 %v4309_v6 }
 0x172   : > { %v5085_v37 = vpop.f32.mrf.mxu1  ;;  %3803 = vmatpush3.bf16.msra.mxu0 %v4311_v4  ;;  %3882 = vmatprep.subr.bf16.mxu1 %v4312_v18 }
 0x173   : > { %v1725_v57 = vpop.f32.mrf.mxu0  ;;  %3804 = vmatprep.subr.bf16.mxu0 %v4313_v11 }
 0x174   : > { %v1838_v3 = vpop.f32.mrf.mxu1 }
 0x175   : > { %v5087_v62 = vadd.f32 %v1838_v3, %v1725_v57  ;;  %v1727_v16 = vpop.f32.mrf.mxu0  ;;  %3883 = vmatpush3.bf16.msra.mxu1 %v4312_v18 }
 0x176   : > { %v1840_v8 = vpop.f32.mrf.mxu1  ;;  %3805 = vmatpush3.bf16.msra.mxu0 %v4314_v39  ;;  %3884 = vmatprep.subr.bf16.mxu1 %v4315_v15 }
 0x177   : > { %v5089_v20 = vadd.f32 %v1840_v8, %v1727_v16  ;;  %v1729_v24 = vpop.f32.mrf.mxu0 }
 0x178   : > { %v1842_v25 = vpop.f32.mrf.mxu1 }
 0x179   : > { %v5091_v26 = vadd.f32 %v1842_v25, %v1729_v24  ;;  %v5093_v21 = vpop.f32.mrf.mxu0  ;;  %3885 = vmatpush3.bf16.msra.mxu1 %v4315_v15 }
 0x17a   : > { %v5095_v27 = vpop.f32.mrf.mxu1 }
 0x17b   : > { %v1735_v28 = vpop.f32.mrf.mxu0 }
 0x17c   : > { %v1848_v30 = vpop.f32.mrf.mxu1 }
 0x17d   : > { %v5097_v31 = vadd.f32 %v1848_v30, %v1735_v28  ;;  %v1737_v34 = vpop.f32.mrf.mxu0 }
 0x17e   : > { %v1850_v42 = vpop.f32.mrf.mxu1 }
 0x17f   : > { %v5099_v41 = vadd.f32 %v1850_v42, %v1737_v34  ;;  %v1739_v46 = vpop.f32.mrf.mxu0 }
 0x180   : > { %v1852_v50 = vpop.f32.mrf.mxu1 }
 0x181   : > { %v5101_v48 = vadd.f32 %v1852_v50, %v1739_v46  ;;  %v5103_v52 = vpop.f32.mrf.mxu0 }
 0x182   : > { %v5105_v53 = vpop.f32.mrf.mxu1 }
 0x183   : > { %v1745_v55 = vpop.f32.mrf.mxu0 }
 0x184   : > { %v1858_v58 = vpop.f32.mrf.mxu1 }
 0x185   : > { %v5107_v59 = vadd.f32 %v1858_v58, %v1745_v55  ;;  %v1747_v49 = vpop.f32.mrf.mxu0 }
 0x186   : > { %v1860_v2 = vpop.f32.mrf.mxu1 }
 0x187   : > { %v5109_v5 = vadd.f32 %v1860_v2, %v1747_v49  ;;  %v1749_v12 = vpop.f32.mrf.mxu0 }
 0x188   : > { %v1862_v13 = vpop.f32.mrf.mxu1 }
 0x189   : > { %v5111_v7 = vadd.f32 %v1862_v13, %v1749_v12  ;;  %v5113_v33 = vpop.f32.mrf.mxu0 }
 0x18a   : > { %v5115_v38 = vpop.f32.mrf.mxu1 }
 0x18b   : > { %v1755_v56 = vpop.f32.mrf.mxu0 }
 0x18c   : > { %v1868_v60 = vpop.f32.mrf.mxu1 }
 0x18d   : > { %v5117_v61 = vadd.f32 %v1868_v60, %v1755_v56  ;;  %v1757_v0 = vpop.f32.mrf.mxu0 }
 0x18e   : > { %v1870_v14 = vpop.f32.mrf.mxu1 }
 0x18f   : > { %v5119_v19 = vadd.f32 %v1870_v14, %v1757_v0  ;;  %v1759_v35 = vpop.f32.mrf.mxu0 }
 0x190   : > { %v1872_v43 = vpop.f32.mrf.mxu1 }
 0x191   : > { %v5121_v63 = vadd.f32 %v1872_v43, %v1759_v35  ;;  %v1761_v47 = vpop.f32.mrf.mxu0 }
 0x192   : > { %v1874_v9 = vpop.f32.mrf.mxu1 }
 0x193   : > { %v5123_v10 = vadd.f32 %v1874_v9, %v1761_v47  ;;  %v1765_v57 = vpop.f32.mrf.mxu0 }
 0x194   : > { %v1878_v3 = vpop.f32.mrf.mxu1 }
 0x195   : > { %v5125_v16 = vadd.f32 %v1878_v3, %v1765_v57  ;;  %v1767_v8 = vpop.f32.mrf.mxu0 }
 0x196   : > { %v1880_v22 = vpop.f32.mrf.mxu1 }
 0x197   : > { %v5127_v17 = vadd.f32 %v1880_v22, %v1767_v8  ;;  %v1769_v24 = vpop.f32.mrf.mxu0 }
 0x198   : > { %v1882_v25 = vpop.f32.mrf.mxu1 }
 0x199   : > { %v5129_v28 = vadd.f32 %v1882_v25, %v1769_v24  ;;  %v1771_v30 = vpop.f32.mrf.mxu0  ;;  %v2359_v24 = vmul.f32 %v5077_v23, %v5077_v23 }
 0x19a   : > { %v1884_v32 = vpop.f32.mrf.mxu1 }
 0x19b   : > { %v5131_v34 = vadd.f32 %v1884_v32, %v1771_v30  ;;  %v1775_v42 = vpop.f32.mrf.mxu0 }
 0x19c   : > { %v1888_v40 = vpop.f32.mrf.mxu1 }
 0x19d   : > { %v5133_v45 = vadd.f32 %v1888_v40, %v1775_v42  ;;  %v1777_v46 = vpop.f32.mrf.mxu0 }
 0x19e   : > { %v1890_v50 = vpop.f32.mrf.mxu1 }
 0x19f   : > { %v5135_v51 = vadd.f32 %v1890_v50, %v1777_v46  ;;  %v1779_v54 = vpop.f32.mrf.mxu0 }
 0x1a0   : > { %v1892_v55 = vpop.f32.mrf.mxu1 }
 0x1a1   : > { %v5137_v58 = vadd.f32 %v1892_v55, %v1779_v54  ;;  %v1781_v1 = vpop.f32.mrf.mxu0  ;;  %v2362_v55 = vmul.f32 %v5081_v29, %v5081_v29 }
 0x1a2   : > { %v1894_v49 = vpop.f32.mrf.mxu1 }
 0x1a3   : > { %v5139_v2 = vadd.f32 %v1894_v49, %v1781_v1  ;;  %v1785_v4 = vpop.f32.mrf.mxu0 }
 0x1a4   : > { %v1898_v6 = vpop.f32.mrf.mxu1 }
 0x1a5   : > { %v5141_v12 = vadd.f32 %v1898_v6, %v1785_v4  ;;  %v1787_v13 = vpop.f32.mrf.mxu0 }
 0x1a6   : > { %v1900_v11 = vpop.f32.mrf.mxu1 }
 0x1a7   : > { %v5143_v39 = vadd.f32 %v1900_v11, %v1787_v13  ;;  %v1789_v56 = vpop.f32.mrf.mxu0 }
 0x1a8   : > { %v1902_v60 = vpop.f32.mrf.mxu1 }
 0x1a9   : > { %v5145_v0 = vadd.f32 %v1902_v60, %v1789_v56  ;;  %v1791_v14 = vpop.f32.mrf.mxu0 }
 0x1aa   : > { %v1904_v18 = vpop.f32.mrf.mxu1 }
 0x1ab   : > { %v5147_v35 = vadd.f32 %v1904_v18, %v1791_v14  ;;  %v1941_v43 = vpop.f32.mrf.mxu0  ;;  %v2365_v14 = vmul.f32 %v5087_v62, %v5087_v62 }
 0x1ac   : > { %v2054_v47 = vpop.f32.mrf.mxu1 }
 0x1ad   : > { %v5149_v9 = vadd.f32 %v2054_v47, %v1941_v43  ;;  %v1943_v57 = vpop.f32.mrf.mxu0 }
 0x1ae   : > { %v2056_v3 = vpop.f32.mrf.mxu1 }
 0x1af   : > { %v2057_v15 = vadd.f32 %v2056_v3, %v1943_v57  ;;  %v1945_v8 = vpop.f32.mrf.mxu0 }
 0x1b0   : > { %v2058_v22 = vpop.f32.mrf.mxu1 }
 0x1b1   : > { %v2407_v25 = vmul.f32 %v2057_v15, %v2057_v15  ;;  %v5153_v30 = vadd.f32 %v2058_v22, %v1945_v8  ;;  %v1947_v32 = vpop.f32.mrf.mxu0 }
 0x1b2   : > { %v2060_v42 = vpop.f32.mrf.mxu1 }
 0x1b3   : > { %v2455_v40 = vadd.f32 %v2407_v25, %v2359_v24  ;;  %v2061_v46 = vadd.f32 %v2060_v42, %v1947_v32  ;;  %v1951_v50 = vpop.f32.mrf.mxu0  ;;  %v2368_v24 = vmul.f32 %v5091_v26, %v5091_v26 }
 0x1b4   : > { %v2064_v54 = vpop.f32.mrf.mxu1 }
 0x1b5   : > { %v5157_v1 = vadd.f32 1e-06, %v2455_v40  ;;  %v2410_v49 = vmul.f32 %v2061_v46, %v2061_v46  ;;  %v5159_v4 = vadd.f32 %v2064_v54, %v1951_v50  ;;  %v1953_v6 = vpop.f32.mrf.mxu0 }
 0x1b6   : > { %v2066_v13 = vpop.f32.mrf.mxu1 }
 0x1b7   : > { %4316 = vrsqrt.f32 %v5157_v1  ;;  %v2458_v23 = vadd.f32 %v2410_v49, %v2362_v55  ;;  %v2067_v11 = vadd.f32 %v2066_v13, %v1953_v6  ;;  %v1955_v56 = vpop.f32.mrf.mxu0  ;;  %v2371_v49 = vmul.f32 %v5097_v31, %v5097_v31 }
 0x1b8   : > { %v2068_v60 = vpop.f32.mrf.mxu1  ;;  %vm2553_vm3 = vcmp.eq.f32.partialorder %v5157_v1, inf  ;;  %vm2555_vm4 = vcmp.eq.f32.partialorder %v5157_v1, 0.0 }
 0x1b9   : > { %v5164_v18 = vadd.f32 1e-06, %v2458_v23  ;;  %v2413_v43 = vmul.f32 %v2067_v11, %v2067_v11  ;;  %v5166_v29 = vadd.f32 %v2068_v60, %v1955_v56  ;;  %v1957_v47 = vpop.f32.mrf.mxu0 }
 0x1ba   : > { %v2070_v57 = vpop.f32.mrf.mxu1 }
 0x1bb   : > { %4318 = vrsqrt.f32 %v5164_v18  ;;  %v2461_v3 = vadd.f32 %v2413_v43, %v2365_v14  ;;  %v2071_v15 = vadd.f32 %v2070_v57, %v1957_v47  ;;  %v1961_v8 = vpop.f32.mrf.mxu0  ;;  %v2374_v43 = vmul.f32 %v5101_v48, %v5101_v48 }
 0x1bc   : > { %v2074_v22 = vpop.f32.mrf.mxu1  ;;  %vm2574_vm5 = vcmp.eq.f32.partialorder %v5164_v18, inf  ;;  %vm2576_vm6 = vcmp.eq.f32.partialorder %v5164_v18, 0.0 }
 0x1bd   : > { %v5171_v25 = vadd.f32 1e-06, %v2461_v3  ;;  %v2416_v32 = vmul.f32 %v2071_v15, %v2071_v15  ;;  %v5173_v62 = vadd.f32 %v2074_v22, %v1961_v8  ;;  %v1963_v42 = vpop.f32.mrf.mxu0 }
 0x1be   : > { %v2076_v40 = vpop.f32.mrf.mxu1 }
 0x1bf   : > { %4320 = vrsqrt.f32 %v5171_v25  ;;  %v2464_v46 = vadd.f32 %v2416_v32, %v2368_v24  ;;  %v2077_v50 = vadd.f32 %v2076_v40, %v1963_v42  ;;  %v1965_v54 = vpop.f32.mrf.mxu0  ;;  %vm2595_vm7 = vcmp.eq.f32.partialorder %v5171_v25, inf }
 0x1c0   : > { %v2078_v55 = vpop.f32.mrf.mxu1  ;;  %vm2597_vm8 = vcmp.eq.f32.partialorder %v5171_v25, 0.0 }
 0x1c1   : > { %v5178_v6 = vadd.f32 1e-06, %v2464_v46  ;;  %v2419_v13 = vmul.f32 %v2077_v50, %v2077_v50  ;;  %v5180_v26 = vadd.f32 %v2078_v55, %v1965_v54  ;;  %v1967_v23 = vpop.f32.mrf.mxu0  ;;  %v2377_v46 = vmul.f32 %v5107_v59, %v5107_v59 }
 0x1c2   : > { %v2080_v11 = vpop.f32.mrf.mxu1 }
 0x1c3   : > { %4322 = vrsqrt.f32 %v5178_v6  ;;  %v2467_v56 = vadd.f32 %v2419_v13, %v2371_v49  ;;  %v2081_v60 = vadd.f32 %v2080_v11, %v1967_v23  ;;  %v1971_v47 = vpop.f32.mrf.mxu0  ;;  %vm2616_vm9 = vcmp.eq.f32.partialorder %v5178_v6, inf }
 0x1c4   : > { %v4317_v14 = vpop.eup %4316  ;;  %v2084_v57 = vpop.f32.mrf.mxu1  ;;  %vm2618_vm10 = vcmp.eq.f32.partialorder %v5178_v6, 0.0 }
 0x1c5   : > { %v5185_v3 = vadd.f32 1e-06, %v2467_v56  ;;  %v2422_v31 = vmul.f32 %v2081_v60, %v2081_v60  ;;  %v5187_v15 = vadd.f32 %v2084_v57, %v1971_v47  ;;  %v2552_v8 = vmul.f32 %v4317_v14, %v5157_v1  ;;  %v1973_v22 = vpop.f32.mrf.mxu0 }
 0x1c6   : > { %v2086_v24 = vpop.f32.mrf.mxu1  ;;  %v2556_v56 = vand.u32 2147483648, %v5157_v1  ;;  %v2380_v57 = vmul.f32 %v5111_v7, %v5111_v7 }
 0x1c7   : > { %4324 = vrsqrt.f32 %v5185_v3  ;;  %v2470_v32 = vadd.f32 %v2422_v31, %v2374_v43  ;;  %v2087_v42 = vadd.f32 %v2086_v24, %v1973_v22  ;;  %v1975_v48 = vpop.f32.mrf.mxu0  ;;  %v2554_v13 = vsel %vm2553_vm3, %v5157_v1, %v2552_v8 }
 0x1c8   : > { %v4319_v40 = vpop.eup %4318  ;;  %v2088_v50 = vpop.f32.mrf.mxu1  ;;  %v2577_v43 = vand.u32 2147483648, %v5164_v18  ;;  %v5207_v22 = vsel %vm2555_vm4, %v2556_v56, %v2554_v13  ;;  %vm2637_vm11 = vcmp.eq.f32.partialorder %v5185_v3, inf  ;;  %vm2639_vm13 = vcmp.eq.f32.partialorder %v5185_v3, 0.0 }
 0x1c9   : > { %v5194_v54 = vadd.f32 1e-06, %v2470_v32  ;;  %v2425_v55 = vmul.f32 %v2087_v42, %v2087_v42  ;;  %v5196_v49 = vadd.f32 %v2088_v50, %v1975_v48  ;;  %v1977_v23 = vpop.f32.mrf.mxu0  ;;  %v2573_v60 = vmul.f32 %v4319_v40, %v5164_v18 }
 0x1ca   : > { %v2090_v11 = vpop.f32.mrf.mxu1 }
 0x1cb   : > { %4326 = vrsqrt.f32 %v5194_v54  ;;  %v2473_v59 = vadd.f32 %v2425_v55, %v2377_v46  ;;  %v2091_v14 = vadd.f32 %v2090_v11, %v1977_v23  ;;  %v1981_v31 = vpop.f32.mrf.mxu0  ;;  %v2575_v1 = vsel %vm2574_vm5, %v5164_v18, %v2573_v60 }
 0x1cc   : > { %v4321_v47 = vpop.eup %4320  ;;  %v2094_v8 = vpop.f32.mrf.mxu1  ;;  %v5215_v40 = vsel %vm2576_vm6, %v2577_v43, %v2575_v1  ;;  %v1835_v18 = vadd.f32 %v5085_v37, %v5083_v36  ;;  %v2383_v11 = vmul.f32 %v5117_v61, %v5117_v61  ;;  %v2598_v36 = vand.u32 2147483648, %v5171_v25 }
 0x1cd   : > { %v5211_v24 = vadd.f32 1e-06, %v2473_v59  ;;  %v2428_v32 = vmul.f32 %v2091_v14, %v2091_v14  ;;  %v5213_v42 = vadd.f32 %v2094_v8, %v1981_v31  ;;  %v1983_v46 = vpop.f32.mrf.mxu0  ;;  %v2594_v50 = vmul.f32 %v4321_v47, %v5171_v25 }
 0x1ce   : > { %v2096_v48 = vpop.f32.mrf.mxu1  ;;  %v2619_v1 = vand.u32 2147483648, %v5178_v6  ;;  %vm2658_vm12 = vcmp.eq.f32.partialorder %v5194_v54, inf  ;;  %vm2660_vm14 = vcmp.eq.f32.partialorder %v5194_v54, 0.0 }
 0x1cf   : > { %4328 = vrsqrt.f32 %v5211_v24  ;;  %v2476_v55 = vadd.f32 %v2428_v32, %v2380_v57  ;;  %v2097_v13 = vadd.f32 %v2096_v48, %v1983_v46  ;;  %v1985_v56 = vpop.f32.mrf.mxu0  ;;  %v2596_v47 = vsel %vm2595_vm7, %v5171_v25, %v2594_v50 }
 0x1d0   : > { %v4323_v23 = vpop.eup %4322  ;;  %v2098_v60 = vpop.f32.mrf.mxu1  ;;  %v2386_v46 = vmul.f32 %v5121_v63, %v5121_v63  ;;  %v5253_v63 = vmul.f32 %v1835_v18, %v1835_v18  ;;  %v1855_v18 = vadd.f32 %v5105_v53, %v5103_v52  ;;  %v2640_v52 = vand.u32 2147483648, %v5185_v3 }
 0x1d1   : > { %v5226_v59 = vadd.f32 1e-06, %v2476_v55  ;;  %v2431_v14 = vmul.f32 %v2097_v13, %v2097_v13  ;;  %v5228_v43 = vadd.f32 %v2098_v60, %v1985_v56  ;;  %v1987_v57 = vpop.f32.mrf.mxu0  ;;  %v2615_v37 = vmul.f32 %v4323_v23, %v5178_v6 }
 0x1d2   : > { %v2100_v31 = vpop.f32.mrf.mxu1  ;;  %v5239_v55 = vsel %vm2597_vm8, %v2598_v36, %v2596_v47  ;;  %v5251_v60 = vmul.f32 %v5079_v44, %v5079_v44  ;;  %v1845_v44 = vadd.f32 %v5095_v27, %v5093_v21  ;;  %vm2679_vm15 = vcmp.eq.f32.partialorder %v5211_v24, inf }
 0x1d3   : > { %4330 = vrsqrt.f32 %v5226_v59  ;;  %v2479_v61 = vadd.f32 %v2431_v14, %v2383_v11  ;;  %v2101_v8 = vadd.f32 %v2100_v31, %v1987_v57  ;;  %v1991_v48 = vpop.f32.mrf.mxu0  ;;  %v2617_v25 = vsel %vm2616_vm9, %v5178_v6, %v2615_v37 }
 0x1d4   : > { %v4325_v32 = vpop.eup %4324  ;;  %v2104_v50 = vpop.f32.mrf.mxu1  ;;  %v5247_v11 = vsel %vm2618_vm10, %v2619_v1, %v2617_v25  ;;  %v5260_v31 = vmul.f32 %v5089_v20, %v5089_v20  ;;  %v2389_v1 = vmul.f32 %v5125_v16, %v5125_v16  ;;  %v2661_v16 = vand.u32 2147483648, %v5194_v54 }
 0x1d5   : > { %v5243_v13 = vadd.f32 1e-06, %v2479_v61  ;;  %v2434_v23 = vmul.f32 %v2101_v8, %v2101_v8  ;;  %v5245_v56 = vadd.f32 %v2104_v50, %v1991_v48  ;;  %v1993_v14 = vpop.f32.mrf.mxu0  ;;  %v2636_v6 = vmul.f32 %v4325_v32, %v5185_v3 }
 0x1d6   : > { %v2106_v47 = vpop.f32.mrf.mxu1  ;;  %v1865_v8 = vadd.f32 %v5115_v38, %v5113_v33  ;;  %vm2700_vm0 = vcmp.eq.f32.partialorder %v5226_v59, inf  ;;  %vm2681_vm1 = vcmp.eq.f32.partialorder %v5211_v24, 0.0  ;;  %vm2702_vm2 = vcmp.eq.f32.partialorder %v5226_v59, 0.0 }
 0x1d7   : > { %4332 = vrsqrt.f32 %v5243_v13  ;;  %v2482_v36 = vadd.f32 %v2434_v23, %v2386_v46  ;;  %v2107_v37 = vadd.f32 %v2106_v47, %v1993_v14  ;;  %v1995_v32 = vpop.f32.mrf.mxu0  ;;  %v2638_v27 = vsel %vm2637_vm11, %v5185_v3, %v2636_v6 }
 0x1d8   : > { %v4327_v61 = vpop.eup %4326  ;;  %v2108_v20 = vpop.f32.mrf.mxu1  ;;  %v2392_v14 = vmul.f32 %v5129_v28, %v5129_v28  ;;  %v5297_v28 = vmul.f32 %v5099_v41, %v5099_v41  ;;  %v5312_v41 = vmul.f32 %v5119_v19, %v5119_v19  ;;  %v2398_v19 = vmul.f32 %v5137_v58, %v5137_v58 }
 0x1d9   : > { %v5271_v48 = vadd.f32 1e-06, %v2482_v36  ;;  %v2437_v50 = vmul.f32 %v2107_v37, %v2107_v37  ;;  %v5273_v46 = vadd.f32 %v2108_v20, %v1995_v32  ;;  %v1997_v25 = vpop.f32.mrf.mxu0  ;;  %v2657_v53 = vmul.f32 %v4327_v61, %v5194_v54 }
 0x1da   : > { %v2110_v21 = vpop.f32.mrf.mxu1  ;;  %v5289_v32 = vsel %vm2639_vm13, %v2640_v52, %v2638_v27  ;;  %v5293_v20 = vmul.f32 %v1845_v44, %v1845_v44  ;;  %v5306_v27 = vmul.f32 %v5109_v5, %v5109_v5  ;;  %vm2721_vm3 = vcmp.eq.f32.partialorder %v5243_v13, inf }
 0x1db   : > { %4334 = vrsqrt.f32 %v5271_v48  ;;  %v2485_v33 = vadd.f32 %v2437_v50, %v2389_v1  ;;  %v2111_v38 = vadd.f32 %v2110_v21, %v1997_v25  ;;  %v2001_v47 = vpop.f32.mrf.mxu0  ;;  %v2659_v6 = vsel %vm2658_vm12, %v5194_v54, %v2657_v53 }
 0x1dc   : > { %v4329_v23 = vpop.eup %4328  ;;  %v2114_v36 = vpop.f32.mrf.mxu1  ;;  %v5291_v1 = vsel %vm2660_vm14, %v2661_v16, %v2659_v6  ;;  %v5302_v21 = vmul.f32 %v1855_v18, %v1855_v18  ;;  %v5316_v16 = vmul.f32 %v5123_v10, %v5123_v10  ;;  %v5320_v18 = vmul.f32 %v5127_v17, %v5127_v17 }
 0x1dd   : > { %v2440_v37 = vmul.f32 %v2111_v38, %v2111_v38  ;;  %v5287_v61 = vadd.f32 %v2114_v36, %v2001_v47  ;;  %v2003_v50 = vpop.f32.mrf.mxu0  ;;  %v2678_v54 = vmul.f32 %v4329_v23, %v5211_v24  ;;  %v5308_v38 = vmul.f32 %v1865_v8, %v1865_v8 }
 0x1de   : > { %v2116_v25 = vpop.f32.mrf.mxu1  ;;  %v2682_v17 = vand.u32 2147483648, %v5211_v24  ;;  %vm2742_vm4 = vcmp.eq.f32.partialorder %v5271_v48, inf  ;;  %vm2723_vm5 = vcmp.eq.f32.partialorder %v5243_v13, 0.0  ;;  %vm2744_vm6 = vcmp.eq.f32.partialorder %v5271_v48, 0.0 }
 0x1df   : > { %v2488_v52 = vadd.f32 %v2440_v37, %v2392_v14  ;;  %v2117_v44 = vadd.f32 %v2116_v25, %v2003_v50  ;;  %v2005_v23 = vpop.f32.mrf.mxu0  ;;  %v2395_v14 = vmul.f32 %v5133_v45, %v5133_v45  ;;  %v2680_v6 = vsel %vm2679_vm15, %v5211_v24, %v2678_v54 }
 0x1e0   : > { %v4331_v53 = vpop.eup %4330  ;;  %v2118_v5 = vpop.f32.mrf.mxu1  ;;  %v2703_v45 = vand.u32 2147483648, %v5226_v59 }
 0x1e1   : > { %v2443_v47 = vmul.f32 %v2117_v44, %v2117_v44  ;;  %v5324_v8 = vadd.f32 %v2118_v5, %v2005_v23  ;;  %v2007_v36 = vpop.f32.mrf.mxu0  ;;  %v2699_v37 = vmul.f32 %v4331_v53, %v5226_v59  ;;  %v5336_v23 = vadd.f32 1e-06, %v2485_v33 }
 0x1e2   : > { %v2120_v10 = vpop.f32.mrf.mxu1  ;;  %v5353_v33 = vmul.f32 %v5135_v51, %v5135_v51  ;;  %v5368_v51 = vmul.f32 %v5143_v39, %v5143_v39  ;;  %v2361_v39 = vmul.f32 %v5149_v9, %v5149_v9 }
 0x1e3   : > { %v5332_v50 = vadd.f32 %v2443_v47, %v2395_v14  ;;  %v2121_v25 = vadd.f32 %v2120_v10, %v2007_v36  ;;  %v2011_v5 = vpop.f32.mrf.mxu0  ;;  %v2701_v54 = vsel %vm2700_vm0, %v5226_v59, %v2699_v37  ;;  %v5343_v14 = vsel %vm2681_vm1, %v2682_v17, %v2680_v6 }
 0x1e4   : > { %v4333_v44 = vpop.eup %4332  ;;  %v2124_v58 = vpop.f32.mrf.mxu1  ;;  %v5345_v47 = vsel %vm2702_vm2, %v2703_v45, %v2701_v54  ;;  %v5349_v36 = vmul.f32 %v5131_v34, %v5131_v34  ;;  %v5360_v6 = vmul.f32 %v5139_v2, %v5139_v2  ;;  %v2401_v17 = vmul.f32 %v5141_v12, %v5141_v12 }
 0x1e5   : > { %v2446_v3 = vmul.f32 %v2121_v25, %v2121_v25  ;;  %v5341_v53 = vadd.f32 %v2124_v58, %v2011_v5  ;;  %v2013_v24 = vpop.f32.mrf.mxu0  ;;  %v2720_v37 = vmul.f32 %v4333_v44, %v5243_v13  ;;  %v2404_v5 = vmul.f32 %v5145_v0, %v5145_v0 }
 0x1e6   : > { %v2126_v10 = vpop.f32.mrf.mxu1  ;;  %4336 = vrsqrt.f32 %v5336_v23  ;;  %v5373_v44 = vadd.f32 1e-06, %v2488_v52  ;;  %v5377_v12 = vmul.f32 %v5147_v35, %v5147_v35  ;;  %v2724_v52 = vand.u32 2147483648, %v5243_v13 }
 0x1e7   : > { %v5364_v34 = vadd.f32 %v2446_v3, %v2398_v19  ;;  %v2127_v25 = vadd.f32 %v2126_v10, %v2013_v24  ;;  %v2015_v2 = vpop.f32.mrf.mxu0  ;;  %v2722_v24 = vsel %vm2721_vm3, %v5243_v13, %v2720_v37  ;;  %v2745_v35 = vand.u32 2147483648, %v5271_v48 }
 0x1e8   : > { %v4335_v45 = vpop.eup %4334  ;;  %v2128_v58 = vpop.f32.mrf.mxu1  ;;  %4338 = vrsqrt.f32 %v5373_v44  ;;  %v5393_v7 = vsel %vm2723_vm5, %v2724_v52, %v2722_v24  ;;  %v5405_v13 = vmul.f32 %v5166_v29, %v5166_v29  ;;  %v5419_v29 = vmul.f32 %v5187_v15, %v5187_v15 }
 0x1e9   : > { %v2449_v3 = vmul.f32 %v2127_v25, %v2127_v25  ;;  %v5379_v19 = vadd.f32 %v2128_v58, %v2015_v2  ;;  %v2017_v54 = vpop.f32.mrf.mxu0  ;;  %v2741_v10 = vmul.f32 %v4335_v45, %v5271_v48  ;;  %6070 = vst [vmem:[#allocation20_spill] sm:$0xff] %v5393_v7  ;;  %v2364_v45 = vmul.f32 %v5153_v30, %v5153_v30 }
 0x1ea   : > { %v2130_v0 = vpop.f32.mrf.mxu1  ;;  %v5436_v15 = vmul.f32 %v5245_v56, %v5245_v56  ;;  %vm2763_vm7 = vcmp.eq.f32.partialorder %v5336_v23, inf }
 0x1eb   : > { %v2497_v59 = vadd.f32 %v2449_v3, %v2401_v17  ;;  %v2131_v57 = vadd.f32 %v2130_v0, %v2017_v54  ;;  %v2167_v25 = vpop.f32.mrf.mxu0  ;;  %v2743_v9 = vsel %vm2742_vm4, %v5271_v48, %v2741_v10  ;;  %v5401_v3 = vmul.f32 %v5159_v4, %v5159_v4 }
 0x1ec   : > { %v2280_v2 = vpop.f32.mrf.mxu1  ;;  %v5395_v17 = vsel %vm2744_vm6, %v2745_v35, %v2743_v9  ;;  %v5411_v48 = vmul.f32 %v5173_v62, %v5173_v62  ;;  %v5415_v4 = vmul.f32 %v5180_v26, %v5180_v26  ;;  %v5423_v10 = vmul.f32 %v5196_v49, %v5196_v49 }
 0x1ed   : > { %v2452_v37 = vmul.f32 %v2131_v57, %v2131_v57  ;;  %v2281_v58 = vadd.f32 %v2280_v2, %v2167_v25  ;;  %v2169_v54 = vpop.f32.mrf.mxu0  ;;  %v5427_v35 = vmul.f32 %v5213_v42, %v5213_v42  ;;  %v5431_v25 = vmul.f32 %v5228_v43, %v5228_v43 }
 0x1ee   : > { %v2282_v0 = vpop.f32.mrf.mxu1  ;;  %v5440_v49 = vmul.f32 %v5273_v46, %v5273_v46  ;;  %v5444_v42 = vmul.f32 %v5287_v61, %v5287_v61  ;;  %v5455_v46 = vmul.f32 %v5324_v8, %v5324_v8  ;;  %v5458_v61 = vadd.f32 1e-06, %v5364_v34 }
 0x1ef   : > { %v2500_v24 = vadd.f32 %v2452_v37, %v2404_v5  ;;  %v2408_v52 = vmul.f32 %v2281_v58, %v2281_v58  ;;  %v2283_v30 = vadd.f32 %v2282_v0, %v2169_v54  ;;  %v2171_v62 = vpop.f32.mrf.mxu0  ;;  %v5447_v37 = vadd.f32 1e-06, %v5332_v50 }
 0x1f0   : > { %v2284_v5 = vpop.f32.mrf.mxu1  ;;  %6071 = vst [vmem:[#allocation21_spill] sm:$0xff] %v5458_v61  ;;  %v5468_v8 = vmul.f32 %v5341_v53, %v5341_v53  ;;  %v5470_v34 = vadd.f32 1e-06, %v2497_v59 }
 0x1f1   : > { %v2456_v26 = vadd.f32 %v2408_v52, %v5251_v60  ;;  %v2409_v2 = vmul.f32 %v2283_v30, %v2283_v30  ;;  %v2285_v9 = vadd.f32 %v2284_v5, %v2171_v62  ;;  %v2173_v43 = vpop.f32.mrf.mxu0 }
 0x1f2   : > { %v2286_v58 = vpop.f32.mrf.mxu1  ;;  %6072 = vst [vmem:[#allocation22_spill] sm:$0xff] %v5470_v34 }
 0x1f3   : > { %v5449_v60 = vadd.f32 1e-06, %v2456_v26  ;;  %v2457_v54 = vadd.f32 %v2409_v2, %v2361_v39  ;;  %v2411_v0 = vmul.f32 %v2285_v9, %v2285_v9  ;;  %v2287_v52 = vadd.f32 %v2286_v58, %v2173_v43  ;;  %v2177_v50 = vpop.f32.mrf.mxu0  ;;  %v4337_v5 = vpop.eup %4336 }
 0x1f4   : > { %v2290_v30 = vpop.f32.mrf.mxu1 }
 0x1f5   : > { %4340 = vrsqrt.f32 %v5449_v60  ;;  %v5462_v39 = vadd.f32 1e-06, %v2457_v54  ;;  %v2459_v26 = vadd.f32 %v2411_v0, %v5253_v63  ;;  %v2291_v2 = vadd.f32 %v2290_v30, %v2177_v50  ;;  %v2179_v43 = vpop.f32.mrf.mxu0  ;;  %v4339_v59 = vpop.eup %4338 }
 0x1f6   : > { %4342 = vrsqrt.f32 %v5447_v37  ;;  %v2412_v9 = vmul.f32 %v2287_v52, %v2287_v52  ;;  %v2292_v58 = vpop.f32.mrf.mxu1  ;;  %v2762_v30 = vmul.f32 %v4337_v5, %v5336_v23  ;;  %vm2560_vm8 = vcmp.eq.f32.partialorder %v5449_v60, inf }
 0x1f7   : > { %4344 = vrsqrt.f32 %v5462_v39  ;;  %v5473_v62 = vadd.f32 1e-06, %v2459_v26  ;;  %v2414_v54 = vmul.f32 %v2291_v2, %v2291_v2  ;;  %v2293_v57 = vadd.f32 %v2292_v58, %v2179_v43  ;;  %v2181_v0 = vpop.f32.mrf.mxu0 }
 0x1f8   : > { %4346 = vrsqrt.f32 %v5458_v61  ;;  %v2460_v63 = vadd.f32 %v2412_v9, %v2364_v45  ;;  %v2294_v50 = vpop.f32.mrf.mxu1  ;;  %v5483_v26 = vmul.f32 %v5379_v19, %v5379_v19  ;;  %v5485_v45 = vadd.f32 1e-06, %v2500_v24 }
 0x1f9   : > { %4348 = vrsqrt.f32 %v5473_v62  ;;  %v2462_v52 = vadd.f32 %v2414_v54, %v5260_v31  ;;  %v2415_v56 = vmul.f32 %v2293_v57, %v2293_v57  ;;  %v2295_v7 = vadd.f32 %v2294_v50, %v2181_v0  ;;  %v2183_v5 = vpop.f32.mrf.mxu0 }
 0x1fa   : > { %4350 = vrsqrt.f32 %v5470_v34  ;;  %6073 = vst [vmem:[#allocation23_spill] sm:$0xff] %v5485_v45  ;;  %v5487_v2 = vadd.f32 1e-06, %v2460_v63  ;;  %v2296_v9 = vpop.f32.mrf.mxu1  ;;  %v5496_v19 = vsel %vm2763_vm7, %v5336_v23, %v2762_v30  ;;  %vm2562_vm9 = vcmp.eq.f32.partialorder %v5449_v60, 0.0 }
 0x1fb   : > { %v5489_v43 = vadd.f32 1e-06, %v2462_v52  ;;  %v2463_v58 = vadd.f32 %v2415_v56, %v5401_v3  ;;  %v2417_v53 = vmul.f32 %v2295_v7, %v2295_v7  ;;  %v2297_v31 = vadd.f32 %v2296_v9, %v2183_v5  ;;  %v2187_v57 = vpop.f32.mrf.mxu0 }
 0x1fc   : > { %4352 = vrsqrt.f32 %v5487_v2  ;;  %v2300_v54 = vpop.f32.mrf.mxu1  ;;  %v5503_v7 = vmul.f32 %v4339_v59, %v5373_v44  ;;  %vm2567_vm10 = vcmp.eq.f32.partialorder %v5462_v39, inf  ;;  %vm2581_vm11 = vcmp.eq.f32.partialorder %v5473_v62, inf }
 0x1fd   : > { %4354 = vrsqrt.f32 %v5489_v43  ;;  %v2465_v0 = vadd.f32 %v2417_v53, %v5293_v20  ;;  %v2418_v3 = vmul.f32 %v2297_v31, %v2297_v31  ;;  %v5506_v56 = vadd.f32 1e-06, %v2463_v58  ;;  %v2189_v52 = vpop.f32.mrf.mxu0 }
 0x1fe   : > { %4356 = vrsqrt.f32 %v5485_v45  ;;  %v2301_v50 = vadd.f32 %v2300_v54, %v2187_v57  ;;  %v2302_v30 = vpop.f32.mrf.mxu1  ;;  %v2563_v20 = vand.u32 2147483648, %v5449_v60  ;;  %vm2569_vm12 = vcmp.eq.f32.partialorder %v5462_v39, 0.0 }
 0x1ff   : > { %v5509_v5 = vadd.f32 1e-06, %v2465_v0  ;;  %v2466_v9 = vadd.f32 %v2418_v3, %v5405_v13  ;;  %v2303_v63 = vadd.f32 %v2302_v30, %v2189_v52  ;;  %v2191_v59 = vpop.f32.mrf.mxu0  ;;  %vm2583_vm13 = vcmp.eq.f32.partialorder %v5473_v62, 0.0 }
 0x200   : > { %v2420_v53 = vmul.f32 %v2301_v50, %v2301_v50  ;;  %v2304_v31 = vpop.f32.mrf.mxu1  ;;  %vm2588_vm14 = vcmp.eq.f32.partialorder %v5487_v2, inf  ;;  %vm2590_vm15 = vcmp.eq.f32.partialorder %v5487_v2, 0.0  ;;  %vm2602_vm0 = vcmp.eq.f32.partialorder %v5489_v43, inf }
 0x201   : > { %4358 = vrsqrt.f32 %v5509_v5  ;;  %v5518_v54 = vadd.f32 1e-06, %v2466_v9  ;;  %v2421_v0 = vmul.f32 %v2303_v63, %v2303_v63  ;;  %v2305_v13 = vadd.f32 %v2304_v31, %v2191_v59  ;;  %v2193_v52 = vpop.f32.mrf.mxu0 }
 0x202   : > { %v4341_v3 = vpop.eup %4340  ;;  %4360 = vrsqrt.f32 %v5506_v56  ;;  %v2468_v50 = vadd.f32 %v2420_v53, %v5297_v28  ;;  %v2306_v30 = vpop.f32.mrf.mxu1  ;;  %vm2604_vm1 = vcmp.eq.f32.partialorder %v5489_v43, 0.0  ;;  %vm2623_vm2 = vcmp.eq.f32.partialorder %v5509_v5, inf }
 0x203   : > { %v5526_v57 = vpop.eup %4342  ;;  %4362 = vrsqrt.f32 %v5518_v54  ;;  %v2469_v63 = vadd.f32 %v2421_v0, %v5411_v48  ;;  %v2423_v9 = vmul.f32 %v2305_v13, %v2305_v13  ;;  %v2307_v59 = vadd.f32 %v2306_v30, %v2193_v52  ;;  %v2197_v53 = vpop.f32.mrf.mxu0 }
 0x204   : > { %6074 = vst [vmem:[#allocation24_spill] sm:$0xff] %v5526_v57  ;;  %v4345_v31 = vpop.eup %4344  ;;  %v5532_v28 = vadd.f32 1e-06, %v2468_v50  ;;  %v2310_v45 = vpop.f32.mrf.mxu1  ;;  %v2559_v24 = vmul.f32 %v4341_v3, %v5449_v60  ;;  %vm2625_vm3 = vcmp.eq.f32.partialorder %v5509_v5, 0.0  ;;  %vm2609_vm4 = vcmp.eq.f32.partialorder %v5506_v56, inf }
 0x205   : > { %v5537_v57 = vpop.eup %4346  ;;  %v5539_v48 = vadd.f32 1e-06, %v2469_v63  ;;  %v2471_v0 = vadd.f32 %v2423_v9, %v5302_v21  ;;  %v2424_v13 = vmul.f32 %v2307_v59, %v2307_v59  ;;  %v2311_v52 = vadd.f32 %v2310_v45, %v2197_v53  ;;  %v2199_v3 = vpop.f32.mrf.mxu0 }
 0x206   : > { %6075 = vst [vmem:[#allocation25_spill] sm:$0xff] %v5537_v57  ;;  %v4349_v50 = vpop.eup %4348  ;;  %4364 = vrsqrt.f32 %v5532_v28  ;;  %v2312_v30 = vpop.f32.mrf.mxu1  ;;  %v2561_v34 = vsel %vm2560_vm8, %v5449_v60, %v2559_v24  ;;  %v2566_v63 = vmul.f32 %v4345_v31, %v5462_v39  ;;  %vm2630_vm5 = vcmp.eq.f32.partialorder %v5518_v54, inf }
 0x207   : > { %v5550_v21 = vpop.eup %4350  ;;  %4366 = vrsqrt.f32 %v5539_v48  ;;  %v5553_v45 = vadd.f32 1e-06, %v2471_v0  ;;  %v2472_v9 = vadd.f32 %v2424_v13, %v5415_v4  ;;  %v2426_v59 = vmul.f32 %v2311_v52, %v2311_v52  ;;  %v2201_v57 = vpop.f32.mrf.mxu0 }
 0x208   : > { %6076 = vst [vmem:[#allocation26_spill] sm:$0xff] %v5550_v21  ;;  %v2313_v53 = vadd.f32 %v2312_v30, %v2199_v3  ;;  %v2314_v61 = vpop.f32.mrf.mxu1  ;;  %v2564_v24 = vsel %vm2562_vm9, %v2563_v20, %v2561_v34  ;;  %v2580_v31 = vmul.f32 %v4349_v50, %v5473_v62  ;;  %v2568_v58 = vsel %vm2567_vm10, %v5462_v39, %v2566_v63 }
 0x209   : > { %v4353_v21 = vpop.eup %4352  ;;  %4368 = vrsqrt.f32 %v5553_v45  ;;  %v5564_v0 = vadd.f32 1e-06, %v2472_v9  ;;  %v2474_v4 = vadd.f32 %v2426_v59, %v5306_v27  ;;  %v2315_v13 = vadd.f32 %v2314_v61, %v2201_v57  ;;  %v2203_v60 = vpop.f32.mrf.mxu0 }
 0x20a   : > { %v4355_v52 = vpop.eup %4354  ;;  %v2427_v3 = vmul.f32 %v2313_v53, %v2313_v53  ;;  %v2316_v34 = vpop.f32.mrf.mxu1  ;;  %v2582_v20 = vsel %vm2581_vm11, %v5473_v62, %v2580_v31  ;;  %v6077_v50 = vand.u32 2147483648, %v5462_v39  ;;  %v2587_v63 = vmul.f32 %v4353_v21, %v5487_v2 }
 0x20b   : > { %v5576_v9 = vpop.eup %4356  ;;  %4370 = vrsqrt.f32 %v5564_v0  ;;  %v5579_v27 = vadd.f32 1e-06, %v2474_v4  ;;  %v2429_v61 = vmul.f32 %v2315_v13, %v2315_v13  ;;  %v2317_v57 = vadd.f32 %v2316_v34, %v2203_v60  ;;  %v2207_v39 = vpop.f32.mrf.mxu0 }
 0x20c   : > { %v2571_v30 = vsel %vm2569_vm12, %v6077_v50, %v2568_v58  ;;  %6078 = vst [vmem:[#allocation27_spill] sm:$0xff] %v5576_v9  ;;  %v2475_v59 = vadd.f32 %v2427_v3, %v5419_v29  ;;  %v2320_v58 = vpop.f32.mrf.mxu1  ;;  %v6079_v21 = vand.u32 2147483648, %v5473_v62  ;;  %v2589_v31 = vsel %vm2588_vm14, %v5487_v2, %v2587_v63 }
 0x20d   : > { %v2601_v4 = vmul.f32 %v4355_v52, %v5489_v43  ;;  %4372 = vrsqrt.f32 %v5579_v27  ;;  %v2477_v13 = vadd.f32 %v2429_v61, %v5308_v38  ;;  %v2430_v60 = vmul.f32 %v2317_v57, %v2317_v57 }
 0x20e   : > { %v2585_v53 = vsel %vm2583_vm13, %v6079_v21, %v2582_v20  ;;  %v2321_v34 = vadd.f32 %v2320_v58, %v2207_v39  ;;  %vm2611_vm6 = vcmp.eq.f32.partialorder %v5506_v56, 0.0  ;;  %vm2632_vm7 = vcmp.eq.f32.partialorder %v5518_v54, 0.0  ;;  %v4359_v29 = vpop.eup %4358  ;;  %v2209_v20 = vpop.f32.mrf.mxu0 }
 0x20f   : > { %v5597_v3 = vadd.f32 1e-06, %v2475_v59  ;;  %v2888_v62 = vpack.c.bf16 %v2585_v53, %v2564_v24  ;;  %v2322_v50 = vpop.f32.mrf.mxu1  ;;  %v6080_v63 = vand.u32 2147483648, %v5487_v2  ;;  %v2603_v38 = vsel %vm2602_vm0, %v5489_v43, %v2601_v4  ;;  %v4361_v61 = vpop.eup %4360 }
 0x210   : > { %v5606_v57 = vadd.f32 1e-06, %v2477_v13  ;;  %v2478_v39 = vadd.f32 %v2430_v60, %v5423_v10  ;;  %v2432_v58 = vmul.f32 %v2321_v34, %v2321_v34  ;;  %v2323_v59 = vadd.f32 %v2322_v50, %v2209_v20  ;;  %v4363_v21 = vpop.eup %4362  ;;  %v2211_v53 = vpop.f32.mrf.mxu0 }
 0x211   : > { %v2592_v52 = vsel %vm2590_vm15, %v6080_v63, %v2589_v31  ;;  %4374 = vrsqrt.f32 %v5597_v3  ;;  %3135 = vmatprep.mubr.bf16.mxu0 %v2888_v62  ;;  %v2324_v9 = vpop.f32.mrf.mxu1  ;;  %v6081_v2 = vand.u32 2147483648, %v5489_v43  ;;  %v2622_v4 = vmul.f32 %v4359_v29, %v5509_v5 }
 0x212   : > { %v2889_v24 = vpack.c.bf16 %v2592_v52, %v2571_v30  ;;  %4376 = vrsqrt.f32 %v5606_v57  ;;  %v5616_v13 = vadd.f32 1e-06, %v2478_v39  ;;  %v2480_v10 = vadd.f32 %v2432_v58, %v5312_v41  ;;  %v2213_v62 = vpop.f32.mrf.mxu0 }
 0x213   : > { %v2606_v31 = vsel %vm2604_vm1, %v6081_v2, %v2603_v38  ;;  %v2433_v60 = vmul.f32 %v2323_v59, %v2323_v59  ;;  %v6082_v34 = vpack.c.bf16 %v5215_v40, %v5207_v22  ;;  %v2325_v30 = vadd.f32 %v2324_v9, %v2211_v53  ;;  %v2326_v20 = vpop.f32.mrf.mxu1  ;;  %v4365_v63 = vpop.eup %4364 }
 0x214   : > { %3886 = vmatprep.mubr.bf16.mxu1 %v2889_v24  ;;  %v2624_v43 = vsel %vm2623_vm2, %v5509_v5, %v2622_v4  ;;  %v2608_v29 = vmul.f32 %v4361_v61, %v5506_v56  ;;  %v2629_v50 = vmul.f32 %v4363_v21, %v5518_v54  ;;  %4378 = vrsqrt.f32 %v5616_v13  ;;  %v5631_v52 = vpop.eup %4366  ;;  %v2217_v38 = vpop.f32.mrf.mxu0 }
 0x215   : > { %3136 = vmatmul.mubr.bf16.vlgmr.msra.gmra.mxu0 %v6082_v34  ;;  %v5628_v41 = vadd.f32 1e-06, %v2480_v10  ;;  %v2481_v22 = vadd.f32 %v2433_v60, %v5427_v35  ;;  %v2327_v40 = vadd.f32 %v2326_v20, %v2213_v62  ;;  %v2435_v9 = vmul.f32 %v2325_v30, %v2325_v30  ;;  %v2330_v39 = vpop.f32.mrf.mxu1 }
 0x216   : > { %v6083_v58 = vand.u32 2147483648, %v5509_v5  ;;  %v2610_v59 = vsel %vm2609_vm4, %v5506_v56, %v2608_v29  ;;  %v2631_v21 = vsel %vm2630_vm5, %v5518_v54, %v2629_v50  ;;  %v2331_v53 = vadd.f32 %v2330_v39, %v2217_v38  ;;  %v4369_v2 = vpop.eup %4368  ;;  %v2219_v5 = vpop.f32.mrf.mxu0 }
 0x217   : > { %4380 = vrsqrt.f32 %v5628_v41  ;;  %v5644_v35 = vadd.f32 1e-06, %v2481_v22  ;;  %v2436_v24 = vmul.f32 %v2327_v40, %v2327_v40  ;;  %v2483_v4 = vadd.f32 %v2435_v9, %v5316_v16  ;;  %v2332_v60 = vpop.f32.mrf.mxu1 }
 0x218   : > { %v2627_v61 = vsel %vm2625_vm3, %v6083_v58, %v2624_v43  ;;  %v6084_v34 = vand.u32 2147483648, %v5506_v56  ;;  %v6085_v62 = vand.u32 2147483648, %v5518_v54  ;;  %v2438_v29 = vmul.f32 %v2331_v53, %v2331_v53  ;;  %v5657_v16 = vpop.eup %4370  ;;  %v2221_v40 = vpop.f32.mrf.mxu0 }
 0x219   : > { %v2891_v10 = vpack.c.bf16 %v2627_v61, %v2606_v31  ;;  %4382 = vrsqrt.f32 %v5644_v35  ;;  %v2484_v43 = vadd.f32 %v2436_v24, %v5431_v25  ;;  %v2333_v50 = vadd.f32 %v2332_v60, %v2219_v5  ;;  %v2334_v56 = vpop.f32.mrf.mxu1 }
 0x21a   : > { %v2613_v30 = vsel %vm2611_vm6, %v6084_v34, %v2610_v59  ;;  %v2634_v20 = vsel %vm2632_vm7, %v6085_v62, %v2631_v21  ;;  %v5659_v31 = vadd.f32 1e-06, %v2483_v4  ;;  %v2643_v9 = vmul.f32 %v4365_v63, %v5532_v28  ;;  %v5669_v61 = vpop.eup %4372  ;;  %v2223_v59 = vpop.f32.mrf.mxu0 }
 0x21b   : > { %3143 = vmatprep.mubr.bf16.mxu0 %v2891_v10  ;;  %v2892_v22 = vpack.c.bf16 %v2634_v20, %v2613_v30  ;;  %vm2644_vm8 = vcmp.eq.f32.partialorder %v5532_v28, inf  ;;  %v5663_v54 = vadd.f32 1e-06, %v2484_v43  ;;  %v2486_v38 = vadd.f32 %v2438_v29, %v5320_v18  ;;  %v2336_v21 = vpop.f32.mrf.mxu1 }
 0x21c   : > { %v2439_v39 = vmul.f32 %v2333_v50, %v2333_v50  ;;  %v6086_v25 = vpack.c.bf16 %v5247_v11, %v5239_v55  ;;  %v2335_v58 = vadd.f32 %v2334_v56, %v2221_v40  ;;  %4384 = vrsqrt.f32 %v5659_v31  ;;  %v2227_v4 = vpop.f32.mrf.mxu0 }
 0x21d   : > { %3887 = vmatmul.mubr.bf16.vlgmr.msra.gmra.mxu1 %v2892_v22  ;;  %v2645_v63 = vsel %vm2644_vm8, %v5532_v28, %v2643_v9  ;;  %vm2646_vm9 = vcmp.eq.f32.partialorder %v5532_v28, 0.0  ;;  %v2647_v24 = vand.u32 2147483648, %v5532_v28  ;;  %4386 = vrsqrt.f32 %v5663_v54  ;;  %v2340_v10 = vpop.f32.mrf.mxu1 }
 0x21e   : > { %3144 = vmatmul.mubr.bf16.gmra.mxu0 %v6086_v25  ;;  %v5676_v18 = vadd.f32 1e-06, %v2486_v38  ;;  %v2487_v55 = vadd.f32 %v2439_v39, %v5436_v15  ;;  %v2441_v11 = vmul.f32 %v2335_v58, %v2335_v58  ;;  %v2337_v53 = vadd.f32 %v2336_v21, %v2223_v59  ;;  %v5681_v34 = vpop.eup %4374  ;;  %v2229_v29 = vpop.f32.mrf.mxu0 }
 0x21f   : > { %v2648_v5 = vsel %vm2646_vm9, %v2647_v24, %v2645_v63  ;;  %v2664_v60 = vmul.f32 %v4369_v2, %v5553_v45  ;;  %vm2665_vm10 = vcmp.eq.f32.partialorder %v5553_v45, inf  ;;  %v2341_v62 = vadd.f32 %v2340_v10, %v2227_v4  ;;  %v5687_v20 = vpop.eup %4376  ;;  %v2342_v50 = vpop.f32.mrf.mxu1 }
 0x220   : > { %4388 = vrsqrt.f32 %v5676_v18  ;;  %v5684_v28 = vadd.f32 1e-06, %v2487_v55  ;;  %v2489_v30 = vadd.f32 %v2441_v11, %v5349_v36  ;;  %v2442_v15 = vmul.f32 %v2337_v53, %v2337_v53  ;;  %v2231_v25 = vpop.f32.mrf.mxu0 }
 0x221   : > { %v2666_v43 = vsel %vm2665_vm10, %v5553_v45, %v2664_v60  ;;  %vm2667_vm11 = vcmp.eq.f32.partialorder %v5553_v45, 0.0  ;;  %v2668_v2 = vand.u32 2147483648, %v5553_v45  ;;  %v2444_v40 = vmul.f32 %v2341_v62, %v2341_v62  ;;  %v5695_v9 = vpop.eup %4378  ;;  %v2344_v45 = vpop.f32.mrf.mxu1 }
 0x222   : > { %4390 = vrsqrt.f32 %v5684_v28  ;;  %v5693_v22 = vadd.f32 1e-06, %v2489_v30  ;;  %v2343_v56 = vadd.f32 %v2342_v50, %v2229_v29  ;;  %v2490_v36 = vadd.f32 %v2442_v15, %v5440_v49  ;;  %v2233_v55 = vpop.f32.mrf.mxu0 }
 0x223   : > { %v2669_v38 = vsel %vm2667_vm11, %v2668_v2, %v2666_v43  ;;  %v2650_v39 = vmul.f32 %v5631_v52, %v5539_v48  ;;  %vm2651_vm12 = vcmp.eq.f32.partialorder %v5539_v48, inf  ;;  %v2492_v58 = vadd.f32 %v2444_v40, %v5353_v33  ;;  %v2346_v11 = vpop.f32.mrf.mxu1 }
 0x224   : > { %4392 = vrsqrt.f32 %v5693_v22  ;;  %v2894_v59 = vpack.c.bf16 %v2669_v38, %v2648_v5  ;;  %v2445_v21 = vmul.f32 %v2343_v56, %v2343_v56  ;;  %v5703_v63 = vpop.eup %4380  ;;  %v5705_v24 = vadd.f32 1e-06, %v2490_v36  ;;  %v2237_v30 = vpop.f32.mrf.mxu0 }
 0x225   : > { %v2652_v49 = vsel %vm2651_vm12, %v5539_v48, %v2650_v39  ;;  %vm2653_vm13 = vcmp.eq.f32.partialorder %v5539_v48, 0.0  ;;  %v2654_v52 = vand.u32 2147483648, %v5539_v48  ;;  %v5710_v53 = vadd.f32 1e-06, %v2492_v58 }
 0x226   : > { %3151 = vmatprep.mubr.bf16.mxu0 %v2894_v59  ;;  %v2493_v4 = vadd.f32 %v2445_v21, %v5444_v42  ;;  %v2671_v33 = vmul.f32 %v5657_v16, %v5564_v0  ;;  %vm2672_vm14 = vcmp.eq.f32.partialorder %v5564_v0, inf  ;;  %v5716_v10 = vpop.eup %4382  ;;  %4394 = vrsqrt.f32 %v5705_v24  ;;  %v2350_v42 = vpop.f32.mrf.mxu1 }
 0x227   : > { %v6087_v5 = vpack.c.bf16 %v5291_v1, %v5289_v32  ;;  %v2655_v48 = vsel %vm2653_vm13, %v2654_v52, %v2652_v49  ;;  %vm2674_vm15 = vcmp.eq.f32.partialorder %v5564_v0, 0.0  ;;  %v2675_v60 = vand.u32 2147483648, %v5564_v0  ;;  %v2239_v29 = vpop.f32.mrf.mxu0 }
 0x228   : > { %4396 = vrsqrt.f32 %v5710_v53  ;;  %v5725_v16 = vadd.f32 1e-06, %v2493_v4  ;;  %v2673_v62 = vsel %vm2672_vm14, %v5564_v0, %v2671_v33  ;;  %v2345_v15 = vadd.f32 %v2344_v45, %v2231_v25  ;;  %v2352_v50 = vpop.f32.mrf.mxu1 }
 0x229   : > { %3152 = vmatmul.mubr.bf16.gmra.mxu0 %v6087_v5  ;;  %vm2765_vm0 = vcmp.eq.f32.partialorder %v5336_v23, 0.0  ;;  %vm2784_vm1 = vcmp.eq.f32.partialorder %v5373_v44, inf  ;;  %v2676_v32 = vsel %vm2674_vm15, %v2675_v60, %v2673_v62  ;;  %v2347_v1 = vadd.f32 %v2346_v11, %v2233_v55  ;;  %v5732_v40 = vpop.eup %4384  ;;  %v2241_v55 = vpop.f32.mrf.mxu0 }
 0x22a   : > { %v2351_v43 = vadd.f32 %v2350_v42, %v2237_v30  ;;  %v2685_v2 = vmul.f32 %v5669_v61, %v5579_v27  ;;  %4398 = vrsqrt.f32 %v5725_v16  ;;  %v2895_v56 = vpack.c.bf16 %v2676_v32, %v2655_v48  ;;  %v5736_v0 = vpop.eup %4386  ;;  %v2354_v11 = vpop.f32.mrf.mxu1 }
 0x22b   : > { %v2447_v36 = vmul.f32 %v2345_v15, %v2345_v15  ;;  %vm2686_vm2 = vcmp.eq.f32.partialorder %v5579_v27, inf  ;;  %v2448_v38 = vmul.f32 %v2347_v1, %v2347_v1  ;;  %vm2688_vm3 = vcmp.eq.f32.partialorder %v5579_v27, 0.0  ;;  %v2243_v62 = vpop.f32.mrf.mxu0 }
 0x22c   : > { %v2450_v39 = vmul.f32 %v2351_v43, %v2351_v43  ;;  %v2687_v25 = vsel %vm2686_vm2, %v5579_v27, %v2685_v2  ;;  %3890 = vmatprep.mubr.bf16.mxu1 %v2895_v56  ;;  %v2689_v45 = vand.u32 2147483648, %v5579_v27  ;;  %v2706_v58 = vmul.f32 %v5687_v20, %v5606_v57  ;;  %v2356_v15 = vpop.f32.mrf.mxu1 }
 0x22d   : > { %v2495_v61 = vadd.f32 %v2447_v36, %v5360_v6  ;;  %vm2707_vm4 = vcmp.eq.f32.partialorder %v5606_v57, inf  ;;  %v5745_v59 = vpop.eup %4388  ;;  %v2496_v21 = vadd.f32 %v2448_v38, %v5455_v46  ;;  %vm2709_vm5 = vcmp.eq.f32.partialorder %v5606_v57, 0.0 }
 0x22e   : > { %v2498_v49 = vadd.f32 %v2450_v39, %v5368_v51  ;;  %v2710_v52 = vand.u32 2147483648, %v5606_v57  ;;  %v2690_v27 = vsel %vm2688_vm3, %v2689_v45, %v2687_v25  ;;  %v2708_v4 = vsel %vm2707_vm4, %v5606_v57, %v2706_v58 }
 0x22f   : > { %v5751_v6 = vadd.f32 1e-06, %v2495_v61  ;;  %v2353_v20 = vadd.f32 %v2352_v50, %v2239_v29  ;;  %v5754_v33 = vpop.eup %4390  ;;  %v5756_v5 = vadd.f32 1e-06, %v2496_v21  ;;  %v2692_v51 = vmul.f32 %v5681_v34, %v5597_v3 }
 0x230   : > { %v5758_v48 = vadd.f32 1e-06, %v2498_v49  ;;  %v2711_v46 = vsel %vm2709_vm5, %v2710_v52, %v2708_v4  ;;  %vm2693_vm6 = vcmp.eq.f32.partialorder %v5597_v3, inf  ;;  %v6088_v32 = vand.u32 2147483648, %v5336_v23 }
 0x231   : > { %4400 = vrsqrt.f32 %v5751_v6  ;;  %v2897_v60 = vpack.c.bf16 %v2711_v46, %v2690_v27  ;;  %v2451_v30 = vmul.f32 %v2353_v20, %v2353_v20  ;;  %v5764_v42 = vpop.eup %4392  ;;  %v2694_v57 = vsel %vm2693_vm6, %v5597_v3, %v2692_v51 }
 0x232   : > { %4402 = vrsqrt.f32 %v5756_v5  ;;  %v5773_v34 = vsel %vm2765_vm0, %v6088_v32, %v5496_v19  ;;  %v5779_v1 = vsel %vm2784_vm1, %v5373_v44, %v5503_v7  ;;  %vm2695_vm7 = vcmp.eq.f32.partialorder %v5597_v3, 0.0 }
 0x233   : > { %3159 = vmatprep.mubr.bf16.mxu0 %v2897_v60  ;;  %v2499_v43 = vadd.f32 %v2451_v30, %v5468_v8  ;;  %v2696_v2 = vand.u32 2147483648, %v5597_v3  ;;  %v2713_v29 = vmul.f32 %v5695_v9, %v5616_v13  ;;  %4404 = vrsqrt.f32 %v5758_v48  ;;  %v5792_v50 = vpop.eup %4394  ;;  %v6090_v60 = vld [vmem:[#allocation20_spill] sm:$0xff] }
 0x234   : > { %v6089_v23 = vpack.c.bf16 %v5345_v47, %v5343_v14  ;;  %vm2714_vm8 = vcmp.eq.f32.partialorder %v5616_v13, inf  ;;  %v2717_v19 = vand.u32 2147483648, %v5616_v13  ;;  %v2355_v7 = vadd.f32 %v2354_v11, %v2241_v55 }
 0x235   : > { %v2715_v8 = vsel %vm2714_vm8, %v5616_v13, %v2713_v29  ;;  %vm2716_vm9 = vcmp.eq.f32.partialorder %v5616_v13, 0.0  ;;  %v2357_v3 = vadd.f32 %v2356_v15, %v2243_v62  ;;  %v2727_v9 = vmul.f32 %v5703_v63, %v5628_v41  ;;  %v5798_v56 = vpop.eup %4396 }
 0x236   : > { %3160 = vmatmul.mubr.bf16.gmra.mxu0 %v6089_v23  ;;  %v5800_v36 = vadd.f32 1e-06, %v2499_v43  ;;  %v2697_v14 = vsel %vm2695_vm7, %v2696_v2, %v2694_v57  ;;  %v2718_v47 = vsel %vm2716_vm9, %v2717_v19, %v2715_v8  ;;  %v2453_v38 = vmul.f32 %v2355_v7, %v2355_v7  ;;  %v6093_v19 = vld [vmem:[#allocation21_spill] sm:$0xff] }
 0x237   : > { %v2898_v39 = vpack.c.bf16 %v2718_v47, %v2697_v14  ;;  %v2454_v25 = vmul.f32 %v2357_v3, %v2357_v3  ;;  %vm2728_vm10 = vcmp.eq.f32.partialorder %v5628_v41, inf  ;;  %vm2730_vm11 = vcmp.eq.f32.partialorder %v5628_v41, 0.0  ;;  %v5804_v61 = vpop.eup %4398 }
 0x238   : > { %v2501_v13 = vadd.f32 %v2453_v38, %v5377_v12  ;;  %v2729_v45 = vsel %vm2728_vm10, %v5628_v41, %v2727_v9  ;;  %v2731_v63 = vand.u32 2147483648, %v5628_v41  ;;  %v2748_v58 = vmul.f32 %v5732_v40, %v5659_v31 }
 0x239   : > { %vm2786_vm12 = vcmp.eq.f32.partialorder %v5373_v44, 0.0  ;;  %3891 = vmatmul.mubr.bf16.gmra.mxu1 %v2898_v39  ;;  %v2502_v21 = vadd.f32 %v2454_v25, %v5483_v26  ;;  %vm2749_vm13 = vcmp.eq.f32.partialorder %v5659_v31, inf  ;;  %v2752_v49 = vand.u32 2147483648, %v5659_v31  ;;  %v6094_v25 = vld [vmem:[#allocation24_spill] sm:$0xff] }
 0x23a   : > { %v2734_v52 = vmul.f32 %v5716_v10, %v5644_v35  ;;  %4406 = vrsqrt.f32 %v5800_v36  ;;  %v5818_v12 = vadd.f32 1e-06, %v2501_v13  ;;  %v2750_v55 = vsel %vm2749_vm13, %v5659_v31, %v2748_v58 }
 0x23b   : > { %vm2751_vm14 = vcmp.eq.f32.partialorder %v5659_v31, 0.0  ;;  %v5822_v40 = vadd.f32 1e-06, %v2502_v21  ;;  %v2732_v26 = vsel %vm2730_vm11, %v2731_v63, %v2729_v45  ;;  %vm2735_vm15 = vcmp.eq.f32.partialorder %v5644_v35, inf  ;;  %v6095_v63 = vld [vmem:[#allocation25_spill] sm:$0xff] }
 0x23c   : > { %v2753_v11 = vsel %vm2751_vm14, %v2752_v49, %v2750_v55  ;;  %v2736_v4 = vsel %vm2735_vm15, %v5644_v35, %v2734_v52  ;;  %vm2737_vm0 = vcmp.eq.f32.partialorder %v5644_v35, 0.0  ;;  %v2755_v10 = vmul.f32 %v5736_v0, %v5663_v54 }
 0x23d   : > { %v2900_v27 = vpack.c.bf16 %v2753_v11, %v2732_v26  ;;  %4408 = vrsqrt.f32 %v5818_v12  ;;  %v2738_v31 = vand.u32 2147483648, %v5644_v35  ;;  %vm2756_vm1 = vcmp.eq.f32.partialorder %v5663_v54, inf  ;;  %v6096_v26 = vld [vmem:[#allocation22_spill] sm:$0xff]  ;;  %v6097_v11 = vld [vmem:[#allocation23_spill] sm:$0xff] }
 0x23e   : > { %v2759_v41 = vand.u32 2147483648, %v5663_v54  ;;  %v4401_v20 = vpop.eup %4400  ;;  %4410 = vrsqrt.f32 %v5822_v40  ;;  %v2757_v46 = vsel %vm2756_vm1, %v5663_v54, %v2755_v10  ;;  %vm2758_vm2 = vcmp.eq.f32.partialorder %v5663_v54, 0.0 }
 0x23f   : > { %3167 = vmatprep.mubr.bf16.mxu0 %v2900_v27  ;;  %v2769_v51 = vmul.f32 %v5745_v59, %v5676_v18  ;;  %v4403_v0 = vpop.eup %4402  ;;  %v6091_v30 = vpack.c.bf16 %v5395_v17, %v6090_v60  ;;  %v2739_v35 = vsel %vm2737_vm0, %v2738_v31, %v2736_v4  ;;  %vm2770_vm3 = vcmp.eq.f32.partialorder %v5676_v18, inf }
 0x240   : > { %v2760_v57 = vsel %vm2758_vm2, %v2759_v41, %v2757_v46  ;;  %v2790_v62 = vmul.f32 %v5764_v42, %v5693_v22  ;;  %v2773_v54 = vand.u32 2147483648, %v5676_v18  ;;  %vm2791_vm4 = vcmp.eq.f32.partialorder %v5693_v22, inf  ;;  %v5849_v59 = vpop.eup %4404 }
 0x241   : > { %3168 = vmatmul.mubr.bf16.gmra.mxu0 %v6091_v30  ;;  %v2901_v15 = vpack.c.bf16 %v2760_v57, %v2739_v35  ;;  %v2771_v32 = vsel %vm2770_vm3, %v5676_v18, %v2769_v51  ;;  %vm2772_vm5 = vcmp.eq.f32.partialorder %v5676_v18, 0.0  ;;  %v2794_v43 = vand.u32 2147483648, %v5693_v22 }
 0x242   : > { %v2792_v17 = vsel %vm2791_vm4, %v5693_v22, %v2790_v62  ;;  %v6092_v2 = vand.u32 2147483648, %v5373_v44  ;;  %vm2805_vm6 = vcmp.eq.f32.partialorder %v5447_v37, inf  ;;  %v2774_v29 = vsel %vm2772_vm5, %v2773_v54, %v2771_v32 }
 0x243   : > { %3894 = vmatprep.mubr.bf16.mxu1 %v2901_v15  ;;  %vm2793_vm7 = vcmp.eq.f32.partialorder %v5693_v22, 0.0  ;;  %v2776_v18 = vmul.f32 %v5754_v33, %v5684_v28  ;;  %vm2826_vm8 = vcmp.eq.f32.partialorder %v6093_v19, inf  ;;  %vm2777_vm9 = vcmp.eq.f32.partialorder %v5684_v28, inf }
 0x244   : > { %v2788_v42 = vsel %vm2786_vm12, %v6092_v2, %v5779_v1  ;;  %v2795_v7 = vsel %vm2793_vm7, %v2794_v43, %v2792_v17  ;;  %v2780_v8 = vand.u32 2147483648, %v5684_v28  ;;  %v2797_v44 = vmul.f32 %v5792_v50, %v5705_v24  ;;  %v6101_v17 = vld [vmem:[#allocation27_spill] sm:$0xff] }
 0x245   : > { %v2902_v23 = vpack.c.bf16 %v2788_v42, %v5773_v34  ;;  %vm2807_vm10 = vcmp.eq.f32.partialorder %v5447_v37, 0.0  ;;  %vm2828_vm11 = vcmp.eq.f32.partialorder %v6093_v19, 0.0  ;;  %v2903_v22 = vpack.c.bf16 %v2795_v7, %v2774_v29 }
 0x246   : > { %v2778_v34 = vsel %vm2777_vm9, %v5684_v28, %v2776_v18  ;;  %vm2798_vm12 = vcmp.eq.f32.partialorder %v5705_v24, inf  ;;  %v2801_v33 = vand.u32 2147483648, %v5705_v24  ;;  %vm2779_vm13 = vcmp.eq.f32.partialorder %v5684_v28, 0.0 }
 0x247   : > { %v2799_v1 = vsel %vm2798_vm12, %v5705_v24, %v2797_v44  ;;  %vm2800_vm14 = vcmp.eq.f32.partialorder %v5705_v24, 0.0  ;;  %v2811_v50 = vmul.f32 %v5798_v56, %v5710_v53  ;;  %3175 = vmatprep.mubr.bf16.mxu0 %v2903_v22  ;;  %v2781_v3 = vsel %vm2779_vm13, %v2780_v8, %v2778_v34  ;;  %v4407_v47 = vpop.eup %4406 }
 0x248   : > { %v2802_v9 = vsel %vm2800_vm14, %v2801_v33, %v2799_v1  ;;  %vm2812_vm15 = vcmp.eq.f32.partialorder %v5710_v53, inf  ;;  %v2832_v14 = vmul.f32 %v4401_v20, %v5751_v6  ;;  %v2815_v28 = vand.u32 2147483648, %v5710_v53 }
 0x249   : > { %3176 = vmatmul.mubr.bf16.gmra.mxu0 %v2902_v23  ;;  %v2904_v38 = vpack.c.bf16 %v2802_v9, %v2781_v3  ;;  %v2813_v39 = vsel %vm2812_vm15, %v5710_v53, %v2811_v50  ;;  %vm2833_vm0 = vcmp.eq.f32.partialorder %v5751_v6, inf  ;;  %vm2814_vm1 = vcmp.eq.f32.partialorder %v5710_v53, 0.0 }
 0x24a   : > { %v2834_v24 = vsel %vm2833_vm0, %v5751_v6, %v2832_v14  ;;  %v2836_v56 = vand.u32 2147483648, %v5751_v6  ;;  %v2804_v13 = vmul.f32 %v6094_v25, %v5447_v37  ;;  %v2816_v45 = vsel %vm2814_vm1, %v2815_v28, %v2813_v39  ;;  %v4409_v49 = vpop.eup %4408 }
 0x24b   : > { %3895 = vmatmul.mubr.bf16.gmra.mxu1 %v2904_v38  ;;  %vm2835_vm2 = vcmp.eq.f32.partialorder %v5751_v6, 0.0  ;;  %v2825_v58 = vmul.f32 %v6095_v63, %v6093_v19  ;;  %v2818_v21 = vmul.f32 %v5804_v61, %v5725_v16  ;;  %vm2819_vm3 = vcmp.eq.f32.partialorder %v5725_v16, inf  ;;  %v4411_v6 = vpop.eup %4410 }
 0x24c   : > { %v2837_v52 = vsel %vm2835_vm2, %v2836_v56, %v2834_v24  ;;  %v2806_v53 = vsel %vm2805_vm6, %v5447_v37, %v2804_v13  ;;  %v2839_v55 = vmul.f32 %v4403_v0, %v5756_v5  ;;  %vm2847_vm4 = vcmp.eq.f32.partialorder %v6096_v26, inf }
 0x24d   : > { %vm2868_vm5 = vcmp.eq.f32.partialorder %v6097_v11, inf  ;;  %v2906_v27 = vpack.c.bf16 %v2837_v52, %v2816_v45  ;;  %v2827_v61 = vsel %vm2826_vm8, %v6093_v19, %v2825_v58  ;;  %v2820_v4 = vsel %vm2819_vm3, %v5725_v16, %v2818_v21 }
 0x24e   : > { %vm2821_vm7 = vcmp.eq.f32.partialorder %v5725_v16, 0.0  ;;  %vm2849_vm6 = vcmp.eq.f32.partialorder %v6096_v26, 0.0  ;;  %v6098_v10 = vand.u32 2147483648, %v5447_v37  ;;  %v6099_v41 = vand.u32 2147483648, %v6093_v19 }
 0x24f   : > { %v2822_v46 = vand.u32 2147483648, %v5725_v16  ;;  %vm2840_vm8 = vcmp.eq.f32.partialorder %v5756_v5, inf  ;;  %3183 = vmatprep.mubr.bf16.mxu0 %v2906_v27  ;;  %v2843_v60 = vand.u32 2147483648, %v5756_v5  ;;  %v2853_v30 = vmul.f32 %v5849_v59, %v5758_v48 }
 0x250   : > { %v2809_v31 = vsel %vm2807_vm10, %v6098_v10, %v2806_v53  ;;  %v2830_v20 = vsel %vm2828_vm11, %v6099_v41, %v2827_v61  ;;  %v2841_v0 = vsel %vm2840_vm8, %v5756_v5, %v2839_v55  ;;  %vm2842_vm9 = vcmp.eq.f32.partialorder %v5756_v5, 0.0  ;;  %v6100_v5 = vld [vmem:[#allocation26_spill] sm:$0xff] }
 0x251   : > { %v2905_v51 = vpack.c.bf16 %v2830_v20, %v2809_v31  ;;  %v2823_v37 = vsel %vm2821_vm7, %v2822_v46, %v2820_v4  ;;  %vm2854_vm10 = vcmp.eq.f32.partialorder %v5758_v48, inf  ;;  %v2874_v35 = vmul.f32 %v4409_v49, %v5818_v12 }
 0x252   : > { %v2844_v16 = vsel %vm2842_vm9, %v2843_v60, %v2841_v0  ;;  %v2855_v57 = vsel %vm2854_vm10, %v5758_v48, %v2853_v30  ;;  %vm2856_vm11 = vcmp.eq.f32.partialorder %v5758_v48, 0.0  ;;  %vm2875_vm12 = vcmp.eq.f32.partialorder %v5818_v12, inf }
 0x253   : > { %3184 = vmatmul.mubr.bf16.gmra.mxu0 %v2905_v51  ;;  %v2907_v62 = vpack.c.bf16 %v2844_v16, %v2823_v37  ;;  %v2857_v15 = vand.u32 2147483648, %v5758_v48  ;;  %v2876_v32 = vsel %vm2875_vm12, %v5818_v12, %v2874_v35  ;;  %v2878_v54 = vand.u32 2147483648, %v5818_v12 }
 0x254   : > { %vm2877_vm13 = vcmp.eq.f32.partialorder %v5818_v12, 0.0  ;;  %v2846_v59 = vmul.f32 %v6100_v5, %v6096_v26  ;;  %v2867_v43 = vmul.f32 %v6101_v17, %v6097_v11  ;;  %v2860_v2 = vmul.f32 %v4407_v47, %v5800_v36 }
 0x255   : > { %3898 = vmatprep.mubr.bf16.mxu1 %v2907_v62  ;;  %v2858_v42 = vsel %vm2856_vm11, %v2857_v15, %v2855_v57  ;;  %v2879_v29 = vsel %vm2877_vm13, %v2878_v54, %v2876_v32  ;;  %vm2870_vm14 = vcmp.eq.f32.partialorder %v6097_v11, 0.0  ;;  %v2871_v48 = vand.u32 2147483648, %v6097_v11 }
 0x256   : > { %v2909_v23 = vpack.c.bf16 %v2879_v29, %v2858_v42  ;;  %v2848_v12 = vsel %vm2847_vm4, %v6096_v26, %v2846_v59  ;;  %v2869_v18 = vsel %vm2868_vm5, %v6097_v11, %v2867_v43  ;;  %vm2861_vm15 = vcmp.eq.f32.partialorder %v5800_v36, inf }
 0x257   : > { %v6102_v19 = vand.u32 2147483648, %v6096_v26  ;;  %v2872_v8 = vsel %vm2870_vm14, %v2871_v48, %v2869_v18  ;;  %v2862_v44 = vsel %vm2861_vm15, %v5800_v36, %v2860_v2  ;;  %v2881_v22 = vmul.f32 %v4411_v6, %v5822_v40 }
 0x258   : > { %3191 = vmatprep.mubr.bf16.mxu0 %v2909_v23  ;;  %v2864_v33 = vand.u32 2147483648, %v5800_v36  ;;  %vm2882_vm0 = vcmp.eq.f32.partialorder %v5822_v40, inf  ;;  %v2885_v1 = vand.u32 2147483648, %v5822_v40  ;;  %vm2863_vm1 = vcmp.eq.f32.partialorder %v5800_v36, 0.0 }
 0x259   : > { %v2851_v7 = vsel %vm2849_vm6, %v6102_v19, %v2848_v12  ;;  %v2883_v50 = vsel %vm2882_vm0, %v5822_v40, %v2881_v22  ;;  %vm2884_vm2 = vcmp.eq.f32.partialorder %v5822_v40, 0.0 }
 0x25a   : > { %v2908_v34 = vpack.c.bf16 %v2872_v8, %v2851_v7  ;;  %v2865_v3 = vsel %vm2863_vm1, %v2864_v33, %v2862_v44  ;;  %v2886_v9 = vsel %vm2884_vm2, %v2885_v1, %v2883_v50 }
 0x25b   : > { %v2910_v14 = vpack.c.bf16 %v2886_v9, %v2865_v3 }
 0x25c   : > { %3192 = vmatmul.mubr.bf16.gmra.mxu0 %v2908_v34 }
 0x25d   : > { %3899 = vmatmul.mubr.bf16.gmra.mxu1 %v2910_v14 }
 0x2d5   : > { %v3806_v47 = vpop.f32.mrf.mxu0 }
 0x2d7   : > { %v3807_v38 = vpop.f32.mrf.mxu0 }
 0x2d8   : > { %v3808_v25 = vadd.f32 %v3807_v38, %v3806_v47 }
 0x2d9   : > { %v3809_v39 = vpop.f32.mrf.mxu0 }
 0x2db   : > { %v3810_v28 = vpop.f32.mrf.mxu0 }
 0x2dc   : > { %v3811_v49 = vadd.f32 %v3810_v28, %v3809_v39 }
 0x2dd   : > { %v3888_v56 = vpop.f32.mrf.mxu1 }
 0x2de   : > { %v3812_v24 = vpop.f32.mrf.mxu0 }
 0x2df   : > { %v3234_v63 = vpop.f32.mrf.mxu1 }
 0x2e0   : > { %v3813_v13 = vpop.f32.mrf.mxu0  ;;  %v3235_v36 = vadd.f32 %v3808_v25, %v3234_v63 }
 0x2e1   : > { %v3814_v45 = vadd.f32 %v3813_v13, %v3812_v24  ;;  %v3889_v21 = vpop.f32.mrf.mxu1 }
 0x2e2   : > { %v3815_v58 = vpop.f32.mrf.mxu0  ;;  %v3297_v52 = vmax.f32 %v3235_v36, 1e-05 }
 0x2e3   : > { %v3243_v40 = vadd.f32 %v3888_v56, %v3814_v45  ;;  %v3237_v26 = vpop.f32.mrf.mxu1 }
 0x2e4   : > { %v3816_v53 = vpop.f32.mrf.mxu0  ;;  %4412 = vlog2.f32 %v3297_v52  ;;  %v3238_v11 = vadd.f32 %v3811_v49, %v3237_v26 }
 0x2e5   : > { %v3817_v55 = vadd.f32 %v3816_v53, %v3815_v58  ;;  %v3299_v6 = vmax.f32 %v3243_v40, 1e-05 }
 0x2e6   : > { %v3298_v61 = vmax.f32 %v3238_v11, 1e-05 }
 0x2e7   : > { %v3246_v27 = vadd.f32 %v3889_v21, %v3817_v55 }
 0x2e8   : > { %4414 = vlog2.f32 %v3298_v61 }
 0x2e9   : > { %v3818_v4 = vpop.f32.mrf.mxu0  ;;  %4416 = vlog2.f32 %v3299_v6  ;;  %v3300_v31 = vmax.f32 %v3246_v27, 1e-05 }
 0x2eb   : > { %v3819_v10 = vpop.f32.mrf.mxu0  ;;  %4418 = vlog2.f32 %v3300_v31 }
 0x2ec   : > { %v3820_v62 = vadd.f32 %v3819_v10, %v3818_v4 }
 0x2ed   : > { %v3821_v41 = vpop.f32.mrf.mxu0 }
 0x2ef   : > { %v3822_v20 = vpop.f32.mrf.mxu0 }
 0x2f0   : > { %v3823_v2 = vadd.f32 %v3822_v20, %v3821_v41 }
 0x2f1   : > { %v4413_v46 = vpop.eup %4412 }
 0x2f2   : > { %v3314_v51 = vmul.f32 0.6931472, %v4413_v46 }
 0x2f4   : > { %3345 = vxpose.xlu0.b32.start [1/16] %v3314_v51, 128 }
 0x2f5   : > { %v4415_v60 = vpop.eup %4414 }
 0x2f6   : > { %v3824_v0 = vpop.f32.mrf.mxu0  ;;  %v3316_v37 = vmul.f32 0.6931472, %v4415_v60  ;;  %v4417_v35 = vpop.eup %4416 }
 0x2f7   : > { %v3318_v5 = vmul.f32 0.6931472, %v4417_v35 }
 0x2f8   : > { %v3825_v30 = vpop.f32.mrf.mxu0  ;;  %3346 = vxpose.xlu0.b32.cont [2/16] %v3316_v37, 128  ;;  %v4419_v59 = vpop.eup %4418 }
 0x2f9   : > { %v3892_v57 = vpop.f32.mrf.mxu1  ;;  %v3826_v15 = vadd.f32 %v3825_v30, %v3824_v0  ;;  %v3320_v18 = vmul.f32 0.6931472, %v4419_v59 }
 0x2fa   : > { %v3827_v16 = vpop.f32.mrf.mxu0 }
 0x2fb   : > { %v3250_v32 = vpop.f32.mrf.mxu1  ;;  %v3259_v42 = vadd.f32 %v3892_v57, %v3826_v15 }
 0x2fc   : > { %v3828_v54 = vpop.f32.mrf.mxu0  ;;  %v3251_v17 = vadd.f32 %v3820_v62, %v3250_v32  ;;  %3347 = vxpose.xlu0.b32.cont [3/16] %v3318_v5, 128 }
 0x2fd   : > { %v3893_v43 = vpop.f32.mrf.mxu1  ;;  %v3829_v48 = vadd.f32 %v3828_v54, %v3827_v16  ;;  %v3303_v8 = vmax.f32 %v3259_v42, 1e-05 }
 0x2fe   : > { %v3301_v29 = vmax.f32 %v3251_v17, 1e-05 }
 0x2ff   : > { %v3253_v23 = vpop.f32.mrf.mxu1  ;;  %v3262_v44 = vadd.f32 %v3893_v43, %v3829_v48 }
 0x300   : > { %4420 = vlog2.f32 %v3301_v29  ;;  %v3254_v19 = vadd.f32 %v3823_v2, %v3253_v23  ;;  %3348 = vxpose.xlu0.b32.cont [4/16] %v3320_v18, 128 }
 0x301   : > { %v3830_v12 = vpop.f32.mrf.mxu0  ;;  %v3304_v1 = vmax.f32 %v3262_v44, 1e-05 }
 0x302   : > { %v3302_v22 = vmax.f32 %v3254_v19, 1e-05 }
 0x303   : > { %v3831_v7 = vpop.f32.mrf.mxu0 }
 0x304   : > { %4422 = vlog2.f32 %v3302_v22  ;;  %v3832_v14 = vadd.f32 %v3831_v7, %v3830_v12 }
 0x305   : > { %v3833_v34 = vpop.f32.mrf.mxu0  ;;  %4424 = vlog2.f32 %v3303_v8 }
 0x306   : > { %4426 = vlog2.f32 %v3304_v1 }
 0x307   : > { %v3834_v33 = vpop.f32.mrf.mxu0 }
 0x308   : > { %v3835_v13 = vadd.f32 %v3834_v33, %v3833_v34 }
 0x309   : > { %v3836_v50 = vpop.f32.mrf.mxu0 }
 0x30b   : > { %v3896_v3 = vpop.f32.mrf.mxu1  ;;  %v3837_v9 = vpop.f32.mrf.mxu0 }
 0x30c   : > { %v3838_v47 = vadd.f32 %v3837_v9, %v3836_v50 }
 0x30d   : > { %v3266_v38 = vpop.f32.mrf.mxu1  ;;  %v3839_v39 = vpop.f32.mrf.mxu0 }
 0x30e   : > { %v3267_v28 = vadd.f32 %v3832_v14, %v3266_v38  ;;  %v4421_v24 = vpop.eup %4420  ;;  %v3275_v36 = vadd.f32 %v3896_v3, %v3838_v47 }
 0x30f   : > { %v3897_v56 = vpop.f32.mrf.mxu1  ;;  %v3840_v25 = vpop.f32.mrf.mxu0  ;;  %v3322_v63 = vmul.f32 0.6931472, %v4421_v24 }
 0x310   : > { %v3305_v45 = vmax.f32 %v3267_v28, 1e-05  ;;  %v3841_v58 = vadd.f32 %v3840_v25, %v3839_v39  ;;  %v3307_v6 = vmax.f32 %v3275_v36, 1e-05 }
 0x311   : > { %v3269_v21 = vpop.f32.mrf.mxu1  ;;  %3349 = vxpose.xlu0.b32.cont [5/16] %v3322_v63, 128  ;;  %v4423_v52 = vpop.eup %4422 }
 0x312   : > { %v3270_v40 = vadd.f32 %v3835_v13, %v3269_v21  ;;  %4428 = vlog2.f32 %v3305_v45  ;;  %v3324_v26 = vmul.f32 0.6931472, %v4423_v52  ;;  %v4425_v11 = vpop.eup %4424  ;;  %v3278_v27 = vadd.f32 %v3897_v56, %v3841_v58 }
 0x313   : > { %v3842_v49 = vpop.f32.mrf.mxu0  ;;  %v3326_v10 = vmul.f32 0.6931472, %v4425_v11  ;;  %v4427_v31 = vpop.eup %4426 }
 0x314   : > { %v3306_v55 = vmax.f32 %v3270_v40, 1e-05  ;;  %v3308_v41 = vmax.f32 %v3278_v27, 1e-05  ;;  %v3328_v0 = vmul.f32 0.6931472, %v4427_v31 }
 0x315   : > { %v3843_v53 = vpop.f32.mrf.mxu0  ;;  %3350 = vxpose.xlu0.b32.cont [6/16] %v3324_v26, 128 }
 0x316   : > { %4430 = vlog2.f32 %v3306_v55  ;;  %v3844_v60 = vadd.f32 %v3843_v53, %v3842_v49 }
 0x317   : > { %v3845_v61 = vpop.f32.mrf.mxu0  ;;  %4432 = vlog2.f32 %v3307_v6 }
 0x318   : > { %4434 = vlog2.f32 %v3308_v41 }
 0x319   : > { %v3846_v4 = vpop.f32.mrf.mxu0  ;;  %3351 = vxpose.xlu0.b32.cont [7/16] %v3326_v10, 128 }
 0x31a   : > { %v3847_v15 = vadd.f32 %v3846_v4, %v3845_v61 }
 0x31c   : > { %v3848_v20 = vpop.f32.mrf.mxu0 }
 0x31d   : > { %v3900_v51 = vpop.f32.mrf.mxu1  ;;  %3352 = vxpose.xlu0.b32.cont [8/16] %v3328_v0, 128 }
 0x31e   : > { %v3849_v46 = vpop.f32.mrf.mxu0 }
 0x31f   : > { %v3850_v30 = vadd.f32 %v3849_v46, %v3848_v20  ;;  %v3282_v35 = vpop.f32.mrf.mxu1  ;;  %v4429_v62 = vpop.eup %4428 }
 0x320   : > { %v3851_v37 = vpop.f32.mrf.mxu0  ;;  %v3283_v16 = vadd.f32 %v3844_v60, %v3282_v35  ;;  %v3330_v17 = vmul.f32 0.6931472, %v4429_v62 }
 0x321   : > { %v3901_v32 = vpop.f32.mrf.mxu1  ;;  %v3291_v54 = vadd.f32 %v3900_v51, %v3850_v30 }
 0x322   : > { %v3852_v57 = vpop.f32.mrf.mxu0  ;;  %v3309_v5 = vmax.f32 %v3283_v16, 1e-05  ;;  %3353 = vxpose.xlu0.b32.cont [9/16] %v3330_v17, 128 }
 0x323   : > { %v3853_v59 = vadd.f32 %v3852_v57, %v3851_v37  ;;  %v3285_v43 = vpop.f32.mrf.mxu1  ;;  %v4431_v42 = vpop.eup %4430  ;;  %v3311_v29 = vmax.f32 %v3291_v54, 1e-05 }
 0x324   : > { %4436 = vlog2.f32 %v3309_v5  ;;  %v3286_v2 = vadd.f32 %v3847_v15, %v3285_v43  ;;  %v3332_v12 = vmul.f32 0.6931472, %v4431_v42  ;;  %v4433_v18 = vpop.eup %4432 }
 0x325   : > { %v3294_v48 = vadd.f32 %v3901_v32, %v3853_v59  ;;  %v3334_v7 = vmul.f32 0.6931472, %v4433_v18  ;;  %v4435_v8 = vpop.eup %4434 }
 0x326   : > { %v3310_v23 = vmax.f32 %v3286_v2, 1e-05  ;;  %3354 = vxpose.xlu0.b32.cont [10/16] %v3332_v12, 128  ;;  %v3336_v44 = vmul.f32 0.6931472, %v4435_v8 }
 0x327   : > { %v3312_v19 = vmax.f32 %v3294_v48, 1e-05 }
 0x328   : > { %4438 = vlog2.f32 %v3310_v23 }
 0x329   : > { %4440 = vlog2.f32 %v3311_v29 }
 0x32a   : > { %3355 = vxpose.xlu0.b32.cont [11/16] %v3334_v7, 128  ;;  %4442 = vlog2.f32 %v3312_v19 }
 0x32e   : > { %3356 = vxpose.xlu0.b32.cont [12/16] %v3336_v44, 128 }
 0x331   : > { %v4437_v22 = vpop.eup %4436 }
 0x332   : > { %v3338_v34 = vmul.f32 0.6931472, %v4437_v22 }
 0x334   : > { %3357 = vxpose.xlu0.b32.cont [13/16] %v3338_v34, 128 }
 0x335   : > { %v4439_v33 = vpop.eup %4438 }
 0x336   : > { %v3340_v1 = vmul.f32 0.6931472, %v4439_v33  ;;  %v4441_v50 = vpop.eup %4440 }
 0x337   : > { %v3342_v3 = vmul.f32 0.6931472, %v4441_v50  ;;  %v4443_v9 = vpop.eup %4442 }
 0x338   : > { %3358 = vxpose.xlu0.b32.cont [14/16] %v3340_v1, 128  ;;  %v3344_v14 = vmul.f32 0.6931472, %v4443_v9 }
 0x33c   : > { %3359 = vxpose.xlu0.b32.cont [15/16] %v3342_v3, 128 }
 0x340   : > { %3360 = vxpose.xlu0.b32.end [16/16] %v3344_v14, 128 }
 0x380   : > { %v3361_v47 = vpop.trf.xlu0 }
 0x381   : > { %3377 = vst [vmem:[%s5958_s23] sm:$0xff] %v3361_v47 }
 0x384   : > { %v3362_v38 = vpop.trf.xlu0 }
 0x385   : > { %3378 = vst [vmem:[%s5958_s23 + $0x8] sm:$0xff] %v3362_v38 }
 0x388   : > { %v3363_v39 = vpop.trf.xlu0 }
 0x389   : > { %3379 = vst [vmem:[%s5958_s23 + $0x10] sm:$0xff] %v3363_v39 }
 0x38c   : > { %v3364_v28 = vpop.trf.xlu0 }
 0x38d   : > { %3380 = vst [vmem:[%s5958_s23 + $0x18] sm:$0xff] %v3364_v28 }
 0x390   : > { %v3365_v24 = vpop.trf.xlu0 }
 0x391   : > { %3381 = vst [vmem:[%s5958_s23 + $0x20] sm:$0xff] %v3365_v24 }
 0x394   : > { %v3366_v56 = vpop.trf.xlu0 }
 0x395   : > { %3382 = vst [vmem:[%s5958_s23 + $0x28] sm:$0xff] %v3366_v56 }
 0x398   : > { %v3367_v25 = vpop.trf.xlu0 }
 0x399   : > { %3383 = vst [vmem:[%s5958_s23 + $0x30] sm:$0xff] %v3367_v25 }
 0x39c   : > { %v3368_v13 = vpop.trf.xlu0 }
 0x39d   : > { %3384 = vst [vmem:[%s5958_s23 + $0x38] sm:$0xff] %v3368_v13 }
 0x3a0   : > { %v3369_v45 = vpop.trf.xlu0 }
 0x3a1   : > { %3385 = vst [vmem:[%s5958_s23 + $0x40] sm:$0xff] %v3369_v45 }
 0x3a4   : > { %v3370_v63 = vpop.trf.xlu0 }
 0x3a5   : > { %3386 = vst [vmem:[%s5958_s23 + $0x48] sm:$0xff] %v3370_v63 }
 0x3a8   : > { %v3371_v36 = vpop.trf.xlu0 }
 0x3a9   : > { %3387 = vst [vmem:[%s5958_s23 + $0x50] sm:$0xff] %v3371_v36 }
 0x3ac   : > { %v3372_v58 = vpop.trf.xlu0 }
 0x3ad   : > { %3388 = vst [vmem:[%s5958_s23 + $0x58] sm:$0xff] %v3372_v58 }
 0x3b0   : > { %v3373_v21 = vpop.trf.xlu0 }
 0x3b1   : > { %3389 = vst [vmem:[%s5958_s23 + $0x60] sm:$0xff] %v3373_v21 }
 0x3b4   : > { %v3374_v49 = vpop.trf.xlu0 }
 0x3b5   : > { %3390 = vst [vmem:[%s5958_s23 + $0x68] sm:$0xff] %v3374_v49 }
 0x3b8   : > { %v3375_v40 = vpop.trf.xlu0 }
 0x3b9   : > { %3391 = vst [vmem:[%s5958_s23 + $0x70] sm:$0xff] %v3375_v40 }
 0x3bc   : > { %v3376_v52 = vpop.trf.xlu0 }
 0x3bd   : > { %3392 = vst [vmem:[%s5958_s23 + $0x78] sm:$0xff] %v3376_v52 }
 0x3be   : > { %4571 = shalt.err (!%p4568_p1)
}
 0x3bf   : > { %s4572_s7 = scalar_lea.hbm %s5980_s13, 2048  ;;  %s4576_s12 = scalar_lea.hbm %s6035_s4, 4096 }
 0x3c0   : > { %p4573_p2 = scmp.ne.s32.totalorder %s5980_s13, %s4572_s7  ;;  %p4577_p13 = scmp.lt.s32.totalorder %s5980_s13, %s6035_s4 }
 0x3c1   : > { %p4578_p0 = scmp.lt.s32.totalorder %s4576_s12, %s4572_s7 }
 0x3c2   : > { %p4574_p6 = pnand %p4573_p2, %p4782_p9 }
 0x3c3   : > { %p4579_p12 = por %p4578_p0, %p4577_p13 }
 0x3c4   : > { %p4575_p8 = pneg %p4574_p6 }
 0x3c6   : > { %p4580_p4 = pnand %p4579_p12, %p4575_p8 }
 0x3c8   : > { %4583 = shalt.err (!%p4580_p4)
}
 0x3c9   : > { %s4661_s19 = smov 128   ;;  %s4662_s17 = smov 8  }
 0x3ca   : > { %3914 = dma.vmem_to_hbm [thread:$0]  (%p4782_p9), %s5982_s5, 2048, %s5980_s13, %s3394_s14, %s4661_s19, %s4661_s19, %s4662_s17  }
 0x3cb PF: > { %s3423_s25 = sand.u32 1, %s4630_s15   ;;  %p6103_p3 = scmp.ne.s32.totalorder %s6054_s24, 0 }
 0x3cc   : > { %p6104_p7 = scmp.ge.s32.totalorder %s4650_s20, 2  ;;  %s3424_s11 = scalar_lea.sflag [#allocation4], %s3423_s25 }
 0x3ce   : > { %p3931_p11 = pnand %p6104_p7, %p6103_p3 }
 0x3d0   : > { %p3932_p5 = pneg %p3931_p11 }
 0x3d2   : > { %4625 = dma.done.wait (%p3932_p5), %s3424_s11, 2048  }
 0x3d3   : > { %4627 = vsyncadd (%p3932_p5), %s3424_s11, 4294965248  ;;  %s24_s20 = sadd.s32 1, %s4650_s20   ;;  %s6105_s22 = sld [smem:[#allocation16_spill]] }
 0x3d4   : > { %p21_p10 = scmp.ge.s32.totalorder %s24_s20, 4   ;;  %s6106_s17 = sld [smem:[#allocation19_spill]] }
 0x3d5   : > { %s6107_s18 = sld [smem:[#allocation17_spill]]  ;;  %s6109_s15 = smov %s4634_s16 }
 0x3d6   : > { %s6108_s19 = sld [smem:[#allocation18_spill]]  ;;  %23 = sbr.rel (!%p21_p10) target bundleno = 13 (0xd), region = 102 }
 0x3d9   : > { %s6110_s16 = smov %s6105_s22 }
 0x3db   :  { %3429 = vsyncpa [#allocation3], 1 }
 0x3dc   :  { %3431 = vsyncpa [#allocation3 + $0x1], 1 }
 0x3dd   :  { %3432 = vsyncpa [#allocation6], 1 }
 0x3de   :  { %3434 = vsyncpa [#allocation6 + $0x1], 1 }
 0x3df   :  { %3435 = vsyncpa [#allocation9], 1 }
 0x3e0   :  { %3436 = vsyncpa [#allocation4], 1 }
 0x3e1   :  { %3438 = vsyncpa [#allocation4 + $0x1], 1 }

</bundles_post_ra>
